<compile_context>
chip_gen: v7x
topology: tpu7x:2x2x1
jax: 0.10.0
libtpu: 0.0.40
codegen_flags: <defaults>
</compile_context>

<pallas_src>
import jax
import jax.numpy as jnp
from jax.experimental import pallas as pl
from jax.experimental.pallas import tpu as pltpu

NEF = 256


# --------------------------------------------------------------------------
# Fused Pallas kernel (one grid step == one batch element)
# --------------------------------------------------------------------------
def _fused_head_kernel(x6e_ref, wf_ref, x7c_ref, wc_ref, b_ref,
                       feat_ref, code_ref):
    # x6e_ref : (1, 768, 289)  bf16   Mixed_6e activation, NCHW flattened
    # wf_ref  : (256, 768)     bf16   conv1x1 weight (O, Cin)
    # x7c_ref : (1, 2048, 64)  bf16   Mixed_7c activation, NCHW flattened
    # wc_ref  : (256, 2048)    bf16   Linear weight (O, Cin)
    # b_ref   : (256, 1)       f32    Linear bias
    # feat_ref: (1, 256, 289)  f32    conv1x1 output (NCHW flattened)
    # code_ref: (1, 256, 1)    f32    cnn_code output

    # 1x1 conv as a per-batch matmul: [256,768] @ [768,289] -> [256,289]
    feat_ref[0] = jnp.dot(wf_ref[...], x6e_ref[0],
                          preferred_element_type=jnp.float32)

    # F.avg_pool2d(x,8) + Linear, fused.  Linearity lets us matmul first
    # (full-K MXU work) and average the 64 spatial columns afterwards:
    #   mean_s(W @ X[:, s]) == W @ mean_s(X)
    scores = jnp.dot(wc_ref[...], x7c_ref[0],
                     preferred_element_type=jnp.float32)          # (256, 64)
    code_ref[0] = jnp.mean(scores, axis=-1, keepdims=True) + b_ref[...]


# --------------------------------------------------------------------------
# Wrapper
# --------------------------------------------------------------------------
def cnn_encoder_head(feat_mixed_6e, feat_mixed_7c, w_feat, w_code, b_code):
    """Fused emb_features (conv1x1) + emb_cnn_code (avgpool+Linear) heads."""
    B, C6, H6, W6 = feat_mixed_6e.shape          # (B, 768, 17, 17)
    _, C7, H7, W7 = feat_mixed_7c.shape          # (B, 2048, 8, 8)
    O = w_feat.shape[0]
    S6 = H6 * W6                                  # 289
    S7 = H7 * W7                                  # 64

    # NCHW kept end-to-end: reshapes only (no data movement), bf16 operands
    # so the HBM->VMEM DMA moves half the bytes; accumulation stays f32.
    x6 = feat_mixed_6e.reshape(B, C6, S6).astype(jnp.bfloat16)
    x7 = feat_mixed_7c.reshape(B, C7, S7).astype(jnp.bfloat16)
    wf = w_feat.astype(jnp.bfloat16)              # (O, 768)
    wc = w_code.astype(jnp.bfloat16)              # (O, 2048)
    b2 = b_code.reshape(O, 1).astype(jnp.float32)

    feat3d, code3d = pl.pallas_call(
        _fused_head_kernel,
        out_shape=(
            jax.ShapeDtypeStruct((B, O, S6), jnp.float32),
            jax.ShapeDtypeStruct((B, O, 1), jnp.float32),
        ),
        grid=(B,),
        in_specs=[
            pl.BlockSpec((1, C6, S6), lambda b: (b, 0, 0)),   # x6e per batch
            pl.BlockSpec((O, C6), lambda b: (0, 0)),          # w_feat (resident)
            pl.BlockSpec((1, C7, S7), lambda b: (b, 0, 0)),   # x7c per batch
            pl.BlockSpec((O, C7), lambda b: (0, 0)),          # w_code (resident)
            pl.BlockSpec((O, 1), lambda b: (0, 0)),           # bias
        ],
        out_specs=(
            pl.BlockSpec((1, O, S6), lambda b: (b, 0, 0)),
            pl.BlockSpec((1, O, 1), lambda b: (b, 0, 0)),
        ),
        compiler_params=pltpu.CompilerParams(
            dimension_semantics=("parallel",)),
    )(x6, wf, x7, wc, b2)

    features = feat3d.reshape(B, O, H6, W6)       # free reshape, stays NCHW
    cnn_code = code3d.reshape(B, O)               # drop trailing size-1 dim
    return features, cnn_code


def cnn_encoder_forward(x, feat_mixed_6e, feat_mixed_7c, w_feat, w_code, b_code):
    """Reproduces CNN_ENCODER.forward's trainable tail on the backbone activations."""
    B = x.shape[0]
    # x = F.interpolate(x, size=(299, 299), mode='bilinear', align_corners=False)
    x_resized = jax.image.resize(x, (B, x.shape[1], 299, 299), method="bilinear")
    # TODO(synk): frozen torchvision inception_v3 backbone (Conv2d_1a_3x3 .. Mixed_7c,
    # incl. both intermediate max_pool2d calls) is an external pretrained module and
    # is not re-implemented; feat_mixed_6e / feat_mixed_7c stand in for its activations.
    del x_resized

    return cnn_encoder_head(feat_mixed_6e, feat_mixed_7c, w_feat, w_code, b_code)


# --------------------------------------------------------------------------
# Main
# --------------------------------------------------------------------------
if __name__ == "__main__":
    key = jax.random.PRNGKey(0)
    k1, k2, k3, k4, k5, k6 = jax.random.split(key, 6)
    B = 2

    # Module image input (NCHW) -- forward resizes it to 299x299 for the backbone.
    x = jax.random.normal(k1, (B, 3, 16, 16), jnp.float32)
    # Deterministic synthetic backbone activations at the real inception shapes.
    feat_mixed_6e = jax.random.normal(k2, (B, 768, 17, 17), jnp.float32)
    feat_mixed_7c = jax.random.normal(k3, (B, 2048, 8, 8), jnp.float32)

    # init_trainable_weights(): uniform(-0.1, 0.1) on the two trainable weights.
    initrange = 0.1
    w_feat = jax.random.uniform(k4, (NEF, 768), jnp.float32, -initrange, initrange)
    w_code = jax.random.uniform(k5, (NEF, 2048), jnp.float32, -initrange, initrange)
    bound = 1.0 / float(jnp.sqrt(2048.0))          # nn.Linear default bias init range
    b_code = jax.random.uniform(k6, (NEF,), jnp.float32, -bound, bound)

    features, cnn_code = jax.jit(cnn_encoder_forward)(
        x, feat_mixed_6e, feat_mixed_7c, w_feat, w_code, b_code)
    jax.block_until_ready((features, cnn_code))

    assert features.shape == (B, NEF, 17, 17)
    assert cnn_code.shape == (B, NEF)

    # Pure-JAX f32 reference for the translated head.  The kernel uses bf16
    # operands with f32 MXU accumulation, so a slightly looser tolerance than
    # pure-f32 is used (bf16 operand rounding ~1e-2 worst case here).
    ref_feat = jnp.einsum("oc,bchw->bohw", w_feat, feat_mixed_6e,
                          precision=jax.lax.Precision.HIGHEST)
    pooled = feat_mixed_7c.reshape(B, 2048, 64).mean(axis=-1)
    ref_code = jnp.dot(pooled, w_code.T,
                       precision=jax.lax.Precision.HIGHEST) + b_code

    assert jnp.allclose(features, ref_feat, atol=2e-2, rtol=2e-2)
    assert jnp.allclose(cnn_code, ref_code, atol=2e-2, rtol=2e-2)

    print("KERNEL_OK")
</pallas_src>

<mosaic_0001>
module attributes {stable_mosaic.version = 11 : i64} {
  func.func @_fused_head_kernel(%arg0: i32, %arg1: memref<1x768x289xbf16, #tpu.memory_space<vmem>>, %arg2: memref<256x768xbf16, #tpu.memory_space<vmem>>, %arg3: memref<1x2048x64xbf16, #tpu.memory_space<vmem>>, %arg4: memref<256x2048xbf16, #tpu.memory_space<vmem>>, %arg5: memref<256x1xf32, #tpu.memory_space<vmem>>, %arg6: memref<1x256x289xf32, #tpu.memory_space<vmem>>, %arg7: memref<1x256x1xf32, #tpu.memory_space<vmem>>) attributes {dimension_semantics = [#tpu.dimension_semantics<parallel>], iteration_bounds = array<i64: 2>, scalar_prefetch = 0 : i64, scratch_operands = 0 : i64, tpu.core_type = #tpu.core_type<tc>, window_params = [{transform_indices = @transform_0, window_bounds = array<i64: 1, 768, 289>}, {pipeline_mode = #tpu.pipeline_mode<synchronous>, transform_indices = @transform_1, window_bounds = array<i64: 256, 768>}, {transform_indices = @transform_2, window_bounds = array<i64: 1, 2048, 64>}, {pipeline_mode = #tpu.pipeline_mode<synchronous>, transform_indices = @transform_3, window_bounds = array<i64: 256, 2048>}, {pipeline_mode = #tpu.pipeline_mode<synchronous>, transform_indices = @transform_4, window_bounds = array<i64: 256, 1>}, {transform_indices = @transform_5, window_bounds = array<i64: 1, 256, 289>}, {transform_indices = @transform_6, window_bounds = array<i64: 1, 256, 1>}]} {
    %c0 = arith.constant 0 : index
    %c0_0 = arith.constant 0 : index
    %0 = vector.load %arg2[%c0, %c0_0] : memref<256x768xbf16, #tpu.memory_space<vmem>>, vector<256x768xbf16>
    %c0_1 = arith.constant 0 : index
    %c0_2 = arith.constant 0 : index
    %c0_3 = arith.constant 0 : index
    %1 = vector.load %arg1[%c0_1, %c0_2, %c0_3] : memref<1x768x289xbf16, #tpu.memory_space<vmem>>, vector<1x768x289xbf16>
    %2 = vector.shape_cast %1 : vector<1x768x289xbf16> to vector<768x289xbf16>
    %cst = arith.constant dense<0.000000e+00> : vector<256x289xf32>
    %3 = tpu.matmul %0, %2, %cst {dimension_numbers = #tpu.dot_dimension_numbers<[1], [0], [0], [1], [0, 0, 1, 1], [], []>} : vector<256x768xbf16>, vector<768x289xbf16>, vector<256x289xf32> -> vector<256x289xf32>
    %c0_4 = arith.constant 0 : index
    %c0_5 = arith.constant 0 : index
    %c0_6 = arith.constant 0 : index
    %4 = vector.load %arg6[%c0_4, %c0_5, %c0_6] : memref<1x256x289xf32, #tpu.memory_space<vmem>>, vector<1x256x289xf32>
    %5 = vector.shape_cast %4 : vector<1x256x289xf32> to vector<256x289xf32>
    %6 = vector.shape_cast %3 : vector<256x289xf32> to vector<1x256x289xf32>
    tpu.vector_store %arg6[%c0_4, %c0_5, %c0_6], %6 {strides = array<i32>} : memref<1x256x289xf32, #tpu.memory_space<vmem>>, vector<1x256x289xf32>,
    %c0_7 = arith.constant 0 : index
    %c0_8 = arith.constant 0 : index
    %7 = vector.load %arg4[%c0_7, %c0_8] : memref<256x2048xbf16, #tpu.memory_space<vmem>>, vector<256x2048xbf16>
    %c0_9 = arith.constant 0 : index
    %c0_10 = arith.constant 0 : index
    %c0_11 = arith.constant 0 : index
    %8 = vector.load %arg3[%c0_9, %c0_10, %c0_11] : memref<1x2048x64xbf16, #tpu.memory_space<vmem>>, vector<1x2048x64xbf16>
    %9 = vector.shape_cast %8 : vector<1x2048x64xbf16> to vector<2048x64xbf16>
    %cst_12 = arith.constant dense<0.000000e+00> : vector<256x64xf32>
    %10 = tpu.matmul %7, %9, %cst_12 {dimension_numbers = #tpu.dot_dimension_numbers<[1], [0], [0], [1], [0, 0, 1, 1], [], []>} : vector<256x2048xbf16>, vector<2048x64xbf16>, vector<256x64xf32> -> vector<256x64xf32>
    %cst_13 = arith.constant dense<0.000000e+00> : vector<256xf32>
    %11 = vector.multi_reduction <add>, %10, %cst_13 [1] : vector<256x64xf32> to vector<256xf32>
    %12 = vector.shape_cast %11 : vector<256xf32> to vector<256x1xf32>
    %cst_14 = arith.constant 6.400000e+01 : f32
    %13 = vector.broadcast %cst_14 : f32 to vector<256x1xf32>
    %14 = arith.divf %12, %13 : vector<256x1xf32>
    %c0_15 = arith.constant 0 : index
    %c0_16 = arith.constant 0 : index
    %15 = vector.load %arg5[%c0_15, %c0_16] : memref<256x1xf32, #tpu.memory_space<vmem>>, vector<256x1xf32>
    %16 = arith.addf %14, %15 : vector<256x1xf32>
    %c0_17 = arith.constant 0 : index
    %c0_18 = arith.constant 0 : index
    %c0_19 = arith.constant 0 : index
    %17 = vector.load %arg7[%c0_17, %c0_18, %c0_19] : memref<1x256x1xf32, #tpu.memory_space<vmem>>, vector<1x256x1xf32>
    %18 = vector.shape_cast %17 : vector<1x256x1xf32> to vector<256x1xf32>
    %19 = vector.shape_cast %16 : vector<256x1xf32> to vector<1x256x1xf32>
    tpu.vector_store %arg7[%c0_17, %c0_18, %c0_19], %19 {strides = array<i32>} : memref<1x256x1xf32, #tpu.memory_space<vmem>>, vector<1x256x1xf32>,
    return
  }
  func.func @transform_0(%arg0: i32) -> (i32, i32, i32) {
    %c0_i32 = arith.constant 0 : i32
    %c0_i32_0 = arith.constant 0 : i32
    %c0_i32_1 = arith.constant 0 : i32
    return %arg0, %c0_i32, %c0_i32_0 : i32, i32, i32
  }
  func.func @transform_1(%arg0: i32) -> (i32, i32) {
    %c0_i32 = arith.constant 0 : i32
    %c0_i32_0 = arith.constant 0 : i32
    %c0_i32_1 = arith.constant 0 : i32
    return %c0_i32, %c0_i32_0 : i32, i32
  }
  func.func @transform_2(%arg0: i32) -> (i32, i32, i32) {
    %c0_i32 = arith.constant 0 : i32
    %c0_i32_0 = arith.constant 0 : i32
    %c0_i32_1 = arith.constant 0 : i32
    return %arg0, %c0_i32, %c0_i32_0 : i32, i32, i32
  }
  func.func @transform_3(%arg0: i32) -> (i32, i32) {
    %c0_i32 = arith.constant 0 : i32
    %c0_i32_0 = arith.constant 0 : i32
    %c0_i32_1 = arith.constant 0 : i32
    return %c0_i32, %c0_i32_0 : i32, i32
  }
  func.func @transform_4(%arg0: i32) -> (i32, i32) {
    %c0_i32 = arith.constant 0 : i32
    %c0_i32_0 = arith.constant 0 : i32
    %c0_i32_1 = arith.constant 0 : i32
    return %c0_i32, %c0_i32_0 : i32, i32
  }
  func.func @transform_5(%arg0: i32) -> (i32, i32, i32) {
    %c0_i32 = arith.constant 0 : i32
    %c0_i32_0 = arith.constant 0 : i32
    %c0_i32_1 = arith.constant 0 : i32
    return %arg0, %c0_i32, %c0_i32_0 : i32, i32, i32
  }
  func.func @transform_6(%arg0: i32) -> (i32, i32, i32) {
    %c0_i32 = arith.constant 0 : i32
    %c0_i32_0 = arith.constant 0 : i32
    %c0_i32_1 = arith.constant 0 : i32
    return %arg0, %c0_i32, %c0_i32_0 : i32, i32, i32
  }
}

</mosaic_0001>

<bundles_post_ra>
// kernel: cnn_encoder_forward.1
= control target key start
LH: loop header
LB: loop body
LE: loop exit
PB: predicated region body
PF: predicated region fallthrough
CT: control target
= control target key end

     0   :  { %s9688_s21 = smov 0   ;;  %s12638_s0 = inlined_call_operand.vmem [shape: bf16[2,768,289], index: 0, kind: input, shape index: {}]   ;;  %s12639_s1 = inlined_call_operand.vmem [shape: bf16[256,768], index: 1, kind: input, shape index: {}]   ;;  %s12640_s2 = inlined_call_operand.vmem [shape: bf16[2,2048,64], index: 2, kind: input, shape index: {}]   ;;  %s12641_s3 = inlined_call_operand.vmem [shape: bf16[256,2048], index: 3, kind: input, shape index: {}]   ;;  %s12642_s4 = inlined_call_operand.vmem [shape: f32[256,1], index: 4, kind: input, shape index: {}]   ;;  %s12643_s5 = inlined_call_operand.vmem [shape: f32[2,256,289], index: 5, kind: output, shape index: {0}]   ;;  %s12644_s6 = inlined_call_operand.vmem [shape: f32[2,256,1], index: 6, kind: output, shape index: {1}]  }
   0x1 LB: > { %s7156_s22 = sadd.s32 4294967295, %s9651_s21   ;;  %p7160_p0 = scmp.ge.s32.totalorder %s9651_s21, 1  ;;  %s9651_s21 = sphi %s9688_s21, %s17_s21  }
   0x2   : > { %p225_p1 = scmp.lt.s32.totalorder %s9651_s21, 3 }
   0x4   : > { %p226_p2 = pnand %p7160_p0, %p225_p1 }
   0x6   : > { %229 = sbr.rel (%p226_p2) target bundleno = 1327 (0x52f), region = 40 }
   0xd   : > { %p265_p3 = scmp.lt.s32.totalorder %s7156_s22, 1  ;;  %v9223_v0 = vld [vmem:[%s12639_s1 + $0x4] ss:$24 sps:$4 sm:$0xff]   ;;  %v9744_v35 = vld [vmem:[%s12639_s1] ss:$24 sps:$4 sm:$0xff]   ;;  %vm2886_vm0 = vcmask 269312  }
   0xe   : > { %2433 = vmatprep.mubr.bf16.mxu1 %v9223_v0  ;;  %1854 = vmatprep.mubr.bf16.mxu0 %v9223_v0  ;;  %v9752_v39 = vld [vmem:[%s12639_s1 + $0x34] ss:$24 sps:$4 sm:$0xff]   ;;  %v9763_v44 = vld [vmem:[%s12639_s1 + $0x30] ss:$24 sps:$4 sm:$0xff]   ;;  %v9768_v45 = vld [vmem:[%s12639_s1 + $0x64] ss:$24 sps:$4 sm:$0xff]  }
   0xf   : > { %s12667_s22 = smov (!%p265_p3, %s7156_s22), 1  ;;  %v9781_v52 = vld [vmem:[%s12639_s1 + $0x60] ss:$24 sps:$4 sm:$0xff]   ;;  %v9788_v55 = vld [vmem:[%s12639_s1 + $0x94] ss:$24 sps:$4 sm:$0xff]   ;;  %vm6829_vm1 = vcmask 523264  }
  0x10   : > { %s9171_s25 = smul.u32 1152, %s12667_s22  ;;  %v9799_v60 = vld [vmem:[%s12639_s1 + $0x90] ss:$24 sps:$4 sm:$0xff]   ;;  %v9806_v63 = vld [vmem:[%s12639_s1 + $0xc4] ss:$24 sps:$4 sm:$0xff]   ;;  %s7793_s10 = sshll.u32 %s12667_s22, 10 }
  0x11   : > { %s9981_s13 = scalar_lea.vmem %s12640_s2, %s7793_s10  ;;  %s9172_s11 = smul.u32 768, %s12667_s22  ;;  %vm7023_vm2 = vcmask 7168  }
  0x12   : > { %s9705_s28 = scalar_lea.vmem %s12638_s0, %s9171_s25  ;;  %s7794_s23 = sshll.u32 %s12667_s22, 8 }
  0x13   : > { %v9181_v1 = vld [vmem:[%s9705_s28 + $0x4] ss:$12 sps:$4 sm:$0xff]   ;;  %v9183_v2 = vld [vmem:[%s9705_s28 + $0xc8] ss:$12 sps:$4 sm:$0xff]   ;;  %v9184_v3 = vld [vmem:[%s9705_s28] ss:$12 sps:$4 sm:$0xff]   ;;  %s10748_s19 = scalar_lea.vmem %s12643_s5, %s9172_s11  ;;  %s12476_s29 = scalar_lea.vmem %s12644_s6, %s7794_s23 }
  0x14   : > { %1822 = vmatprep.subr.bf16.mxu0 %v9181_v1  ;;  %7795 = vmatprep.subr.bf16.mxu1 %v9183_v2  ;;  %v9185_v4 = vld [vmem:[%s9705_s28 + $0x8] ss:$12 sps:$4 sm:$0xff]   ;;  %v9188_v6 = vld [vmem:[%s9705_s28 + $0xe0] ss:$12 sps:$4 sm:$0xff]   ;;  %v9189_v7 = vld [vmem:[%s9705_s28 + $0x18] ss:$12 sps:$4 sm:$0xff]  }
  0x15   : > { %1823 = vmatpush1.bf16.msra.mxu0 %v9184_v3  ;;  %v9186_v5 = vld [vmem:[%s9705_s28 + $0x1c] ss:$12 sps:$4 sm:$0xff]   ;;  %7796 = vmatpush3.bf16.msra.mxu1 %v9185_v4  ;;  %v9190_v8 = vld [vmem:[%s9705_s28 + $0x20] ss:$12 sps:$4 sm:$0xff]   ;;  %v9193_v10 = vld [vmem:[%s9705_s28 + $0xf8] ss:$12 sps:$4 sm:$0xff]  }
  0x16   : > { %1824 = vmatprep.subr.bf16.mxu0 %v9186_v5  ;;  %7797 = vmatprep.subr.bf16.mxu1 %v9188_v6  ;;  %v9191_v9 = vld [vmem:[%s9705_s28 + $0x34] ss:$12 sps:$4 sm:$0xff]   ;;  %v9194_v11 = vld [vmem:[%s9705_s28 + $0x30] ss:$12 sps:$4 sm:$0xff]   ;;  %v9195_v12 = vld [vmem:[%s9705_s28 + $0x38] ss:$12 sps:$4 sm:$0xff]  }
  0x17   : > { %v9196_v13 = vld [vmem:[%s9705_s28 + $0x4c] ss:$12 sps:$4 sm:$0xff]   ;;  %v9198_v14 = vld [vmem:[%s9705_s28 + $0x110] ss:$12 sps:$4 sm:$0xff]   ;;  %v9199_v15 = vld [vmem:[%s9705_s28 + $0x48] ss:$12 sps:$4 sm:$0xff]  }
  0x18   : > { %v9200_v16 = vld [vmem:[%s9705_s28 + $0x50] ss:$12 sps:$4 sm:$0xff]   ;;  %v9203_v18 = vld [vmem:[%s9705_s28 + $0x128] ss:$12 sps:$4 sm:$0xff]   ;;  %v9204_v19 = vld [vmem:[%s9705_s28 + $0x60] ss:$12 sps:$4 sm:$0xff]  }
  0x19   : > { %1825 = vmatpush1.bf16.msra.mxu0 %v9189_v7  ;;  %7798 = vmatpush3.bf16.msra.mxu1 %v9190_v8  ;;  %v9201_v17 = vld [vmem:[%s9705_s28 + $0x64] ss:$12 sps:$4 sm:$0xff]   ;;  %v9205_v20 = vld [vmem:[%s9705_s28 + $0x68] ss:$12 sps:$4 sm:$0xff]   ;;  %v9208_v22 = vld [vmem:[%s9705_s28 + $0x140] ss:$12 sps:$4 sm:$0xff]  }
  0x1a   : > { %1826 = vmatprep.subr.bf16.mxu0 %v9191_v9  ;;  %7799 = vmatprep.subr.bf16.mxu1 %v9193_v10  ;;  %v9206_v21 = vld [vmem:[%s9705_s28 + $0x7c] ss:$12 sps:$4 sm:$0xff]   ;;  %v9209_v23 = vld [vmem:[%s9705_s28 + $0x78] ss:$12 sps:$4 sm:$0xff]   ;;  %v9210_v24 = vld [vmem:[%s9705_s28 + $0x80] ss:$12 sps:$4 sm:$0xff]  }
  0x1b   : > { %v9211_v25 = vld [vmem:[%s9705_s28 + $0x94] ss:$12 sps:$4 sm:$0xff]   ;;  %v9213_v26 = vld [vmem:[%s9705_s28 + $0x158] ss:$12 sps:$4 sm:$0xff]   ;;  %v9214_v27 = vld [vmem:[%s9705_s28 + $0x90] ss:$12 sps:$4 sm:$0xff]  }
  0x1c   : > { %v9215_v28 = vld [vmem:[%s9705_s28 + $0x98] ss:$12 sps:$4 sm:$0xff]   ;;  %v9218_v30 = vld [vmem:[%s9705_s28 + $0x170] ss:$12 sps:$4 sm:$0xff]   ;;  %v9219_v31 = vld [vmem:[%s9705_s28 + $0xa8] ss:$12 sps:$4 sm:$0xff]  }
  0x1d   : > { %1827 = vmatpush1.bf16.msra.mxu0 %v9194_v11  ;;  %7800 = vmatpush3.bf16.msra.mxu1 %v9195_v12  ;;  %v9216_v29 = vld [vmem:[%s9705_s28 + $0xac] ss:$12 sps:$4 sm:$0xff]   ;;  %v9220_v32 = vld [vmem:[%s9705_s28 + $0xb0] ss:$12 sps:$4 sm:$0xff]   ;;  %v9229_v34 = vld [vmem:[%s9705_s28 + $0x248] ss:$12 sps:$4 sm:$0xff]  }
  0x1e   : > { %1828 = vmatprep.subr.bf16.mxu0 %v9196_v13  ;;  %7801 = vmatprep.subr.bf16.mxu1 %v9198_v14  ;;  %v9224_v33 = vld [vmem:[%s9705_s28 + $0xc4] ss:$12 sps:$4 sm:$0xff]   ;;  %v9226_v36 = vld [vmem:[%s9705_s28 + $0xc0] ss:$12 sps:$4 sm:$0xff]   ;;  %v9227_v37 = vld [vmem:[%s9705_s28 + $0xdc] ss:$12 sps:$4 sm:$0xff]  }
  0x1f   : > { %v9231_v38 = vld [vmem:[%s9705_s28 + $0x188] ss:$12 sps:$4 sm:$0xff]   ;;  %v9230_v40 = vld [vmem:[%s9705_s28 + $0xd8] ss:$12 sps:$4 sm:$0xff]   ;;  %v9249_v42 = vld [vmem:[%s9705_s28 + $0x260] ss:$12 sps:$4 sm:$0xff]  }
  0x20   : > { %v9234_v41 = vld [vmem:[%s9705_s28 + $0xf4] ss:$12 sps:$4 sm:$0xff]   ;;  %v9237_v46 = vld [vmem:[%s9705_s28 + $0xf0] ss:$12 sps:$4 sm:$0xff]   ;;  %v9238_v47 = vld [vmem:[%s9705_s28 + $0x10c] ss:$12 sps:$4 sm:$0xff]  }
  0x21   : > { %1829 = vmatpush1.bf16.msra.mxu0 %v9199_v15  ;;  %7802 = vmatpush3.bf16.msra.mxu1 %v9200_v16  ;;  %v9251_v43 = vld [vmem:[%s9705_s28 + $0x1a0] ss:$12 sps:$4 sm:$0xff]   ;;  %v9240_v48 = vld [vmem:[%s9705_s28 + $0x108] ss:$12 sps:$4 sm:$0xff]   ;;  %v9267_v49 = vld [vmem:[%s9705_s28 + $0x278] ss:$12 sps:$4 sm:$0xff]  }
  0x22   : > { %1830 = vmatprep.subr.bf16.mxu0 %v9201_v17  ;;  %7803 = vmatprep.subr.bf16.mxu1 %v9203_v18  ;;  %v9268_v50 = vld [vmem:[%s9705_s28 + $0x1b8] ss:$12 sps:$4 sm:$0xff]   ;;  %v9246_v53 = vld [vmem:[%s9705_s28 + $0x120] ss:$12 sps:$4 sm:$0xff]   ;;  %v9247_v54 = vld [vmem:[%s9705_s28 + $0x13c] ss:$12 sps:$4 sm:$0xff]  }
  0x23   : > { %v9243_v51 = vld [vmem:[%s9705_s28 + $0x124] ss:$12 sps:$4 sm:$0xff]   ;;  %v9254_v59 = vld [vmem:[%s9705_s28 + $0x154] ss:$12 sps:$4 sm:$0xff]   ;;  %v9258_v62 = vld [vmem:[%s9705_s28 + $0x16c] ss:$12 sps:$4 sm:$0xff]  }
  0x24   : > { %v9281_v56 = vld [vmem:[%s9705_s28 + $0x290] ss:$12 sps:$4 sm:$0xff]   ;;  %v9250_v58 = vld [vmem:[%s9705_s28 + $0x138] ss:$12 sps:$4 sm:$0xff]   ;;  %v9295_v0 = vld [vmem:[%s9705_s28 + $0x2a8] ss:$12 sps:$4 sm:$0xff]  }
  0x25   : > { %1831 = vmatpush1.bf16.msra.mxu0 %v9204_v19  ;;  %7804 = vmatpush3.bf16.msra.mxu1 %v9205_v20  ;;  %v9282_v57 = vld [vmem:[%s9705_s28 + $0x1d0] ss:$12 sps:$4 sm:$0xff]   ;;  %v9296_v1 = vld [vmem:[%s9705_s28 + $0x1e8] ss:$12 sps:$4 sm:$0xff]   ;;  %v9817_v4 = vld [vmem:[%s12639_s1 + $0xc0] ss:$24 sps:$4 sm:$0xff]  }
  0x26   : > { %1832 = vmatprep.subr.bf16.mxu0 %v9206_v21  ;;  %7805 = vmatprep.subr.bf16.mxu1 %v9208_v22  ;;  %v9257_v61 = vld [vmem:[%s9705_s28 + $0x150] ss:$12 sps:$4 sm:$0xff]   ;;  %v9260_v2 = vld [vmem:[%s9705_s28 + $0x168] ss:$12 sps:$4 sm:$0xff]   ;;  %v9263_v5 = vld [vmem:[%s9705_s28 + $0x180] ss:$12 sps:$4 sm:$0xff]  }
  0x27   : > { %v9265_v3 = vld [vmem:[%s9705_s28 + $0x184] ss:$12 sps:$4 sm:$0xff]   ;;  %v9823_v6 = vld [vmem:[%s12639_s1 + $0xf4] ss:$24 sps:$4 sm:$0xff]   ;;  %v9273_v7 = vld [vmem:[%s9705_s28 + $0x19c] ss:$12 sps:$4 sm:$0xff]  }
  0x28   : > { %v9309_v8 = vld [vmem:[%s9705_s28 + $0x2c0] ss:$12 sps:$4 sm:$0xff]   ;;  %v9271_v10 = vld [vmem:[%s9705_s28 + $0x198] ss:$12 sps:$4 sm:$0xff]   ;;  %v9837_v12 = vld [vmem:[%s12639_s1 + $0xf0] ss:$24 sps:$4 sm:$0xff]  }
  0x29   : > { %1833 = vmatpush1.bf16.msra.mxu0 %v9209_v23  ;;  %7806 = vmatpush3.bf16.msra.mxu1 %v9210_v24  ;;  %v9310_v9 = vld [vmem:[%s9705_s28 + $0x200] ss:$12 sps:$4 sm:$0xff]   ;;  %v9842_v13 = vld [vmem:[%s12639_s1 + $0x124] ss:$24 sps:$4 sm:$0xff]   ;;  %v9285_v18 = vld [vmem:[%s9705_s28 + $0x1c8] ss:$12 sps:$4 sm:$0xff]  }
  0x2a   : > { %1834 = vmatprep.subr.bf16.mxu0 %v9211_v25  ;;  %7807 = vmatprep.subr.bf16.mxu1 %v9213_v26  ;;  %v9279_v11 = vld [vmem:[%s9705_s28 + $0x1b4] ss:$12 sps:$4 sm:$0xff]   ;;  %v9277_v14 = vld [vmem:[%s9705_s28 + $0x1b0] ss:$12 sps:$4 sm:$0xff]   ;;  %v9323_v15 = vld [vmem:[%s9705_s28 + $0x2d8] ss:$12 sps:$4 sm:$0xff]  }
  0x2b   : > { %v9324_v16 = vld [vmem:[%s9705_s28 + $0x218] ss:$12 sps:$4 sm:$0xff]   ;;  %v9862_v21 = vld [vmem:[%s12639_s1 + $0x154] ss:$24 sps:$4 sm:$0xff]   ;;  %v9337_v22 = vld [vmem:[%s9705_s28 + $0x2f0] ss:$12 sps:$4 sm:$0xff]  }
  0x2c   : > { %v9287_v17 = vld [vmem:[%s9705_s28 + $0x1cc] ss:$12 sps:$4 sm:$0xff]   ;;  %v9293_v20 = vld [vmem:[%s9705_s28 + $0x1e4] ss:$12 sps:$4 sm:$0xff]   ;;  %v9301_v25 = vld [vmem:[%s9705_s28 + $0x1fc] ss:$12 sps:$4 sm:$0xff]  }
  0x2d   : > { %1835 = vmatpush1.bf16.msra.mxu0 %v9214_v27  ;;  %7808 = vmatpush3.bf16.msra.mxu1 %v9215_v28  ;;  %v9856_v19 = vld [vmem:[%s12639_s1 + $0x120] ss:$24 sps:$4 sm:$0xff]   ;;  %v9338_v23 = vld [vmem:[%s9705_s28 + $0x230] ss:$12 sps:$4 sm:$0xff]  }
  0x2e   : > { %1836 = vmatprep.subr.bf16.mxu0 %v9216_v29  ;;  %7809 = vmatprep.subr.bf16.mxu1 %v9218_v30  ;;  %v9291_v24 = vld [vmem:[%s9705_s28 + $0x1e0] ss:$12 sps:$4 sm:$0xff]   ;;  %v9299_v26 = vld [vmem:[%s9705_s28 + $0x1f8] ss:$12 sps:$4 sm:$0xff]   ;;  %v9876_v27 = vld [vmem:[%s12639_s1 + $0x150] ss:$24 sps:$4 sm:$0xff]  }
  0x2f   : > { %v9307_v28 = vld [vmem:[%s9705_s28 + $0x214] ss:$12 sps:$4 sm:$0xff]   ;;  %v9883_v30 = vld [vmem:[%s12639_s1 + $0x184] ss:$24 sps:$4 sm:$0xff]  }
  0x30   : > { %v9351_v29 = vld [vmem:[%s9705_s28 + $0x3c8] ss:$12 sps:$4 sm:$0xff]  }
  0x31   : > { %1837 = vmatpush1.bf16.msra.mxu0 %v9219_v31  ;;  %7810 = vmatpush3.bf16.msra.mxu1 %v9220_v32  ;;  %v9305_v31 = vld [vmem:[%s9705_s28 + $0x210] ss:$12 sps:$4 sm:$0xff]   ;;  %v9315_v32 = vld [vmem:[%s9705_s28 + $0x22c] ss:$12 sps:$4 sm:$0xff]  }
  0x32   : > { %1838 = vmatprep.subr.bf16.mxu0 %v9224_v33  ;;  %7907 = vmatprep.subr.bf16.mxu1 %v9229_v34  ;;  %v9313_v33 = vld [vmem:[%s9705_s28 + $0x228] ss:$12 sps:$4 sm:$0xff]   ;;  %v9321_v34 = vld [vmem:[%s9705_s28 + $0x244] ss:$12 sps:$4 sm:$0xff]  }
  0x34   : > { %2434 = vmatmul.mubr.bf16.vlgmr.msra.gmra.mrb[0].mxu1 %v9744_v35 }
  0x35   : > { %1839 = vmatpush1.bf16.msra.mxu0 %v9226_v36  ;;  %7908 = vmatpush3.bf16.msra.mxu1 %v9231_v38  ;;  %v9297_v36 = vld [vmem:[%s12639_s1 + $0x1b4] ss:$24 sps:$4 sm:$0xff]   ;;  %v9329_v38 = vld [vmem:[%s9705_s28 + $0x25c] ss:$12 sps:$4 sm:$0xff]  }
  0x36   : > { %1840 = vmatprep.subr.bf16.mxu0 %v9227_v37  ;;  %2441 = vmatprep.mubr.bf16.mxu1 %v9752_v39  ;;  %v9319_v37 = vld [vmem:[%s9705_s28 + $0x240] ss:$12 sps:$4 sm:$0xff]  }
  0x37   : > { %7909 = vmatprep.subr.bf16.mxu1 %v9249_v42  ;;  %v9303_v42 = vld [vmem:[%s12639_s1 + $0x1e4] ss:$24 sps:$4 sm:$0xff]  }
  0x39   : > { %1841 = vmatpush1.bf16.msra.mxu0 %v9230_v40  ;;  %7910 = vmatpush3.bf16.msra.mxu1 %v9251_v43  ;;  %v9335_v40 = vld [vmem:[%s9705_s28 + $0x274] ss:$12 sps:$4 sm:$0xff]   ;;  %v9333_v43 = vld [vmem:[%s9705_s28 + $0x270] ss:$12 sps:$4 sm:$0xff]  }
  0x3a   : > { %1842 = vmatprep.subr.bf16.mxu0 %v9234_v41  ;;  %7911 = vmatprep.subr.bf16.mxu1 %v9267_v49  ;;  %v9302_v41 = vld [vmem:[%s12639_s1 + $0x1b0] ss:$24 sps:$4 sm:$0xff]   ;;  %v9348_v49 = vld [vmem:[%s9705_s28 + $0x2a0] ss:$12 sps:$4 sm:$0xff]  }
  0x3c   : > { %2442 = vmatmul.mubr.bf16.gmra.mrb[4].mxu1 %v9763_v44 }
  0x3d   : > { %1843 = vmatpush1.bf16.msra.mxu0 %v9237_v46  ;;  %2449 = vmatprep.mubr.bf16.mxu1 %v9768_v45  ;;  %v9350_v46 = vld [vmem:[%s9705_s28 + $0x2a4] ss:$12 sps:$4 sm:$0xff]  }
  0x3e   : > { %1844 = vmatprep.subr.bf16.mxu0 %v9238_v47  ;;  %7912 = vmatpush3.bf16.msra.mxu1 %v9268_v50  ;;  %v9308_v47 = vld [vmem:[%s12639_s1 + $0x1e0] ss:$24 sps:$4 sm:$0xff]   ;;  %v9357_v50 = vld [vmem:[%s9705_s28 + $0x2bc] ss:$12 sps:$4 sm:$0xff]  }
  0x3f   : > { %7913 = vmatprep.subr.bf16.mxu1 %v9281_v56  ;;  %v9371_v56 = vld [vmem:[%s9705_s28 + $0x2ec] ss:$12 sps:$4 sm:$0xff]  }
  0x41   : > { %1845 = vmatpush1.bf16.msra.mxu0 %v9240_v48  ;;  %v9311_v48 = vld [vmem:[%s12639_s1 + $0x214] ss:$24 sps:$4 sm:$0xff]  }
  0x42   : > { %1846 = vmatprep.subr.bf16.mxu0 %v9243_v51  ;;  %7914 = vmatpush3.bf16.msra.mxu1 %v9282_v57  ;;  %v9355_v51 = vld [vmem:[%s9705_s28 + $0x2b8] ss:$12 sps:$4 sm:$0xff]   ;;  %v9369_v57 = vld [vmem:[%s9705_s28 + $0x2e8] ss:$12 sps:$4 sm:$0xff]  }
  0x43   : > { %7915 = vmatprep.subr.bf16.mxu1 %v9295_v0  ;;  %v9339_v0 = vld [vmem:[%s12639_s1 + $0x2d4] ss:$24 sps:$4 sm:$0xff]  }
  0x44   : > { %2450 = vmatmul.mubr.bf16.gmra.mrb[8].mxu1 %v9781_v52 }
  0x45   : > { %1847 = vmatpush1.bf16.msra.mxu0 %v9246_v53  ;;  %2457 = vmatprep.mubr.bf16.mxu1 %v9788_v55  ;;  %v9316_v53 = vld [vmem:[%s12639_s1 + $0x210] ss:$24 sps:$4 sm:$0xff]  }
  0x46   : > { %1848 = vmatprep.subr.bf16.mxu0 %v9247_v54  ;;  %7916 = vmatpush3.bf16.msra.mxu1 %v9296_v1  ;;  %v9317_v54 = vld [vmem:[%s12639_s1 + $0x244] ss:$24 sps:$4 sm:$0xff]   ;;  %v9344_v1 = vld [vmem:[%s12639_s1 + $0x2d0] ss:$24 sps:$4 sm:$0xff]  }
  0x47   : > { %7917 = vmatprep.subr.bf16.mxu1 %v9309_v8  ;;  %v9986_v8 = vld [vmem:[%s12639_s1 + $0x38] ss:$24 sps:$4 sm:$0xff]  }
  0x49   : > { %1849 = vmatpush1.bf16.msra.mxu0 %v9250_v58  ;;  %v9377_v58 = vld [vmem:[%s9705_s28 + $0x304] ss:$12 sps:$4 sm:$0xff]  }
  0x4a   : > { %1850 = vmatprep.subr.bf16.mxu0 %v9254_v59  ;;  %7918 = vmatpush3.bf16.msra.mxu1 %v9310_v9  ;;  %v9322_v59 = vld [vmem:[%s12639_s1 + $0x240] ss:$24 sps:$4 sm:$0xff]  }
  0x4b   : > { %7919 = vmatprep.subr.bf16.mxu1 %v9323_v15  ;;  %v9379_v9 = vld [vmem:[%s9705_s28 + $0x3f8] ss:$12 sps:$4 sm:$0xff]   ;;  %v9364_v15 = vld [vmem:[%s12639_s1 + $0x68] ss:$24 sps:$4 sm:$0xff]  }
  0x4c   : > { %2458 = vmatmul.mubr.bf16.gmra.mrb[12].mxu1 %v9799_v60 }
  0x4d   : > { %1851 = vmatpush1.bf16.msra.mxu0 %v9257_v61  ;;  %2465 = vmatprep.mubr.bf16.mxu1 %v9806_v63  ;;  %v9330_v61 = vld [vmem:[%s12639_s1 + $0x270] ss:$24 sps:$4 sm:$0xff]  }
  0x4e   : > { %1852 = vmatprep.subr.bf16.mxu0 %v9258_v62  ;;  %7920 = vmatpush3.bf16.msra.mxu1 %v9324_v16  ;;  %v9331_v62 = vld [vmem:[%s12639_s1 + $0x2a4] ss:$24 sps:$4 sm:$0xff]  }
  0x4f   : > { %7921 = vmatprep.subr.bf16.mxu1 %v9337_v22  ;;  %v9367_v16 = vld [vmem:[%s12639_s1 + $0x9c] ss:$24 sps:$4 sm:$0xff]   ;;  %v10016_v22 = vld [vmem:[%s12639_s1 + $0xcc] ss:$24 sps:$4 sm:$0xff]  }
  0x51   : > { %1853 = vmatpush1.bf16.msra.mxu0 %v9260_v2  ;;  %v9347_v2 = vld [vmem:[%s12639_s1 + $0xc] ss:$24 sps:$4 sm:$0xff]  }
  0x52   : > { %2015 = vmatprep.subr.bf16.mxu0 %v9265_v3  ;;  %7922 = vmatpush3.bf16.msra.mxu1 %v9338_v23  ;;  %v9345_v3 = vld [vmem:[%s12639_s1 + $0x8] ss:$24 sps:$4 sm:$0xff]   ;;  %v9436_v23 = vld [vmem:[%s9705_s28 + $0x398] ss:$12 sps:$4 sm:$0xff]  }
  0x53   : > { %8019 = vmatprep.subr.bf16.mxu1 %v9351_v29  ;;  %v9381_v29 = vld [vmem:[%s12639_s1 + $0xfc] ss:$24 sps:$4 sm:$0xff]  }
  0x54   : > { %1855 = vmatmul.mubr.bf16.vlgmr.msra.gmra.mrb[0].mxu0 %v9744_v35  ;;  %2466 = vmatmul.mubr.bf16.gmra.mrb[16].mxu1 %v9817_v4  ;;  %v9294_v35 = vld [vmem:[%s12639_s1 + $0x180] ss:$24 sps:$4 sm:$0xff]  }
  0x55   : > { %2016 = vmatpush1.bf16.msra.mxu0 %v9263_v5  ;;  %1864 = vmatprep.mubr.bf16.mxu0 %v9752_v39  ;;  %v9327_v39 = vld [vmem:[%s9705_s28 + $0x258] ss:$12 sps:$4 sm:$0xff]   ;;  %v9972_v5 = vld [vmem:[%s12639_s1 + $0x3c] ss:$24 sps:$4 sm:$0xff]  }
  0x56   : > { %2473 = vmatprep.mubr.bf16.mxu1 %v9823_v6  ;;  %2017 = vmatprep.subr.bf16.mxu0 %v9273_v7  ;;  %v9366_v7 = vld [vmem:[%s9705_s28 + $0x320] ss:$12 sps:$4 sm:$0xff]  }
  0x59   : > { %2018 = vmatpush1.bf16.msra.mxu0 %v9271_v10  ;;  %v9992_v10 = vld [vmem:[%s12639_s1 + $0x6c] ss:$24 sps:$4 sm:$0xff]  }
  0x5a   : > { %2019 = vmatprep.subr.bf16.mxu0 %v9279_v11  ;;  %v9380_v11 = vld [vmem:[%s9705_s28 + $0x338] ss:$12 sps:$4 sm:$0xff]  }
  0x5c   : > { %1865 = vmatmul.mubr.bf16.gmra.mrb[4].mxu0 %v9763_v44  ;;  %2474 = vmatmul.mubr.bf16.gmra.mrb[20].mxu1 %v9837_v12  ;;  %v9343_v44 = vld [vmem:[%s9705_s28 + $0x28c] ss:$12 sps:$4 sm:$0xff]  }
  0x5d   : > { %1874 = vmatprep.mubr.bf16.mxu0 %v9768_v45  ;;  %2481 = vmatprep.mubr.bf16.mxu1 %v9842_v13  ;;  %v9341_v45 = vld [vmem:[%s9705_s28 + $0x288] ss:$12 sps:$4 sm:$0xff]  }
  0x5e   : > { %2020 = vmatpush1.bf16.msra.mxu0 %v9277_v14  ;;  %v9407_v14 = vld [vmem:[%s9705_s28 + $0x428] ss:$12 sps:$4 sm:$0xff]  }
  0x5f   : > { %2021 = vmatprep.subr.bf16.mxu0 %v9287_v17  ;;  %v9408_v17 = vld [vmem:[%s9705_s28 + $0x368] ss:$12 sps:$4 sm:$0xff]  }
  0x62   : > { %2022 = vmatpush1.bf16.msra.mxu0 %v9285_v18  ;;  %v9421_v18 = vld [vmem:[%s9705_s28 + $0x440] ss:$12 sps:$4 sm:$0xff]  }
  0x63   : > { %2023 = vmatprep.subr.bf16.mxu0 %v9293_v20  ;;  %v9435_v20 = vld [vmem:[%s9705_s28 + $0x458] ss:$12 sps:$4 sm:$0xff]  }
  0x64   : > { %1875 = vmatmul.mubr.bf16.gmra.mrb[8].mxu0 %v9781_v52  ;;  %2482 = vmatmul.mubr.bf16.gmra.mrb[24].mxu1 %v9856_v19  ;;  %v9363_v52 = vld [vmem:[%s9705_s28 + $0x2d4] ss:$12 sps:$4 sm:$0xff]  }
  0x65   : > { %1884 = vmatprep.mubr.bf16.mxu0 %v9788_v55  ;;  %2489 = vmatprep.mubr.bf16.mxu1 %v9862_v21  ;;  %v9361_v55 = vld [vmem:[%s9705_s28 + $0x2d0] ss:$12 sps:$4 sm:$0xff]  }
  0x66   : > { %2024 = vmatpush1.bf16.msra.mxu0 %v9291_v24  ;;  %v9449_v24 = vld [vmem:[%s9705_s28 + $0x470] ss:$12 sps:$4 sm:$0xff]  }
  0x67   : > { %2025 = vmatprep.subr.bf16.mxu0 %v9301_v25  ;;  %v9450_v25 = vld [vmem:[%s9705_s28 + $0x3b0] ss:$12 sps:$4 sm:$0xff]  }
  0x6a   : > { %2026 = vmatpush1.bf16.msra.mxu0 %v9299_v26  ;;  %v9463_v26 = vld [vmem:[%s9981_s13 + $0x40] sm:$0xff]  }
  0x6b   : > { %2027 = vmatprep.subr.bf16.mxu0 %v9307_v28  ;;  %v9378_v28 = vld [vmem:[%s12639_s1 + $0xc8] ss:$24 sps:$4 sm:$0xff]  }
  0x6c   : > { %1885 = vmatmul.mubr.bf16.gmra.mrb[12].mxu0 %v9799_v60  ;;  %2490 = vmatmul.mubr.bf16.gmra.mrb[28].mxu1 %v9876_v27  ;;  %v9325_v60 = vld [vmem:[%s12639_s1 + $0x274] ss:$24 sps:$4 sm:$0xff]  }
  0x6d   : > { %1894 = vmatprep.mubr.bf16.mxu0 %v9806_v63  ;;  %2497 = vmatprep.mubr.bf16.mxu1 %v9883_v30  ;;  %v9336_v63 = vld [vmem:[%s12639_s1 + $0x2a0] ss:$24 sps:$4 sm:$0xff]  }
  0x6e   : > { %2028 = vmatpush1.bf16.msra.mxu0 %v9305_v31  ;;  %v9383_v31 = vld [vmem:[%s9705_s28 + $0x318] ss:$12 sps:$4 sm:$0xff]  }
  0x6f   : > { %2029 = vmatprep.subr.bf16.mxu0 %v9315_v32  ;;  %v9391_v32 = vld [vmem:[%s9705_s28 + $0x334] ss:$12 sps:$4 sm:$0xff]  }
  0x72   : > { %2030 = vmatpush1.bf16.msra.mxu0 %v9313_v33  ;;  %v9386_v33 = vld [vmem:[%s12639_s1 + $0xf8] ss:$24 sps:$4 sm:$0xff]  }
  0x73   : > { %2031 = vmatprep.subr.bf16.mxu0 %v9321_v34  ;;  %v10040_v34 = vld [vmem:[%s12639_s1 + $0x12c] ss:$24 sps:$4 sm:$0xff]  }
  0x74   : > { %1895 = vmatmul.mubr.bf16.gmra.mrb[16].mxu0 %v9817_v4  ;;  %2498 = vmatmul.mubr.bf16.gmra.mrb[32].mxu1 %v9294_v35  ;;  %v9352_v4 = vld [vmem:[%s9705_s28 + $0x308] ss:$12 sps:$4 sm:$0xff]  }
  0x75   : > { %1904 = vmatprep.mubr.bf16.mxu0 %v9823_v6  ;;  %2505 = vmatprep.mubr.bf16.mxu1 %v9297_v36  ;;  %v9365_v6 = vld [vmem:[%s9705_s28 + $0x3e0] ss:$12 sps:$4 sm:$0xff]  }
  0x76   : > { %2032 = vmatpush1.bf16.msra.mxu0 %v9319_v37  ;;  %v9397_v37 = vld [vmem:[%s9705_s28 + $0x348] ss:$12 sps:$4 sm:$0xff]  }
  0x77   : > { %2033 = vmatprep.subr.bf16.mxu0 %v9329_v38  ;;  %v9405_v38 = vld [vmem:[%s9705_s28 + $0x364] ss:$12 sps:$4 sm:$0xff]  }
  0x7a   : > { %2034 = vmatpush1.bf16.msra.mxu0 %v9327_v39  ;;  %v9392_v39 = vld [vmem:[%s12639_s1 + $0x128] ss:$24 sps:$4 sm:$0xff]  }
  0x7b   : > { %2035 = vmatprep.subr.bf16.mxu0 %v9335_v40  ;;  %v9395_v40 = vld [vmem:[%s12639_s1 + $0x15c] ss:$24 sps:$4 sm:$0xff]  }
  0x7c   : > { %1905 = vmatmul.mubr.bf16.gmra.mrb[20].mxu0 %v9837_v12  ;;  %2506 = vmatmul.mubr.bf16.gmra.mrb[36].mxu1 %v9302_v41  ;;  %v9393_v12 = vld [vmem:[%s9705_s28 + $0x410] ss:$12 sps:$4 sm:$0xff]  }
  0x7d   : > { %1914 = vmatprep.mubr.bf16.mxu0 %v9842_v13  ;;  %2513 = vmatprep.mubr.bf16.mxu1 %v9303_v42  ;;  %v9394_v13 = vld [vmem:[%s9705_s28 + $0x350] ss:$12 sps:$4 sm:$0xff]  }
  0x7e   : > { %2036 = vmatpush1.bf16.msra.mxu0 %v9333_v43  ;;  %v9411_v43 = vld [vmem:[%s9705_s28 + $0x378] ss:$12 sps:$4 sm:$0xff]  }
  0x7f   : > { %2037 = vmatprep.subr.bf16.mxu0 %v9343_v44  ;;  %v9419_v44 = vld [vmem:[%s9705_s28 + $0x394] ss:$12 sps:$4 sm:$0xff]  }
  0x82   : > { %2038 = vmatpush1.bf16.msra.mxu0 %v9341_v45  ;;  %v10062_v45 = vld [vmem:[%s12639_s1 + $0x158] ss:$24 sps:$4 sm:$0xff]  }
  0x83   : > { %2039 = vmatprep.subr.bf16.mxu0 %v9350_v46  ;;  %v10067_v46 = vld [vmem:[%s12639_s1 + $0x18c] ss:$24 sps:$4 sm:$0xff]  }
  0x84   : > { %1915 = vmatmul.mubr.bf16.gmra.mrb[24].mxu0 %v9856_v19  ;;  %2514 = vmatmul.mubr.bf16.gmra.mrb[40].mxu1 %v9308_v47  ;;  %v9422_v19 = vld [vmem:[%s9705_s28 + $0x380] ss:$12 sps:$4 sm:$0xff]  }
  0x85   : > { %1924 = vmatprep.mubr.bf16.mxu0 %v9862_v21  ;;  %2521 = vmatprep.mubr.bf16.mxu1 %v9311_v48  ;;  %v9372_v21 = vld [vmem:[%s12639_s1 + $0x98] ss:$24 sps:$4 sm:$0xff]  }
  0x86   : > { %2040 = vmatpush1.bf16.msra.mxu0 %v9348_v49  ;;  %v9425_v49 = vld [vmem:[%s9705_s28 + $0x3a8] ss:$12 sps:$4 sm:$0xff]  }
  0x87   : > { %2041 = vmatprep.subr.bf16.mxu0 %v9357_v50  ;;  %v9433_v50 = vld [vmem:[%s9705_s28 + $0x3c4] ss:$12 sps:$4 sm:$0xff]  }
  0x8a   : > { %2042 = vmatpush1.bf16.msra.mxu0 %v9355_v51  ;;  %v10079_v51 = vld [vmem:[%s12639_s1 + $0x188] ss:$24 sps:$4 sm:$0xff]  }
  0x8b   : > { %2043 = vmatprep.subr.bf16.mxu0 %v9363_v52  ;;  %v10084_v52 = vld [vmem:[%s12639_s1 + $0x1bc] ss:$24 sps:$4 sm:$0xff]  }
  0x8c   : > { %1925 = vmatmul.mubr.bf16.gmra.mrb[28].mxu0 %v9876_v27  ;;  %2522 = vmatmul.mubr.bf16.gmra.mrb[44].mxu1 %v9316_v53  ;;  %v9375_v27 = vld [vmem:[%s9705_s28 + $0x300] ss:$12 sps:$4 sm:$0xff]  }
  0x8d   : > { %1934 = vmatprep.mubr.bf16.mxu0 %v9883_v30  ;;  %2529 = vmatprep.mubr.bf16.mxu1 %v9317_v54  ;;  %v9385_v30 = vld [vmem:[%s9705_s28 + $0x31c] ss:$12 sps:$4 sm:$0xff]  }
  0x8e   : > { %2044 = vmatpush1.bf16.msra.mxu0 %v9361_v55  ;;  %v9439_v55 = vld [vmem:[%s9705_s28 + $0x3d8] ss:$12 sps:$4 sm:$0xff]  }
  0x8f   : > { %2045 = vmatprep.subr.bf16.mxu0 %v9371_v56  ;;  %v9447_v56 = vld [vmem:[%s9705_s28 + $0x3f4] ss:$12 sps:$4 sm:$0xff]  }
  0x92   : > { %2046 = vmatpush1.bf16.msra.mxu0 %v9369_v57  ;;  %v10095_v57 = vld [vmem:[%s12639_s1 + $0x1b8] ss:$24 sps:$4 sm:$0xff]  }
  0x93   : > { %2208 = vmatprep.subr.bf16.mxu0 %v9377_v58  ;;  %v10100_v58 = vld [vmem:[%s12639_s1 + $0x1ec] ss:$24 sps:$4 sm:$0xff]  }
  0x94   : > { %1935 = vmatmul.mubr.bf16.gmra.mrb[32].mxu0 %v9294_v35  ;;  %2530 = vmatmul.mubr.bf16.gmra.mrb[48].mxu1 %v9322_v59  ;;  %v9389_v35 = vld [vmem:[%s9705_s28 + $0x330] ss:$12 sps:$4 sm:$0xff]  }
  0x95   : > { %1944 = vmatprep.mubr.bf16.mxu0 %v9297_v36  ;;  %2537 = vmatprep.mubr.bf16.mxu1 %v9325_v60  ;;  %v9399_v36 = vld [vmem:[%s9705_s28 + $0x34c] ss:$12 sps:$4 sm:$0xff]  }
  0x9c   : > { %1945 = vmatmul.mubr.bf16.gmra.mrb[36].mxu0 %v9302_v41  ;;  %2538 = vmatmul.mubr.bf16.gmra.mrb[52].mxu1 %v9330_v61  ;;  %v9403_v41 = vld [vmem:[%s9705_s28 + $0x360] ss:$12 sps:$4 sm:$0xff]  }
  0x9d   : > { %1954 = vmatprep.mubr.bf16.mxu0 %v9303_v42  ;;  %2545 = vmatprep.mubr.bf16.mxu1 %v9331_v62  ;;  %v9413_v42 = vld [vmem:[%s9705_s28 + $0x37c] ss:$12 sps:$4 sm:$0xff]  }
  0xa4   : > { %1955 = vmatmul.mubr.bf16.gmra.mrb[40].mxu0 %v9308_v47  ;;  %2546 = vmatmul.mubr.bf16.gmra.mrb[56].mxu1 %v9336_v63  ;;  %v9417_v47 = vld [vmem:[%s9705_s28 + $0x390] ss:$12 sps:$4 sm:$0xff]  }
  0xa5   : > { %1964 = vmatprep.mubr.bf16.mxu0 %v9311_v48  ;;  %2553 = vmatprep.mubr.bf16.mxu1 %v9339_v0  ;;  %v9427_v48 = vld [vmem:[%s9705_s28 + $0x3ac] ss:$12 sps:$4 sm:$0xff]  }
  0xac   : > { %1965 = vmatmul.mubr.bf16.gmra.mrb[44].mxu0 %v9316_v53  ;;  %2554 = vmatmul.mubr.bf16.gmra.mrb[60].mxu1 %v9344_v1  ;;  %v9431_v53 = vld [vmem:[%s9705_s28 + $0x3c0] ss:$12 sps:$4 sm:$0xff]  }
  0xad   : > { %1974 = vmatprep.mubr.bf16.mxu0 %v9317_v54  ;;  %2594 = vmatprep.mubr.bf16.mxu1 %v9347_v2  ;;  %v9441_v54 = vld [vmem:[%s9705_s28 + $0x3dc] ss:$12 sps:$4 sm:$0xff]  }
  0xb4   : > { %1975 = vmatmul.mubr.bf16.gmra.mrb[48].mxu0 %v9322_v59  ;;  %2595 = vmatmul.mubr.bf16.vlgmr.msra.gmra.mrb[64].mxu1 %v9345_v3  ;;  %v9445_v59 = vld [vmem:[%s9705_s28 + $0x3f0] ss:$12 sps:$4 sm:$0xff]  }
  0xb5   : > { %1984 = vmatprep.mubr.bf16.mxu0 %v9325_v60  ;;  %8020 = vmatpush3.bf16.msra.mxu1 %v9352_v4  ;;  %v9455_v60 = vld [vmem:[%s9705_s28 + $0x40c] ss:$12 sps:$4 sm:$0xff]   ;;  %v9475_v4 = vld [vmem:[%s9705_s28 + $0x454] ss:$12 sps:$4 sm:$0xff]  }
  0xb6   : > { %2602 = vmatprep.mubr.bf16.mxu1 %v9972_v5  ;;  %8021 = vmatprep.subr.bf16.mxu1 %v9365_v6 }
  0xb9   : > { %8022 = vmatpush3.bf16.msra.mxu1 %v9366_v7  ;;  %v10133_v7 = vld [vmem:[%s12639_s1 + $0x24c] ss:$24 sps:$4 sm:$0xff]  }
  0xba   : > { %8023 = vmatprep.subr.bf16.mxu1 %v9379_v9 }
  0xbc   : > { %1985 = vmatmul.mubr.bf16.gmra.mrb[52].mxu0 %v9330_v61  ;;  %2603 = vmatmul.mubr.bf16.gmra.mrb[68].mxu1 %v9986_v8  ;;  %v9453_v61 = vld [vmem:[%s9705_s28 + $0x408] ss:$12 sps:$4 sm:$0xff]  }
  0xbd   : > { %1994 = vmatprep.mubr.bf16.mxu0 %v9331_v62  ;;  %2610 = vmatprep.mubr.bf16.mxu1 %v9992_v10  ;;  %v9462_v62 = vld [vmem:[%s9705_s28 + $0x424] ss:$12 sps:$4 sm:$0xff]  }
  0xbe   : > { %8024 = vmatpush3.bf16.msra.mxu1 %v9380_v11  ;;  %v9473_v11 = vld [vmem:[%s9705_s28 + $0x450] ss:$12 sps:$4 sm:$0xff]  }
  0xbf   : > { %8025 = vmatprep.subr.bf16.mxu1 %v9393_v12 }
  0xc2   : > { %8026 = vmatpush3.bf16.msra.mxu1 %v9394_v13  ;;  %v9483_v13 = vld [vmem:[%s9705_s28 + $0x46c] ss:$12 sps:$4 sm:$0xff]  }
  0xc3   : > { %8027 = vmatprep.subr.bf16.mxu1 %v9407_v14 }
  0xc4   : > { %1995 = vmatmul.mubr.bf16.gmra.mrb[56].mxu0 %v9336_v63  ;;  %2611 = vmatmul.mubr.bf16.gmra.mrb[72].mxu1 %v9364_v15  ;;  %v10112_v63 = vld [vmem:[%s12639_s1 + $0x1e8] ss:$24 sps:$4 sm:$0xff]  }
  0xc5   : > { %2004 = vmatprep.mubr.bf16.mxu0 %v9339_v0  ;;  %2618 = vmatprep.mubr.bf16.mxu1 %v9367_v16  ;;  %v10117_v0 = vld [vmem:[%s12639_s1 + $0x21c] ss:$24 sps:$4 sm:$0xff]  }
  0xc6   : > { %8028 = vmatpush3.bf16.msra.mxu1 %v9408_v17  ;;  %v9434_v17 = vld [vmem:[%s12639_s1 + $0x248] ss:$24 sps:$4 sm:$0xff]  }
  0xc7   : > { %8029 = vmatprep.subr.bf16.mxu1 %v9421_v18 }
  0xca   : > { %8030 = vmatpush3.bf16.msra.mxu1 %v9422_v19 }
  0xcb   : > { %8031 = vmatprep.subr.bf16.mxu1 %v9435_v20 }
  0xcc   : > { %2005 = vmatmul.mubr.bf16.gmra.mrb[60].mxu0 %v9344_v1  ;;  %2619 = vmatmul.mubr.bf16.gmra.mrb[76].mxu1 %v9372_v21  ;;  %v9460_v1 = vld [vmem:[%s9705_s28 + $0x420] ss:$12 sps:$4 sm:$0xff]  }
  0xcd   : > { %2047 = vmatprep.mubr.bf16.mxu0 %v9347_v2  ;;  %2626 = vmatprep.mubr.bf16.mxu1 %v10016_v22  ;;  %v9469_v2 = vld [vmem:[%s9705_s28 + $0x43c] ss:$12 sps:$4 sm:$0xff]  }
  0xce   : > { %8032 = vmatpush3.bf16.msra.mxu1 %v9436_v23 }
  0xcf   : > { %8033 = vmatprep.subr.bf16.mxu1 %v9449_v24 }
  0xd2   : > { %8034 = vmatpush3.bf16.msra.mxu1 %v9450_v25  ;;  %v10162_v25 = vld [vmem:[%s12639_s1 + $0x278] ss:$24 sps:$4 sm:$0xff]  }
  0xd3   : > { %8131 = vmatprep.subr.bf16.mxu1 %v9463_v26 }
  0xd4   : > { %2048 = vmatmul.mubr.bf16.vlgmr.msra.gmra.mrb[0].mxu0 %v9345_v3  ;;  %2627 = vmatmul.mubr.bf16.gmra.mrb[80].mxu1 %v9378_v28  ;;  %v9467_v3 = vld [vmem:[%s9705_s28 + $0x438] ss:$12 sps:$4 sm:$0xff]  }
  0xd5   : > { %2209 = vmatpush1.bf16.msra.mxu0 %v9375_v27  ;;  %2057 = vmatprep.mubr.bf16.mxu0 %v9972_v5  ;;  %v10128_v5 = vld [vmem:[%s12639_s1 + $0x218] ss:$24 sps:$4 sm:$0xff]  }
  0xd6   : > { %2634 = vmatprep.mubr.bf16.mxu1 %v9381_v29  ;;  %2210 = vmatprep.subr.bf16.mxu0 %v9385_v30  ;;  %v9443_v30 = vld [vmem:[%s12639_s1 + $0x2ac] ss:$24 sps:$4 sm:$0xff]  }
  0xd9   : > { %2211 = vmatpush1.bf16.msra.mxu0 %v9383_v31 }
  0xda   : > { %2212 = vmatprep.subr.bf16.mxu0 %v9391_v32 }
  0xdc   : > { %2058 = vmatmul.mubr.bf16.gmra.mrb[4].mxu0 %v9986_v8  ;;  %2635 = vmatmul.mubr.bf16.gmra.mrb[84].mxu1 %v9386_v33 }
  0xdd   : > { %2067 = vmatprep.mubr.bf16.mxu0 %v9992_v10  ;;  %2642 = vmatprep.mubr.bf16.mxu1 %v10040_v34 }
  0xde   : > { %2213 = vmatpush1.bf16.msra.mxu0 %v9389_v35 }
  0xdf   : > { %2214 = vmatprep.subr.bf16.mxu0 %v9399_v36 }
  0xe2   : > { %2215 = vmatpush1.bf16.msra.mxu0 %v9397_v37 }
  0xe3   : > { %2216 = vmatprep.subr.bf16.mxu0 %v9405_v38  ;;  %v10184_v38 = vld [vmem:[%s12639_s1 + $0x2dc] ss:$24 sps:$4 sm:$0xff]  }
  0xe4   : > { %2068 = vmatmul.mubr.bf16.gmra.mrb[8].mxu0 %v9364_v15  ;;  %2643 = vmatmul.mubr.bf16.gmra.mrb[88].mxu1 %v9392_v39  ;;  %v9481_v15 = vld [vmem:[%s9705_s28 + $0x468] ss:$12 sps:$4 sm:$0xff]  }
  0xe5   : > { %2077 = vmatprep.mubr.bf16.mxu0 %v9367_v16  ;;  %2650 = vmatprep.mubr.bf16.mxu1 %v9395_v40  ;;  %v9488_v16 = vld [vmem:[%s9981_s13 + $0xc0] sm:$0xff]  }
  0xe6   : > { %2217 = vmatpush1.bf16.msra.mxu0 %v9403_v41 }
  0xe7   : > { %2218 = vmatprep.subr.bf16.mxu0 %v9413_v42 }
  0xea   : > { %2219 = vmatpush1.bf16.msra.mxu0 %v9411_v43  ;;  %v10195_v43 = vld [vmem:[%s12639_s1 + $0x2d8] ss:$24 sps:$4 sm:$0xff]  }
  0xeb   : > { %2220 = vmatprep.subr.bf16.mxu0 %v9419_v44 }
  0xec   : > { %2078 = vmatmul.mubr.bf16.gmra.mrb[12].mxu0 %v9372_v21  ;;  %2651 = vmatmul.mubr.bf16.gmra.mrb[92].mxu1 %v10062_v45 }
  0xed   : > { %2087 = vmatprep.mubr.bf16.mxu0 %v10016_v22  ;;  %2658 = vmatprep.mubr.bf16.mxu1 %v10067_v46  ;;  %v9437_v22 = vld [vmem:[%s12639_s1 + $0x27c] ss:$24 sps:$4 sm:$0xff]  }
  0xee   : > { %2221 = vmatpush1.bf16.msra.mxu0 %v9417_v47 }
  0xef   : > { %2222 = vmatprep.subr.bf16.mxu0 %v9427_v48 }
  0xf2   : > { %2223 = vmatpush1.bf16.msra.mxu0 %v9425_v49 }
  0xf3   : > { %2224 = vmatprep.subr.bf16.mxu0 %v9433_v50 }
  0xf4   : > { %2088 = vmatmul.mubr.bf16.gmra.mrb[16].mxu0 %v9378_v28  ;;  %2659 = vmatmul.mubr.bf16.gmra.mrb[96].mxu1 %v10079_v51 }
  0xf5   : > { %2097 = vmatprep.mubr.bf16.mxu0 %v9381_v29  ;;  %2666 = vmatprep.mubr.bf16.mxu1 %v10084_v52 }
  0xf6   : > { %2225 = vmatpush1.bf16.msra.mxu0 %v9431_v53 }
  0xf7   : > { %2226 = vmatprep.subr.bf16.mxu0 %v9441_v54  ;;  %v9464_v54 = vld [vmem:[%s9981_s13] sm:$0xff]  }
  0xfa   : > { %2227 = vmatpush1.bf16.msra.mxu0 %v9439_v55  ;;  %v10221_v55 = vld [vmem:[%s12639_s1 + $0x44] ss:$24 sps:$4 sm:$0xff]  }
  0xfb   : > { %2228 = vmatprep.subr.bf16.mxu0 %v9447_v56 }
  0xfc   : > { %2098 = vmatmul.mubr.bf16.gmra.mrb[20].mxu0 %v9386_v33  ;;  %2667 = vmatmul.mubr.bf16.gmra.mrb[100].mxu1 %v10095_v57  ;;  %v10177_v33 = vld [vmem:[%s12639_s1 + $0x2a8] ss:$24 sps:$4 sm:$0xff]  }
  0xfd   : > { %2107 = vmatprep.mubr.bf16.mxu0 %v10040_v34  ;;  %2674 = vmatprep.mubr.bf16.mxu1 %v10100_v58 }
  0xfe   : > { %2229 = vmatpush1.bf16.msra.mxu0 %v9445_v59  ;;  %v9478_v59 = vld [vmem:[%s9981_s13 + $0x8] sm:$0xff]  }
  0xff   : > { %2230 = vmatprep.subr.bf16.mxu0 %v9455_v60  ;;  %v9490_v60 = vld [vmem:[%s9981_s13 + $0x50] sm:$0xff]  }
 0x102   : > { %2231 = vmatpush1.bf16.msra.mxu0 %v9453_v61 }
 0x103   : > { %2232 = vmatprep.subr.bf16.mxu0 %v9462_v62 }
 0x104   : > { %2108 = vmatmul.mubr.bf16.gmra.mrb[24].mxu0 %v9392_v39  ;;  %2675 = vmatmul.mubr.bf16.gmra.mrb[104].mxu1 %v10112_v63 }
 0x105   : > { %2117 = vmatprep.mubr.bf16.mxu0 %v9395_v40  ;;  %2682 = vmatprep.mubr.bf16.mxu1 %v10117_v0 }
 0x106   : > { %2233 = vmatpush1.bf16.msra.mxu0 %v9460_v1 }
 0x107   : > { %2234 = vmatprep.subr.bf16.mxu0 %v9469_v2  ;;  %v7811_v6 = vpop.f32.mrb[0].mxu1  ;;  %v10240_v2 = vld [vmem:[%s12639_s1 + $0x74] ss:$24 sps:$4 sm:$0xff]  }
 0x108   : > { %v7812_v8 = vpop.f32.mrb[1].mxu1 }
 0x109   : > { %v10135_v9 = vadd.f32 %v7812_v8, %v7811_v6  ;;  %v7814_v10 = vpop.f32.mrb[2].mxu1  ;;  %v9510_v8 = vld [vmem:[%s9981_s13 + $0x60] sm:$0xff]  }
 0x10a   : > { %2235 = vmatpush1.bf16.msra.mxu0 %v9467_v3  ;;  %v7815_v12 = vpop.f32.mrb[3].mxu1  ;;  %v9491_v3 = vld [vmem:[%s9981_s13 + $0x10] sm:$0xff]  }
 0x10b   : > { %2236 = vmatprep.subr.bf16.mxu0 %v9475_v4  ;;  %v10140_v14 = vadd.f32 %v7815_v12, %v7814_v10  ;;  %v10254_v12 = vld [vmem:[%s12639_s1 + $0x70] ss:$24 sps:$4 sm:$0xff]  }
 0x10c   : > { %2118 = vmatmul.mubr.bf16.gmra.mrb[28].mxu0 %v10062_v45  ;;  %2683 = vmatmul.mubr.bf16.gmra.mrb[108].mxu1 %v10128_v5 }
 0x10d   : > { %2127 = vmatprep.mubr.bf16.mxu0 %v10067_v46  ;;  %2690 = vmatprep.mubr.bf16.mxu1 %v10133_v7  ;;  %v10202_v46 = vld [vmem:[%s12639_s1 + $0x14] ss:$24 sps:$4 sm:$0xff]  }
 0x10e   : > { %2237 = vmatpush1.bf16.msra.mxu0 %v9473_v11 }
 0x10f   : > { %2238 = vmatprep.subr.bf16.mxu0 %v9483_v13  ;;  %v7817_v18 = vpop.f32.mrb[4].mxu1 }
 0x110   : > { %v7818_v19 = vpop.f32.mrb[5].mxu1 }
 0x111   : > { %v10150_v20 = vadd.f32 %v7818_v19, %v7817_v18  ;;  %v7820_v21 = vpop.f32.mrb[6].mxu1  ;;  %v9520_v19 = vld [vmem:[%s9981_s13 + $0x68] sm:$0xff]  }
 0x112   : > { %2239 = vmatpush1.bf16.msra.mxu0 %v9481_v15  ;;  %v7821_v23 = vpop.f32.mrb[7].mxu1 }
 0x113   : > { %8243 = vmatprep.subr.bf16.mxu0 %v9488_v16  ;;  %v10156_v24 = vadd.f32 %v7821_v23, %v7820_v21  ;;  %v10261_v16 = vld [vmem:[%s12639_s1 + $0xa4] ss:$24 sps:$4 sm:$0xff]   ;;  %v9530_v23 = vld [vmem:[%s9981_s13 + $0x70] sm:$0xff]  }
 0x114   : > { %2128 = vmatmul.mubr.bf16.gmra.mrb[32].mxu0 %v10079_v51  ;;  %2691 = vmatmul.mubr.bf16.gmra.mrb[112].mxu1 %v9434_v17  ;;  %v10213_v51 = vld [vmem:[%s12639_s1 + $0x10] ss:$24 sps:$4 sm:$0xff]  }
 0x115   : > { %2137 = vmatprep.mubr.bf16.mxu0 %v10084_v52  ;;  %2698 = vmatprep.mubr.bf16.mxu1 %v9437_v22 }
 0x117   : > { %v7823_v26 = vpop.f32.mrb[8].mxu1 }
 0x118   : > { %v7824_v27 = vpop.f32.mrb[9].mxu1 }
 0x119   : > { %v10164_v28 = vadd.f32 %v7824_v27, %v7823_v26  ;;  %v7826_v29 = vpop.f32.mrb[10].mxu1  ;;  %v10276_v27 = vld [vmem:[%s12639_s1 + $0xa0] ss:$24 sps:$4 sm:$0xff]  }
 0x11a   : > { %v7827_v31 = vpop.f32.mrb[11].mxu1 }
 0x11b   : > { %v10170_v32 = vadd.f32 %v7827_v31, %v7826_v29  ;;  %v10283_v31 = vld [vmem:[%s12639_s1 + $0xd4] ss:$24 sps:$4 sm:$0xff]  }
 0x11c   : > { %2138 = vmatmul.mubr.bf16.gmra.mrb[36].mxu0 %v10095_v57  ;;  %2699 = vmatmul.mubr.bf16.gmra.mrb[116].mxu1 %v10162_v25  ;;  %v9477_v57 = vld [vmem:[%s9981_s13 + $0x48] sm:$0xff]  }
 0x11d   : > { %2147 = vmatprep.mubr.bf16.mxu0 %v10100_v58  ;;  %2706 = vmatprep.mubr.bf16.mxu1 %v9443_v30 }
 0x11f   : > { %v7829_v34 = vpop.f32.mrb[12].mxu1 }
 0x120   : > { %v7830_v35 = vpop.f32.mrb[13].mxu1 }
 0x121   : > { %v10179_v36 = vadd.f32 %v7830_v35, %v7829_v34  ;;  %v7832_v37 = vpop.f32.mrb[14].mxu1  ;;  %v9540_v35 = vld [vmem:[%s9981_s13 + $0x78] sm:$0xff]  }
 0x122   : > { %v7833_v39 = vpop.f32.mrb[15].mxu1 }
 0x123   : > { %v10187_v40 = vadd.f32 %v7833_v39, %v7832_v37  ;;  %v9547_v39 = vld [vmem:[%s9981_s13 + $0x140] sm:$0xff]  }
 0x124   : > { %2148 = vmatmul.mubr.bf16.gmra.mrb[40].mxu0 %v10112_v63  ;;  %2707 = vmatmul.mubr.bf16.gmra.mrb[120].mxu1 %v10177_v33  ;;  %v10233_v63 = vld [vmem:[%s12639_s1 + $0x40] ss:$24 sps:$4 sm:$0xff]  }
 0x125   : > { %2157 = vmatprep.mubr.bf16.mxu0 %v10117_v0  ;;  %2714 = vmatprep.mubr.bf16.mxu1 %v10184_v38 }
 0x127   : > { %v7835_v41 = vpop.f32.mrb[16].mxu1 }
 0x128   : > { %v7836_v42 = vpop.f32.mrb[17].mxu1 }
 0x129   : > { %v10197_v44 = vadd.f32 %v7836_v42, %v7835_v41  ;;  %v7838_v45 = vpop.f32.mrb[18].mxu1 }
 0x12a   : > { %v7839_v47 = vpop.f32.mrb[19].mxu1 }
 0x12b   : > { %v10205_v48 = vadd.f32 %v7839_v47, %v7838_v45  ;;  %v9489_v45 = vld [vmem:[%s9981_s13 + $0x80] sm:$0xff]  }
 0x12c   : > { %2158 = vmatmul.mubr.bf16.gmra.mrb[44].mxu0 %v10128_v5  ;;  %2715 = vmatmul.mubr.bf16.gmra.mrb[124].mxu1 %v10195_v43  ;;  %v9500_v5 = vld [vmem:[%s9981_s13 + $0x58] sm:$0xff]  }
 0x12d   : > { %2167 = vmatprep.mubr.bf16.mxu0 %v10133_v7  ;;  %2755 = vmatprep.mubr.bf16.mxu1 %v10202_v46  ;;  %v9501_v7 = vld [vmem:[%s9981_s13 + $0x18] sm:$0xff]  }
 0x12f   : > { %v7841_v49 = vpop.f32.mrb[20].mxu1 }
 0x130   : > { %v7842_v50 = vpop.f32.mrb[21].mxu1 }
 0x131   : > { %v10215_v52 = vadd.f32 %v7842_v50, %v7841_v49  ;;  %v7844_v53 = vpop.f32.mrb[22].mxu1 }
 0x132   : > { %v7845_v56 = vpop.f32.mrb[23].mxu1 }
 0x133   : > { %v10224_v58 = vadd.f32 %v7845_v56, %v7844_v53  ;;  %v9498_v53 = vld [vmem:[%s9981_s13 + $0xc8] sm:$0xff]  }
 0x134   : > { %2168 = vmatmul.mubr.bf16.gmra.mrb[48].mxu0 %v9434_v17  ;;  %2756 = vmatmul.mubr.bf16.vlgmr.msra.gmra.mrb[128].mxu1 %v10213_v51  ;;  %v9511_v17 = vld [vmem:[%s9981_s13 + $0x20] sm:$0xff]   ;;  %v9499_v56 = vld [vmem:[%s9981_s13 + $0x88] sm:$0xff]  }
 0x135   : > { %2177 = vmatprep.mubr.bf16.mxu0 %v9437_v22  ;;  %8132 = vmatpush3.bf16.msra.mxu1 %v9464_v54  ;;  %v9521_v22 = vld [vmem:[%s9981_s13 + $0x28] sm:$0xff]  }
 0x136   : > { %2763 = vmatprep.mubr.bf16.mxu1 %v10221_v55  ;;  %8133 = vmatprep.subr.bf16.mxu1 %v9477_v57  ;;  %v9508_v57 = vld [vmem:[%s9981_s13 + $0xd0] sm:$0xff]  }
 0x137   : > { %v7847_v61 = vpop.f32.mrb[24].mxu1 }
 0x138   : > { %v7848_v62 = vpop.f32.mrb[25].mxu1 }
 0x139   : > { %v10235_v0 = vadd.f32 %v7848_v62, %v7847_v61  ;;  %v7850_v1 = vpop.f32.mrb[26].mxu1  ;;  %8134 = vmatpush3.bf16.msra.mxu1 %v9478_v59 }
 0x13a   : > { %v7851_v4 = vpop.f32.mrb[27].mxu1  ;;  %8135 = vmatprep.subr.bf16.mxu1 %v9490_v60 }
 0x13b   : > { %v10245_v6 = vadd.f32 %v7851_v4, %v7850_v1  ;;  %v9509_v1 = vld [vmem:[%s9981_s13 + $0x90] sm:$0xff]   ;;  %v9518_v4 = vld [vmem:[%s9981_s13 + $0xd8] sm:$0xff]  }
 0x13c   : > { %2178 = vmatmul.mubr.bf16.gmra.mrb[52].mxu0 %v10162_v25  ;;  %2764 = vmatmul.mubr.bf16.gmra.mrb[132].mxu1 %v10233_v63 }
 0x13d   : > { %2187 = vmatprep.mubr.bf16.mxu0 %v9443_v30  ;;  %2771 = vmatprep.mubr.bf16.mxu1 %v10240_v2 }
 0x13e   : > { %8136 = vmatpush3.bf16.msra.mxu1 %v9491_v3 }
 0x13f   : > { %8137 = vmatprep.subr.bf16.mxu1 %v9500_v5  ;;  %v7853_v10 = vpop.f32.mrb[28].mxu1 }
 0x140   : > { %v7854_v11 = vpop.f32.mrb[29].mxu1 }
 0x141   : > { %v10256_v13 = vadd.f32 %v7854_v11, %v7853_v10  ;;  %v7856_v15 = vpop.f32.mrb[30].mxu1 }
 0x142   : > { %8138 = vmatpush3.bf16.msra.mxu1 %v9501_v7  ;;  %v7857_v18 = vpop.f32.mrb[31].mxu1  ;;  %v9519_v7 = vld [vmem:[%s9981_s13 + $0x98] sm:$0xff]  }
 0x143   : > { %8139 = vmatprep.subr.bf16.mxu1 %v9510_v8  ;;  %v10266_v21 = vadd.f32 %v7857_v18, %v7856_v15  ;;  %v9528_v8 = vld [vmem:[%s9981_s13 + $0xe0] sm:$0xff]  }
 0x144   : > { %2188 = vmatmul.mubr.bf16.gmra.mrb[56].mxu0 %v10177_v33  ;;  %2772 = vmatmul.mubr.bf16.gmra.mrb[136].mxu1 %v10254_v12  ;;  %v9531_v33 = vld [vmem:[%s9981_s13 + $0x30] sm:$0xff]   ;;  %v9529_v18 = vld [vmem:[%s9981_s13 + $0xa0] sm:$0xff]  }
 0x145   : > { %2197 = vmatprep.mubr.bf16.mxu0 %v10184_v38  ;;  %2779 = vmatprep.mubr.bf16.mxu1 %v10261_v16  ;;  %v9541_v38 = vld [vmem:[%s9981_s13 + $0x38] sm:$0xff]  }
 0x146   : > { %8140 = vmatpush3.bf16.msra.mxu1 %v9511_v17 }
 0x147   : > { %8141 = vmatprep.subr.bf16.mxu1 %v9520_v19  ;;  %v7859_v25 = vpop.f32.mrb[32].mxu1 }
 0x148   : > { %v7860_v26 = vpop.f32.mrb[33].mxu1 }
 0x149   : > { %v10278_v29 = vadd.f32 %v7860_v26, %v7859_v25  ;;  %v7862_v30 = vpop.f32.mrb[34].mxu1  ;;  %v9539_v25 = vld [vmem:[%s9981_s13 + $0xa8] sm:$0xff]   ;;  %v9545_v26 = vld [vmem:[%s9981_s13 + $0xf0] sm:$0xff]  }
 0x14a   : > { %8142 = vmatpush3.bf16.msra.mxu1 %v9521_v22  ;;  %v7863_v34 = vpop.f32.mrb[35].mxu1  ;;  %v9538_v22 = vld [vmem:[%s9981_s13 + $0xe8] sm:$0xff]  }
 0x14b   : > { %8143 = vmatprep.subr.bf16.mxu1 %v9530_v23  ;;  %v10288_v37 = vadd.f32 %v7863_v34, %v7862_v30 }
 0x14c   : > { %2198 = vmatmul.mubr.bf16.gmra.mrb[60].mxu0 %v10195_v43  ;;  %2780 = vmatmul.mubr.bf16.gmra.mrb[140].mxu1 %v10276_v27  ;;  %v10298_v43 = vld [vmem:[%s12639_s1 + $0xd0] ss:$24 sps:$4 sm:$0xff]  }
 0x14d   : > { %2240 = vmatprep.mubr.bf16.mxu0 %v10202_v46  ;;  %2787 = vmatprep.mubr.bf16.mxu1 %v10283_v31  ;;  %v10306_v46 = vld [vmem:[%s12639_s1 + $0x104] ss:$24 sps:$4 sm:$0xff]  }
 0x14e   : > { %8144 = vmatpush3.bf16.msra.mxu1 %v9531_v33 }
 0x14f   : > { %8145 = vmatprep.subr.bf16.mxu1 %v9540_v35  ;;  %v7865_v41 = vpop.f32.mrb[36].mxu1 }
 0x150   : > { %v7866_v42 = vpop.f32.mrb[37].mxu1 }
 0x151   : > { %v10301_v47 = vadd.f32 %v7866_v42, %v7865_v41  ;;  %v7868_v49 = vpop.f32.mrb[38].mxu1  ;;  %v9549_v41 = vld [vmem:[%s9981_s13 + $0xf8] sm:$0xff]  }
 0x152   : > { %8146 = vmatpush3.bf16.msra.mxu1 %v9541_v38  ;;  %v7869_v50 = vpop.f32.mrb[39].mxu1  ;;  %v9546_v38 = vld [vmem:[%s9981_s13 + $0xb0] sm:$0xff]  }
 0x153   : > { %8355 = vmatprep.subr.bf16.mxu1 %v9547_v39  ;;  %v10310_v54 = vadd.f32 %v7869_v50, %v7868_v49  ;;  %v9553_v49 = vld [vmem:[%s9981_s13 + $0x1c0] sm:$0xff]  }
 0x154   : > { %2241 = vmatmul.mubr.bf16.vlgmr.msra.gmra.mrb[0].mxu0 %v10213_v51  ;;  %2788 = vmatmul.mubr.bf16.gmra.mrb[144].mxu1 %v10298_v43  ;;  %v10320_v51 = vld [vmem:[%s12639_s1 + $0x100] ss:$24 sps:$4 sm:$0xff]  }
 0x155   : > { %8244 = vmatpush3.bf16.msra.mxu0 %v9489_v45  ;;  %2250 = vmatprep.mubr.bf16.mxu0 %v10221_v55  ;;  %v10327_v55 = vld [vmem:[%s12639_s1 + $0x134] ss:$24 sps:$4 sm:$0xff]   ;;  %v9550_v45 = vld [vmem:[%s9981_s13 + $0xb8] sm:$0xff]  }
 0x156   : > { %2795 = vmatprep.mubr.bf16.mxu1 %v10306_v46  ;;  %8245 = vmatprep.subr.bf16.mxu0 %v9498_v53 }
 0x157   : > { %v7871_v59 = vpop.f32.mrb[40].mxu1 }
 0x158   : > { %v7872_v60 = vpop.f32.mrb[41].mxu1 }
 0x159   : > { %8246 = vmatpush3.bf16.msra.mxu0 %v9499_v56  ;;  %v10322_v61 = vadd.f32 %v7872_v60, %v7871_v59  ;;  %v7874_v62 = vpop.f32.mrb[42].mxu1  ;;  %v9507_v56 = vld [vmem:[%s12639_s1 + $0x190] ss:$24 sps:$4 sm:$0xff]   ;;  %v9512_v59 = vld [vmem:[%s12639_s1 + $0x1c4] ss:$24 sps:$4 sm:$0xff]  }
 0x15a   : > { %8247 = vmatprep.subr.bf16.mxu0 %v9508_v57  ;;  %v7875_v3 = vpop.f32.mrb[43].mxu1 }
 0x15b   : > { %v10332_v5 = vadd.f32 %v7875_v3, %v7874_v62  ;;  %v9514_v3 = vld [vmem:[%s12639_s1 + $0x1c0] ss:$24 sps:$4 sm:$0xff]  }
 0x15c   : > { %2251 = vmatmul.mubr.bf16.gmra.mrb[4].mxu0 %v10233_v63  ;;  %2796 = vmatmul.mubr.bf16.gmra.mrb[148].mxu1 %v10320_v51  ;;  %v10342_v63 = vld [vmem:[%s12639_s1 + $0x130] ss:$24 sps:$4 sm:$0xff]  }
 0x15d   : > { %2260 = vmatprep.mubr.bf16.mxu0 %v10240_v2  ;;  %2803 = vmatprep.mubr.bf16.mxu1 %v10327_v55  ;;  %v10349_v2 = vld [vmem:[%s12639_s1 + $0x164] ss:$24 sps:$4 sm:$0xff]  }
 0x15e   : > { %8248 = vmatpush3.bf16.msra.mxu0 %v9509_v1 }
 0x15f   : > { %8249 = vmatprep.subr.bf16.mxu0 %v9518_v4  ;;  %v7877_v10 = vpop.f32.mrb[44].mxu1 }
 0x160   : > { %v7878_v11 = vpop.f32.mrb[45].mxu1 }
 0x161   : > { %v10344_v15 = vadd.f32 %v7878_v11, %v7877_v10  ;;  %v7880_v17 = vpop.f32.mrb[46].mxu1 }
 0x162   : > { %8250 = vmatpush3.bf16.msra.mxu0 %v9519_v7  ;;  %v7881_v19 = vpop.f32.mrb[47].mxu1 }
 0x163   : > { %8251 = vmatprep.subr.bf16.mxu0 %v9528_v8  ;;  %v10354_v23 = vadd.f32 %v7881_v19, %v7880_v17  ;;  %v9515_v8 = vld [vmem:[%s12639_s1 + $0x1f4] ss:$24 sps:$4 sm:$0xff]   ;;  %v9517_v17 = vld [vmem:[%s12639_s1 + $0x1f0] ss:$24 sps:$4 sm:$0xff]  }
 0x164   : > { %2261 = vmatmul.mubr.bf16.gmra.mrb[8].mxu0 %v10254_v12  ;;  %2804 = vmatmul.mubr.bf16.gmra.mrb[152].mxu1 %v10342_v63  ;;  %v10364_v12 = vld [vmem:[%s12639_s1 + $0x160] ss:$24 sps:$4 sm:$0xff]  }
 0x165   : > { %2270 = vmatprep.mubr.bf16.mxu0 %v10261_v16  ;;  %2811 = vmatprep.mubr.bf16.mxu1 %v10349_v2  ;;  %v10371_v16 = vld [vmem:[%s12639_s1 + $0x194] ss:$24 sps:$4 sm:$0xff]  }
 0x166   : > { %8252 = vmatpush3.bf16.msra.mxu0 %v9529_v18 }
 0x167   : > { %8253 = vmatprep.subr.bf16.mxu0 %v9538_v22  ;;  %v7883_v30 = vpop.f32.mrb[48].mxu1  ;;  %v9522_v22 = vld [vmem:[%s12639_s1 + $0x224] ss:$24 sps:$4 sm:$0xff]  }
 0x168   : > { %v7884_v33 = vpop.f32.mrb[49].mxu1 }
 0x169   : > { %v10366_v34 = vadd.f32 %v7884_v33, %v7883_v30  ;;  %v7886_v35 = vpop.f32.mrb[50].mxu1  ;;  %v10422_v30 = vld [vmem:[%s12639_s1 + $0x220] ss:$24 sps:$4 sm:$0xff]  }
 0x16a   : > { %8254 = vmatpush3.bf16.msra.mxu0 %v9539_v25  ;;  %v7887_v39 = vpop.f32.mrb[51].mxu1 }
 0x16b   : > { %8255 = vmatprep.subr.bf16.mxu0 %v9545_v26  ;;  %v10376_v42 = vadd.f32 %v7887_v39, %v7886_v35 }
 0x16c   : > { %2271 = vmatmul.mubr.bf16.gmra.mrb[12].mxu0 %v10276_v27  ;;  %2812 = vmatmul.mubr.bf16.gmra.mrb[156].mxu1 %v10364_v12 }
 0x16d   : > { %2280 = vmatprep.mubr.bf16.mxu0 %v10283_v31  ;;  %2819 = vmatprep.mubr.bf16.mxu1 %v10371_v16 }
 0x16e   : > { %8256 = vmatpush3.bf16.msra.mxu0 %v9546_v38  ;;  %v10427_v38 = vld [vmem:[%s12639_s1 + $0x254] ss:$24 sps:$4 sm:$0xff]  }
 0x16f   : > { %8257 = vmatprep.subr.bf16.mxu0 %v9549_v41  ;;  %v7889_v50 = vpop.f32.mrb[52].mxu1 }
 0x170   : > { %v7890_v53 = vpop.f32.mrb[53].mxu1 }
 0x171   : > { %v10386_v57 = vadd.f32 %v7890_v53, %v7889_v50  ;;  %v7892_v27 = vpop.f32.mrb[54].mxu1  ;;  %v10442_v50 = vld [vmem:[%s12639_s1 + $0x250] ss:$24 sps:$4 sm:$0xff]  }
 0x172   : > { %8258 = vmatpush3.bf16.msra.mxu0 %v9550_v45  ;;  %v7893_v31 = vpop.f32.mrb[55].mxu1 }
 0x173   : > { %8467 = vmatprep.subr.bf16.mxu0 %v9553_v49  ;;  %v10392_v60 = vadd.f32 %v7893_v31, %v7892_v27 }
 0x174   : > { %2281 = vmatmul.mubr.bf16.gmra.mrb[16].mxu0 %v10298_v43  ;;  %2820 = vmatmul.mubr.bf16.gmra.mrb[160].mxu1 %v9507_v56 }
 0x175   : > { %2290 = vmatprep.mubr.bf16.mxu0 %v10306_v46  ;;  %2827 = vmatprep.mubr.bf16.mxu1 %v9512_v59 }
 0x177   : > { %v7895_v62 = vpop.f32.mrb[56].mxu1 }
 0x178   : > { %v7896_v1 = vpop.f32.mrb[57].mxu1 }
 0x179   : > { %v10398_v4 = vadd.f32 %v7896_v1, %v7895_v62  ;;  %v7898_v7 = vpop.f32.mrb[58].mxu1 }
 0x17a   : > { %v7899_v43 = vpop.f32.mrb[59].mxu1 }
 0x17b   : > { %v10404_v10 = vadd.f32 %v7899_v43, %v7898_v7  ;;  %v10460_v7 = vld [vmem:[%s12639_s1 + $0x280] ss:$24 sps:$4 sm:$0xff]  }
 0x17c   : > { %2291 = vmatmul.mubr.bf16.gmra.mrb[20].mxu0 %v10320_v51  ;;  %2828 = vmatmul.mubr.bf16.gmra.mrb[164].mxu1 %v9514_v3 }
 0x17d   : > { %2300 = vmatprep.mubr.bf16.mxu0 %v10327_v55  ;;  %2835 = vmatprep.mubr.bf16.mxu1 %v9515_v8 }
 0x17f   : > { %v7901_v46 = vpop.f32.mrb[60].mxu1 }
 0x180   : > { %v7902_v11 = vpop.f32.mrb[61].mxu1 }
 0x181   : > { %v10410_v18 = vadd.f32 %v7902_v11, %v7901_v46  ;;  %v7904_v19 = vpop.f32.mrb[62].mxu1 }
 0x182   : > { %v7905_v51 = vpop.f32.mrb[63].mxu1 }
 0x183   : > { %v10416_v25 = vadd.f32 %v7905_v51, %v7904_v19 }
 0x184   : > { %2301 = vmatmul.mubr.bf16.gmra.mrb[24].mxu0 %v10342_v63  ;;  %2836 = vmatmul.mubr.bf16.gmra.mrb[168].mxu1 %v9517_v17 }
 0x185   : > { %2310 = vmatprep.mubr.bf16.mxu0 %v10349_v2  ;;  %2843 = vmatprep.mubr.bf16.mxu1 %v9522_v22 }
 0x187   : > { %v7923_v55 = vpop.f32.mrb[64].mxu1 }
 0x188   : > { %v7924_v26 = vpop.f32.mrb[65].mxu1 }
 0x189   : > { %v7925_v33 = vadd.f32 %v7924_v26, %v7923_v55  ;;  %v7926_v35 = vpop.f32.mrb[66].mxu1  ;;  %v10478_v55 = vld [vmem:[%s12639_s1 + $0x2b0] ss:$24 sps:$4 sm:$0xff]  }
 0x18a   : > { %v7927_v63 = vpop.f32.mrb[67].mxu1 }
 0x18b   : > { %v10430_v39 = vadd.f32 %v7925_v33, %v10135_v9  ;;  %v7928_v2 = vadd.f32 %v7927_v63, %v7926_v35  ;;  %v2981_v63 = vld [vmem:[%s12641_s3] sm:$0xff] }
 0x18c   : > { %2311 = vmatmul.mubr.bf16.gmra.mrb[28].mxu0 %v10364_v12  ;;  %2844 = vmatmul.mubr.bf16.gmra.mrb[172].mxu1 %v10422_v30  ;;  %v10447_v12 = vld [vmem:[%s12639_s1 + $0x284] ss:$24 sps:$4 sm:$0xff]  }
 0x18d   : > { %2320 = vmatprep.mubr.bf16.mxu0 %v10371_v16  ;;  %v10436_v41 = vadd.f32 %v7928_v2, %v10140_v14  ;;  %2851 = vmatprep.mubr.bf16.mxu1 %v10427_v38  ;;  %v2989_v2 = vld [vmem:[%s12641_s3 + $0x40] sm:$0xff] }
 0x18f   : > { %v7929_v45 = vpop.f32.mrb[68].mxu1 }
 0x190   : > { %v7930_v49 = vpop.f32.mrb[69].mxu1 }
 0x191   : > { %v7931_v9 = vadd.f32 %v7930_v49, %v7929_v45  ;;  %v7932_v53 = vpop.f32.mrb[70].mxu1  ;;  %v7408_v49 = vcombine.high %v2981_v63, %v2989_v2 }
 0x192   : > { %v7933_v16 = vpop.f32.mrb[71].mxu1 }
 0x193   : > { %v10450_v14 = vadd.f32 %v7931_v9, %v10150_v20  ;;  %v7934_v27 = vadd.f32 %v7933_v16, %v7932_v53 }
 0x194   : > { %2321 = vmatmul.mubr.bf16.gmra.mrb[32].mxu0 %v9507_v56  ;;  %2852 = vmatmul.mubr.bf16.gmra.mrb[176].mxu1 %v10442_v50  ;;  %v10465_v56 = vld [vmem:[%s12639_s1 + $0x2b4] ss:$24 sps:$4 sm:$0xff]  }
 0x195   : > { %2330 = vmatprep.mubr.bf16.mxu0 %v9512_v59  ;;  %v10454_v31 = vadd.f32 %v7934_v27, %v10156_v24  ;;  %2859 = vmatprep.mubr.bf16.mxu1 %v10447_v12 }
 0x197   : > { %v7935_v62 = vpop.f32.mrb[72].mxu1 }
 0x198   : > { %v7936_v1 = vpop.f32.mrb[73].mxu1 }
 0x199   : > { %v7937_v43 = vadd.f32 %v7936_v1, %v7935_v62  ;;  %v7938_v20 = vpop.f32.mrb[74].mxu1  ;;  %v2997_v62 = vld [vmem:[%s12641_s3 + $0x80] sm:$0xff] }
 0x19a   : > { %v7939_v59 = vpop.f32.mrb[75].mxu1 }
 0x19b   : > { %v10468_v24 = vadd.f32 %v7937_v43, %v10164_v28  ;;  %v7940_v46 = vadd.f32 %v7939_v59, %v7938_v20 }
 0x19c   : > { %2331 = vmatmul.mubr.bf16.gmra.mrb[36].mxu0 %v9514_v3  ;;  %2860 = vmatmul.mubr.bf16.gmra.mrb[180].mxu1 %v10460_v7  ;;  %v10483_v3 = vld [vmem:[%s12639_s1 + $0x2e4] ss:$24 sps:$4 sm:$0xff]  }
 0x19d   : > { %2340 = vmatprep.mubr.bf16.mxu0 %v9515_v8  ;;  %v10472_v11 = vadd.f32 %v7940_v46, %v10170_v32  ;;  %2867 = vmatprep.mubr.bf16.mxu1 %v10465_v56  ;;  %v9548_v46 = vld [vmem:[%s9981_s13 + $0x100] sm:$0xff]  }
 0x19f   : > { %v7941_v19 = vpop.f32.mrb[76].mxu1 }
 0x1a0   : > { %v7942_v51 = vpop.f32.mrb[77].mxu1 }
 0x1a1   : > { %v7943_v26 = vadd.f32 %v7942_v51, %v7941_v19  ;;  %v7944_v28 = vpop.f32.mrb[78].mxu1  ;;  %v9551_v19 = vld [vmem:[%s9981_s13 + $0x148] sm:$0xff]  }
 0x1a2   : > { %v7945_v8 = vpop.f32.mrb[79].mxu1 }
 0x1a3   : > { %v10486_v32 = vadd.f32 %v7943_v26, %v10179_v36  ;;  %v7946_v33 = vadd.f32 %v7945_v8, %v7944_v28  ;;  %v9552_v8 = vld [vmem:[%s9981_s13 + $0x108] sm:$0xff]  }
 0x1a4   : > { %2341 = vmatmul.mubr.bf16.gmra.mrb[40].mxu0 %v9517_v17  ;;  %2868 = vmatmul.mubr.bf16.gmra.mrb[184].mxu1 %v10478_v55  ;;  %v10502_v17 = vld [vmem:[%s12639_s1 + $0x2e0] ss:$24 sps:$4 sm:$0xff]  }
 0x1a5   : > { %2350 = vmatprep.mubr.bf16.mxu0 %v9522_v22  ;;  %v10490_v35 = vadd.f32 %v7946_v33, %v10187_v40  ;;  %2875 = vmatprep.mubr.bf16.mxu1 %v10483_v3  ;;  %v3013_v33 = vld [vmem:[%s12641_s3 + $0x100] sm:$0xff] }
 0x1a7   : > { %v7947_v36 = vpop.f32.mrb[80].mxu1 }
 0x1a8   : > { %v7948_v45 = vpop.f32.mrb[81].mxu1 }
 0x1a9   : > { %v7949_v22 = vadd.f32 %v7948_v45, %v7947_v36  ;;  %v7950_v40 = vpop.f32.mrb[82].mxu1 }
 0x1aa   : > { %v7951_v9 = vpop.f32.mrb[83].mxu1 }
 0x1ab   : > { %v10505_v53 = vadd.f32 %v7949_v22, %v10197_v44  ;;  %v7952_v16 = vadd.f32 %v7951_v9, %v7950_v40  ;;  %v3005_v44 = vld [vmem:[%s12641_s3 + $0xc0] sm:$0xff]  ;;  %v9556_v22 = vld [vmem:[%s9981_s13 + $0x110] sm:$0xff]  }
 0x1ac   : > { %2351 = vmatmul.mubr.bf16.gmra.mrb[44].mxu0 %v10422_v30  ;;  %2876 = vmatmul.mubr.bf16.gmra.mrb[188].mxu1 %v10502_v17  ;;  %v7407_v30 = vcombine.low %v2981_v63, %v2989_v2  ;;  %v7423_v2 = vcombine.low %v2997_v62, %v3005_v44 }
 0x1ad   : > { %2360 = vmatprep.mubr.bf16.mxu0 %v10427_v38  ;;  %v10511_v27 = vadd.f32 %v7952_v16, %v10205_v48  ;;  %5573 = vmatprep.mubr.bf16.mxu1 %v7408_v49  ;;  %v7424_v38 = vcombine.high %v2997_v62, %v3005_v44  ;;  %v9559_v49 = vld [vmem:[%s9981_s13 + $0x158] sm:$0xff]  }
 0x1ae   : > { %v9560_v44 = vld [vmem:[%s9981_s13 + $0x118] sm:$0xff]  }
 0x1af   : > { %v7953_v1 = vpop.f32.mrb[84].mxu1 }
 0x1b0   : > { %v7954_v43 = vpop.f32.mrb[85].mxu1 }
 0x1b1   : > { %v7955_v20 = vadd.f32 %v7954_v43, %v7953_v1  ;;  %v7956_v59 = vpop.f32.mrb[86].mxu1  ;;  %v3029_v1 = vld [vmem:[%s12641_s3 + $0x180] sm:$0xff] }
 0x1b2   : > { %v7957_v48 = vpop.f32.mrb[87].mxu1 }
 0x1b3   : > { %v10522_v51 = vadd.f32 %v7955_v20, %v10215_v52  ;;  %v7958_v26 = vadd.f32 %v7957_v48, %v7956_v59  ;;  %v3021_v52 = vld [vmem:[%s12641_s3 + $0x140] sm:$0xff]  ;;  %v9567_v48 = vld [vmem:[%s9981_s13 + $0x168] sm:$0xff]  }
 0x1b4   : > { %2361 = vmatmul.mubr.bf16.gmra.mrb[48].mxu0 %v10442_v50  ;;  %5574 = vmatmul.mubr.bf16.vlgmr.msra.gmra.mrb[192].mxu1 %v7407_v30  ;;  %v9555_v50 = vld [vmem:[%s9981_s13 + $0x150] sm:$0xff]   ;;  %v7440_v45 = vcombine.high %v3013_v33, %v3021_v52  ;;  %v7439_v30 = vcombine.low %v3013_v33, %v3021_v52  ;;  %v2982_v33 = vld [vmem:[%s12641_s3 + $0x8] sm:$0xff] }
 0x1b5   : > { %2370 = vmatprep.mubr.bf16.mxu0 %v10447_v12  ;;  %v10527_v28 = vadd.f32 %v7958_v26, %v10224_v58  ;;  %8356 = vmatpush3.bf16.msra.mxu1 %v9548_v46  ;;  %v9564_v46 = vld [vmem:[%s9981_s13 + $0x120] sm:$0xff]   ;;  %v9568_v52 = vld [vmem:[%s9981_s13 + $0x128] sm:$0xff]  }
 0x1b6   : > { %5581 = vmatprep.mubr.bf16.mxu1 %v7424_v38  ;;  %8357 = vmatprep.subr.bf16.mxu1 %v9551_v19 }
 0x1b7   : > { %v7959_v63 = vpop.f32.mrb[88].mxu1 }
 0x1b8   : > { %v7960_v12 = vpop.f32.mrb[89].mxu1 }
 0x1b9   : > { %v7961_v36 = vadd.f32 %v7960_v12, %v7959_v63  ;;  %v7962_v58 = vpop.f32.mrb[90].mxu1  ;;  %8358 = vmatpush3.bf16.msra.mxu1 %v9552_v8 }
 0x1ba   : > { %v7963_v40 = vpop.f32.mrb[91].mxu1  ;;  %8359 = vmatprep.subr.bf16.mxu1 %v9555_v50 }
 0x1bb   : > { %v10540_v9 = vadd.f32 %v7961_v36, %v10235_v0  ;;  %v7964_v16 = vadd.f32 %v7963_v40, %v7962_v58  ;;  %v3037_v0 = vld [vmem:[%s12641_s3 + $0x1c0] sm:$0xff] }
 0x1bc   : > { %2371 = vmatmul.mubr.bf16.gmra.mrb[52].mxu0 %v10460_v7  ;;  %5582 = vmatmul.mubr.bf16.gmra.mrb[196].mxu1 %v7423_v2  ;;  %v9563_v7 = vld [vmem:[%s9981_s13 + $0x160] sm:$0xff]   ;;  %v7456_v59 = vcombine.high %v3029_v1, %v3037_v0  ;;  %v7455_v12 = vcombine.low %v3029_v1, %v3037_v0 }
 0x1bd   : > { %2380 = vmatprep.mubr.bf16.mxu0 %v10465_v56  ;;  %v10545_v62 = vadd.f32 %v7964_v16, %v10245_v6  ;;  %5589 = vmatprep.mubr.bf16.mxu1 %v7440_v45  ;;  %v3061_v0 = vld [vmem:[%s12641_s3 + $0x280] sm:$0xff] }
 0x1be   : > { %8360 = vmatpush3.bf16.msra.mxu1 %v9556_v22  ;;  %v9572_v22 = vld [vmem:[%s9981_s13 + $0x130] sm:$0xff]  }
 0x1bf   : > { %8361 = vmatprep.subr.bf16.mxu1 %v9559_v49  ;;  %v7965_v43 = vpop.f32.mrb[92].mxu1  ;;  %v9575_v49 = vld [vmem:[%s9981_s13 + $0x178] sm:$0xff]  }
 0x1c0   : > { %v7966_v56 = vpop.f32.mrb[93].mxu1 }
 0x1c1   : > { %v7967_v20 = vadd.f32 %v7966_v56, %v7965_v43  ;;  %v7968_v6 = vpop.f32.mrb[94].mxu1  ;;  %v9579_v43 = vld [vmem:[%s9981_s13 + $0x240] sm:$0xff]  }
 0x1c2   : > { %8362 = vmatpush3.bf16.msra.mxu1 %v9560_v44  ;;  %v7969_v38 = vpop.f32.mrb[95].mxu1 }
 0x1c3   : > { %8363 = vmatprep.subr.bf16.mxu1 %v9563_v7  ;;  %v10558_v19 = vadd.f32 %v7967_v20, %v10256_v13  ;;  %v7970_v26 = vadd.f32 %v7969_v38, %v7968_v6  ;;  %v2990_v13 = vld [vmem:[%s12641_s3 + $0x48] sm:$0xff]  ;;  %v3069_v7 = vld [vmem:[%s12641_s3 + $0x2c0] sm:$0xff] }
 0x1c4   : > { %2381 = vmatmul.mubr.bf16.gmra.mrb[56].mxu0 %v10478_v55  ;;  %5590 = vmatmul.mubr.bf16.gmra.mrb[200].mxu1 %v7439_v30  ;;  %v3045_v55 = vld [vmem:[%s12641_s3 + $0x200] sm:$0xff]  ;;  %v7410_v2 = vcombine.high %v2982_v33, %v2990_v13  ;;  %v7409_v30 = vcombine.low %v2982_v33, %v2990_v13  ;;  %v9558_v33 = vld [vmem:[%s9981_s13 + $0x188] sm:$0xff]  }
 0x1c5   : > { %2390 = vmatprep.mubr.bf16.mxu0 %v10483_v3  ;;  %v10563_v8 = vadd.f32 %v7970_v26, %v10266_v21  ;;  %5597 = vmatprep.mubr.bf16.mxu1 %v7456_v59  ;;  %v3053_v21 = vld [vmem:[%s12641_s3 + $0x240] sm:$0xff]  ;;  %v9571_v3 = vld [vmem:[%s9981_s13 + $0x170] sm:$0xff]  }
 0x1c6   : > { %8364 = vmatpush3.bf16.msra.mxu1 %v9564_v46  ;;  %v7472_v45 = vcombine.high %v3045_v55, %v3053_v21  ;;  %v7471_v6 = vcombine.low %v3045_v55, %v3053_v21  ;;  %v9554_v59 = vld [vmem:[%s9981_s13 + $0x180] sm:$0xff]   ;;  %v3014_v55 = vld [vmem:[%s12641_s3 + $0x108] sm:$0xff]  ;;  %v9561_v21 = vld [vmem:[%s9981_s13 + $0x1d0] sm:$0xff]  }
 0x1c7   : > { %8365 = vmatprep.subr.bf16.mxu1 %v9567_v48  ;;  %v7971_v50 = vpop.f32.mrb[96].mxu1  ;;  %v7488_v48 = vcombine.high %v3061_v0, %v3069_v7 }
 0x1c8   : > { %v7972_v63 = vpop.f32.mrb[97].mxu1 }
 0x1c9   : > { %v7973_v36 = vadd.f32 %v7972_v63, %v7971_v50  ;;  %v7974_v58 = vpop.f32.mrb[98].mxu1 }
 0x1ca   : > { %8366 = vmatpush3.bf16.msra.mxu1 %v9568_v52  ;;  %v7975_v40 = vpop.f32.mrb[99].mxu1 }
 0x1cb   : > { %8367 = vmatprep.subr.bf16.mxu1 %v9571_v3  ;;  %v10582_v16 = vadd.f32 %v7973_v36, %v10278_v29  ;;  %v7976_v44 = vadd.f32 %v7975_v40, %v7974_v58  ;;  %v9576_v29 = vld [vmem:[%s9981_s13 + $0x138] sm:$0xff]   ;;  %v9557_v3 = vld [vmem:[%s9981_s13 + $0x1c8] sm:$0xff]  }
 0x1cc   : > { %2391 = vmatmul.mubr.bf16.gmra.mrb[60].mxu0 %v10502_v17  ;;  %5598 = vmatmul.mubr.bf16.gmra.mrb[204].mxu1 %v7455_v12  ;;  %v2998_v17 = vld [vmem:[%s12641_s3 + $0x88] sm:$0xff]  ;;  %v3077_v12 = vld [vmem:[%s12641_s3 + $0x300] sm:$0xff] }
 0x1cd   : > { %5734 = vmatprep.mubr.bf16.mxu0 %v7410_v2  ;;  %v10586_v1 = vadd.f32 %v7976_v44, %v10288_v37  ;;  %5605 = vmatprep.mubr.bf16.mxu1 %v7472_v45  ;;  %v3006_v37 = vld [vmem:[%s12641_s3 + $0xc8] sm:$0xff]  ;;  %v7487_v45 = vcombine.low %v3061_v0, %v3069_v7 }
 0x1ce   : > { %8368 = vmatpush3.bf16.msra.mxu1 %v9572_v22  ;;  %v7426_v26 = vcombine.high %v2998_v17, %v3006_v37  ;;  %v7425_v36 = vcombine.low %v2998_v17, %v3006_v37  ;;  %v3030_v7 = vld [vmem:[%s12641_s3 + $0x188] sm:$0xff]  ;;  %v3093_v37 = vld [vmem:[%s12641_s3 + $0x380] sm:$0xff] }
 0x1cf   : > { %8369 = vmatprep.subr.bf16.mxu1 %v9575_v49  ;;  %v7977_v56 = vpop.f32.mrb[100].mxu1  ;;  %v3038_v17 = vld [vmem:[%s12641_s3 + $0x1c8] sm:$0xff] }
 0x1d0   : > { %v7978_v20 = vpop.f32.mrb[101].mxu1 }
 0x1d1   : > { %v7979_v46 = vadd.f32 %v7978_v20, %v7977_v56  ;;  %v7980_v38 = vpop.f32.mrb[102].mxu1  ;;  %v9565_v56 = vld [vmem:[%s9981_s13 + $0x1d8] sm:$0xff]  }
 0x1d2   : > { %8370 = vmatpush3.bf16.msra.mxu1 %v9576_v29  ;;  %v7981_v52 = vpop.f32.mrb[103].mxu1  ;;  %v9562_v29 = vld [vmem:[%s9981_s13 + $0x190] sm:$0xff]  }
 0x1d3   : > { %8579 = vmatprep.subr.bf16.mxu1 %v9579_v43  ;;  %v10605_v50 = vadd.f32 %v7979_v46, %v10301_v47  ;;  %v7982_v63 = vadd.f32 %v7981_v52, %v7980_v38  ;;  %v3022_v47 = vld [vmem:[%s12641_s3 + $0x148] sm:$0xff] }
 0x1d4   : > { %5735 = vmatmul.mubr.bf16.vlgmr.msra.gmra.mrb[64].mxu0 %v7409_v30  ;;  %5606 = vmatmul.mubr.bf16.gmra.mrb[208].mxu1 %v7471_v6  ;;  %v7442_v22 = vcombine.high %v3014_v55, %v3022_v47  ;;  %v9569_v6 = vld [vmem:[%s9981_s13 + $0x1e0] sm:$0xff]   ;;  %v7441_v46 = vcombine.low %v3014_v55, %v3022_v47  ;;  %v3046_v47 = vld [vmem:[%s12641_s3 + $0x208] sm:$0xff] }
 0x1d5   : > { %8468 = vmatpush3.bf16.msra.mxu0 %v9554_v59  ;;  %v10609_v13 = vadd.f32 %v7982_v63, %v10310_v54  ;;  %5613 = vmatprep.mubr.bf16.mxu1 %v7488_v48  ;;  %v3085_v54 = vld [vmem:[%s12641_s3 + $0x340] sm:$0xff] }
 0x1d6   : > { %5742 = vmatprep.mubr.bf16.mxu0 %v7426_v26  ;;  %8469 = vmatprep.subr.bf16.mxu0 %v9557_v3  ;;  %v7504_v44 = vcombine.high %v3077_v12, %v3085_v54  ;;  %v7503_v48 = vcombine.low %v3077_v12, %v3085_v54  ;;  %v7458_v26 = vcombine.high %v3030_v7, %v3038_v17  ;;  %v3054_v12 = vld [vmem:[%s12641_s3 + $0x248] sm:$0xff]  ;;  %v3109_v54 = vld [vmem:[%s12641_s3 + $0x400] sm:$0xff] }
 0x1d7   : > { %v7983_v2 = vpop.f32.mrb[104].mxu1 }
 0x1d8   : > { %v7984_v58 = vpop.f32.mrb[105].mxu1 }
 0x1d9   : > { %8470 = vmatpush3.bf16.msra.mxu0 %v9558_v33  ;;  %v7985_v40 = vadd.f32 %v7984_v58, %v7983_v2  ;;  %v7986_v49 = vpop.f32.mrb[106].mxu1  ;;  %v9570_v33 = vld [vmem:[%s9981_s13 + $0x1a0] sm:$0xff]   ;;  %v9573_v2 = vld [vmem:[%s9981_s13 + $0x1e8] sm:$0xff]  }
 0x1da   : > { %8471 = vmatprep.subr.bf16.mxu0 %v9561_v21  ;;  %v7987_v43 = vpop.f32.mrb[107].mxu1 }
 0x1db   : > { %v10627_v30 = vadd.f32 %v7985_v40, %v10322_v61  ;;  %v7988_v20 = vadd.f32 %v7987_v43, %v7986_v49  ;;  %v9566_v61 = vld [vmem:[%s9981_s13 + $0x198] sm:$0xff]   ;;  %v7457_v40 = vcombine.low %v3030_v7, %v3038_v17  ;;  %v3062_v17 = vld [vmem:[%s12641_s3 + $0x288] sm:$0xff] }
 0x1dc   : > { %5743 = vmatmul.mubr.bf16.gmra.mrb[68].mxu0 %v7425_v36  ;;  %5614 = vmatmul.mubr.bf16.gmra.mrb[212].mxu1 %v7487_v45  ;;  %v9577_v45 = vld [vmem:[%s9981_s13 + $0x1f0] sm:$0xff]  }
 0x1dd   : > { %5750 = vmatprep.mubr.bf16.mxu0 %v7442_v22  ;;  %v10630_v0 = vadd.f32 %v7988_v20, %v10332_v5  ;;  %5621 = vmatprep.mubr.bf16.mxu1 %v7504_v44  ;;  %v3101_v5 = vld [vmem:[%s12641_s3 + $0x3c0] sm:$0xff] }
 0x1de   : > { %8472 = vmatpush3.bf16.msra.mxu0 %v9562_v29  ;;  %v7520_v63 = vcombine.high %v3093_v37, %v3101_v5  ;;  %v7519_v44 = vcombine.low %v3093_v37, %v3101_v5  ;;  %v7474_v29 = vcombine.high %v3046_v47, %v3054_v12  ;;  %v3070_v37 = vld [vmem:[%s12641_s3 + $0x2c8] sm:$0xff]  ;;  %v9582_v5 = vld [vmem:[%s9981_s13 + $0x1b8] sm:$0xff]  }
 0x1df   : > { %8473 = vmatprep.subr.bf16.mxu0 %v9565_v56  ;;  %v7989_v59 = vpop.f32.mrb[108].mxu1 }
 0x1e0   : > { %v7990_v38 = vpop.f32.mrb[109].mxu1 }
 0x1e1   : > { %v7991_v52 = vadd.f32 %v7990_v38, %v7989_v59  ;;  %v7992_v3 = vpop.f32.mrb[110].mxu1  ;;  %v9581_v59 = vld [vmem:[%s9981_s13 + $0x1f8] sm:$0xff]  }
 0x1e2   : > { %8474 = vmatpush3.bf16.msra.mxu0 %v9566_v61  ;;  %v7993_v21 = vpop.f32.mrb[111].mxu1  ;;  %v9578_v61 = vld [vmem:[%s9981_s13 + $0x1b0] sm:$0xff]  }
 0x1e3   : > { %8475 = vmatprep.subr.bf16.mxu0 %v9569_v6  ;;  %v10649_v36 = vadd.f32 %v7991_v52, %v10344_v15  ;;  %v7994_v58 = vadd.f32 %v7993_v21, %v7992_v3  ;;  %v9574_v15 = vld [vmem:[%s9981_s13 + $0x1a8] sm:$0xff]   ;;  %v7473_v52 = vcombine.low %v3046_v47, %v3054_v12 }
 0x1e4   : > { %5751 = vmatmul.mubr.bf16.gmra.mrb[72].mxu0 %v7441_v46  ;;  %5622 = vmatmul.mubr.bf16.gmra.mrb[216].mxu1 %v7503_v48  ;;  %v9585_v48 = vld [vmem:[%s9981_s13 + $0x2c0] sm:$0xff]   ;;  %v3078_v47 = vld [vmem:[%s12641_s3 + $0x308] sm:$0xff] }
 0x1e5   : > { %5758 = vmatprep.mubr.bf16.mxu0 %v7458_v26  ;;  %v10652_v55 = vadd.f32 %v7994_v58, %v10354_v23  ;;  %5629 = vmatprep.mubr.bf16.mxu1 %v7520_v63  ;;  %v3117_v23 = vld [vmem:[%s12641_s3 + $0x440] sm:$0xff]  ;;  %v3086_v12 = vld [vmem:[%s12641_s3 + $0x348] sm:$0xff] }
 0x1e6   : > { %8476 = vmatpush3.bf16.msra.mxu0 %v9570_v33  ;;  %v7536_v20 = vcombine.high %v3109_v54, %v3117_v23  ;;  %v7535_v63 = vcombine.low %v3109_v54, %v3117_v23  ;;  %v7490_v33 = vcombine.high %v3062_v17, %v3070_v37  ;;  %v3149_v54 = vld [vmem:[%s12641_s3 + $0x540] sm:$0xff] }
 0x1e7   : > { %8477 = vmatprep.subr.bf16.mxu0 %v9573_v2  ;;  %v7995_v22 = vpop.f32.mrb[112].mxu1 }
 0x1e8   : > { %v7996_v49 = vpop.f32.mrb[113].mxu1 }
 0x1e9   : > { %v7997_v43 = vadd.f32 %v7996_v49, %v7995_v22  ;;  %v7998_v56 = vpop.f32.mrb[114].mxu1 }
 0x1ea   : > { %8478 = vmatpush3.bf16.msra.mxu0 %v9574_v15  ;;  %v7999_v6 = vpop.f32.mrb[115].mxu1 }
 0x1eb   : > { %8479 = vmatprep.subr.bf16.mxu0 %v9577_v45  ;;  %v10671_v46 = vadd.f32 %v7997_v43, %v10366_v34  ;;  %v8000_v38 = vadd.f32 %v7999_v6, %v7998_v56  ;;  %v3125_v34 = vld [vmem:[%s12641_s3 + $0x480] sm:$0xff] }
 0x1ec   : > { %5759 = vmatmul.mubr.bf16.gmra.mrb[76].mxu0 %v7457_v40  ;;  %5630 = vmatmul.mubr.bf16.gmra.mrb[220].mxu1 %v7519_v44 }
 0x1ed   : > { %5766 = vmatprep.mubr.bf16.mxu0 %v7474_v29  ;;  %v10674_v7 = vadd.f32 %v8000_v38, %v10376_v42  ;;  %5637 = vmatprep.mubr.bf16.mxu1 %v7536_v20  ;;  %v3133_v42 = vld [vmem:[%s12641_s3 + $0x4c0] sm:$0xff]  ;;  %v7506_v29 = vcombine.high %v3078_v47, %v3086_v12 }
 0x1ee   : > { %8480 = vmatpush3.bf16.msra.mxu0 %v9578_v61  ;;  %v7552_v58 = vcombine.high %v3125_v34, %v3133_v42  ;;  %v7551_v44 = vcombine.low %v3125_v34, %v3133_v42 }
 0x1ef   : > { %8481 = vmatprep.subr.bf16.mxu0 %v9581_v59  ;;  %v8001_v26 = vpop.f32.mrb[116].mxu1 }
 0x1f0   : > { %v8002_v3 = vpop.f32.mrb[117].mxu1 }
 0x1f1   : > { %v8003_v21 = vadd.f32 %v8002_v3, %v8001_v26  ;;  %v8004_v2 = vpop.f32.mrb[118].mxu1 }
 0x1f2   : > { %8482 = vmatpush3.bf16.msra.mxu0 %v9582_v5  ;;  %v8005_v15 = vpop.f32.mrb[119].mxu1  ;;  %v3165_v5 = vld [vmem:[%s12641_s3 + $0x5c0] sm:$0xff] }
 0x1f3   : > { %8691 = vmatprep.subr.bf16.mxu0 %v9585_v48  ;;  %v10691_v45 = vadd.f32 %v8003_v21, %v10386_v57  ;;  %v8006_v22 = vadd.f32 %v8005_v15, %v8004_v2  ;;  %v3141_v57 = vld [vmem:[%s12641_s3 + $0x500] sm:$0xff]  ;;  %v3110_v15 = vld [vmem:[%s12641_s3 + $0x408] sm:$0xff] }
 0x1f4   : > { %5767 = vmatmul.mubr.bf16.gmra.mrb[80].mxu0 %v7473_v52  ;;  %5638 = vmatmul.mubr.bf16.gmra.mrb[224].mxu1 %v7535_v63  ;;  %v7568_v20 = vcombine.high %v3141_v57, %v3149_v54  ;;  %v7567_v48 = vcombine.low %v3141_v57, %v3149_v54 }
 0x1f5   : > { %5774 = vmatprep.mubr.bf16.mxu0 %v7490_v33  ;;  %v10694_v40 = vadd.f32 %v8006_v22, %v10392_v60  ;;  %5645 = vmatprep.mubr.bf16.mxu1 %v7552_v58  ;;  %v7489_v60 = vcombine.low %v3062_v17, %v3070_v37  ;;  %v3094_v17 = vld [vmem:[%s12641_s3 + $0x388] sm:$0xff] }
 0x1f6   : > { %v3102_v37 = vld [vmem:[%s12641_s3 + $0x3c8] sm:$0xff] }
 0x1f7   : > { %v8007_v23 = vpop.f32.mrb[120].mxu1  ;;  %v7522_v26 = vcombine.high %v3094_v17, %v3102_v37  ;;  %v3118_v22 = vld [vmem:[%s12641_s3 + $0x448] sm:$0xff] }
 0x1f8   : > { %v8008_v49 = vpop.f32.mrb[121].mxu1 }
 0x1f9   : > { %v8009_v43 = vadd.f32 %v8008_v49, %v8007_v23  ;;  %v8010_v56 = vpop.f32.mrb[122].mxu1  ;;  %v7538_v23 = vcombine.high %v3110_v15, %v3118_v22 }
 0x1fa   : > { %v8011_v61 = vpop.f32.mrb[123].mxu1 }
 0x1fb   : > { %v10709_v6 = vadd.f32 %v8009_v43, %v10398_v4  ;;  %v8012_v59 = vadd.f32 %v8011_v61, %v8010_v56  ;;  %v3157_v4 = vld [vmem:[%s12641_s3 + $0x580] sm:$0xff]  ;;  %v3126_v61 = vld [vmem:[%s12641_s3 + $0x488] sm:$0xff] }
 0x1fc   : > { %5775 = vmatmul.mubr.bf16.gmra.mrb[84].mxu0 %v7489_v60  ;;  %5646 = vmatmul.mubr.bf16.gmra.mrb[228].mxu1 %v7551_v44  ;;  %v7584_v63 = vcombine.high %v3157_v4, %v3165_v5  ;;  %v7583_v54 = vcombine.low %v3157_v4, %v3165_v5 }
 0x1fd   : > { %5782 = vmatprep.mubr.bf16.mxu0 %v7506_v29  ;;  %v10712_v38 = vadd.f32 %v8012_v59, %v10404_v10  ;;  %5653 = vmatprep.mubr.bf16.mxu1 %v7568_v20  ;;  %v7505_v10 = vcombine.low %v3078_v47, %v3086_v12  ;;  %v3181_v47 = vld [vmem:[%s12641_s3 + $0x640] sm:$0xff]  ;;  %v7521_v12 = vcombine.low %v3094_v17, %v3102_v37  ;;  %v3134_v59 = vld [vmem:[%s12641_s3 + $0x4c8] sm:$0xff] }
 0x1fe   : > { %v3197_v17 = vld [vmem:[%s12641_s3 + $0x6c0] sm:$0xff]  ;;  %v7537_v37 = vcombine.low %v3110_v15, %v3118_v22  ;;  %v7553_v22 = vcombine.low %v3126_v61, %v3134_v59 }
 0x1ff   : > { %v8013_v34 = vpop.f32.mrb[124].mxu1  ;;  %v3213_v15 = vld [vmem:[%s12641_s3 + $0x740] sm:$0xff] }
 0x200   : > { %v8014_v42 = vpop.f32.mrb[125].mxu1 }
 0x201   : > { %v8015_v52 = vadd.f32 %v8014_v42, %v8013_v34  ;;  %v8016_v3 = vpop.f32.mrb[126].mxu1  ;;  %v7554_v34 = vcombine.high %v3126_v61, %v3134_v59 }
 0x202   : > { %v8017_v33 = vpop.f32.mrb[127].mxu1 }
 0x203   : > { %v10727_v21 = vadd.f32 %v8015_v52, %v10410_v18  ;;  %v8018_v2 = vadd.f32 %v8017_v33, %v8016_v3  ;;  %v3173_v18 = vld [vmem:[%s12641_s3 + $0x600] sm:$0xff]  ;;  %v3142_v33 = vld [vmem:[%s12641_s3 + $0x508] sm:$0xff] }
 0x204   : > { %5783 = vmatmul.mubr.bf16.gmra.mrb[88].mxu0 %v7505_v10  ;;  %5654 = vmatmul.mubr.bf16.gmra.mrb[232].mxu1 %v7567_v48  ;;  %v7600_v44 = vcombine.high %v3173_v18, %v3181_v47  ;;  %v7599_v5 = vcombine.low %v3173_v18, %v3181_v47 }
 0x205   : > { %5790 = vmatprep.mubr.bf16.mxu0 %v7522_v26  ;;  %v10730_v58 = vadd.f32 %v8018_v2, %v10416_v25  ;;  %5661 = vmatprep.mubr.bf16.mxu1 %v7584_v63  ;;  %v3150_v2 = vld [vmem:[%s12641_s3 + $0x548] sm:$0xff] }
 0x207   : > { %v8035_v25 = vpop.f32.mrb[128].mxu1 }
 0x208   : > { %v8036_v57 = vpop.f32.mrb[129].mxu1 }
 0x209   : > { %v8037_v60 = vadd.f32 %v8036_v57, %v8035_v25  ;;  %v8038_v49 = vpop.f32.mrb[130].mxu1  ;;  %v7570_v25 = vcombine.high %v3142_v33, %v3150_v2 }
 0x20a   : > { %v8039_v29 = vpop.f32.mrb[131].mxu1 }
 0x20b   : > { %v2758_v43 = vadd.f32 %v8037_v60, %v10430_v39  ;;  %v8040_v56 = vadd.f32 %v8039_v29, %v8038_v49  ;;  %v3189_v39 = vld [vmem:[%s12641_s3 + $0x680] sm:$0xff]  ;;  %v3158_v29 = vld [vmem:[%s12641_s3 + $0x588] sm:$0xff] }
 0x20c   : > { %5791 = vmatmul.mubr.bf16.gmra.mrb[92].mxu0 %v7521_v12  ;;  %5662 = vmatmul.mubr.bf16.gmra.mrb[236].mxu1 %v7583_v54  ;;  %v7616_v48 = vcombine.high %v3189_v39, %v3197_v17  ;;  %v7615_v47 = vcombine.low %v3189_v39, %v3197_v17 }
 0x20d   : > { %5798 = vmatprep.mubr.bf16.mxu0 %v7538_v23  ;;  %2887 = vst.msk [vmem:[%s10748_s19 + $0x10] sm:$0xff] %vm2886_vm0, %v2758_v43  ;;  %v2761_v20 = vadd.f32 %v8040_v56, %v10436_v41  ;;  %5669 = vmatprep.mubr.bf16.mxu1 %v7600_v44  ;;  %v3166_v43 = vld [vmem:[%s12641_s3 + $0x5c8] sm:$0xff]  ;;  %v3229_v56 = vld [vmem:[%s12641_s3 + $0x7c0] sm:$0xff] }
 0x20e   : > { %v7586_v39 = vcombine.high %v3158_v29, %v3166_v43 }
 0x20f   : > { %2890 = vst.msk [vmem:[%s10748_s19 + $0x28] sm:$0xff] %vm2886_vm0, %v2761_v20  ;;  %v8041_v41 = vpop.f32.mrb[132].mxu1  ;;  %v7569_v20 = vcombine.low %v3142_v33, %v3150_v2 }
 0x210   : > { %v8042_v4 = vpop.f32.mrb[133].mxu1 }
 0x211   : > { %v8043_v10 = vadd.f32 %v8042_v4, %v8041_v41  ;;  %v8044_v42 = vpop.f32.mrb[134].mxu1 }
 0x212   : > { %v8045_v26 = vpop.f32.mrb[135].mxu1 }
 0x213   : > { %v2766_v52 = vadd.f32 %v8043_v10, %v10450_v14  ;;  %v8046_v3 = vadd.f32 %v8045_v26, %v8044_v42  ;;  %v3205_v14 = vld [vmem:[%s12641_s3 + $0x700] sm:$0xff]  ;;  %v3174_v42 = vld [vmem:[%s12641_s3 + $0x608] sm:$0xff]  ;;  %v2983_v26 = vld [vmem:[%s12641_s3 + $0x10] sm:$0xff] }
 0x214   : > { %5799 = vmatmul.mubr.bf16.gmra.mrb[96].mxu0 %v7537_v37  ;;  %5670 = vmatmul.mubr.bf16.gmra.mrb[240].mxu1 %v7599_v5  ;;  %v7632_v54 = vcombine.high %v3205_v14, %v3213_v15  ;;  %v7631_v59 = vcombine.low %v3205_v14, %v3213_v15 }
 0x215   : > { %5806 = vmatprep.mubr.bf16.mxu0 %v7554_v34  ;;  %2893 = vst.msk [vmem:[%s10748_s19 + $0x40] sm:$0xff] %vm2886_vm0, %v2766_v52  ;;  %v2769_v63 = vadd.f32 %v8046_v3, %v10454_v31  ;;  %5677 = vmatprep.mubr.bf16.mxu1 %v7616_v48  ;;  %v3182_v48 = vld [vmem:[%s12641_s3 + $0x648] sm:$0xff]  ;;  %v2991_v52 = vld [vmem:[%s12641_s3 + $0x50] sm:$0xff] }
 0x216   : > { %v7602_v15 = vcombine.high %v3174_v42, %v3182_v48 }
 0x217   : > { %2896 = vst.msk [vmem:[%s10748_s19 + $0x58] sm:$0xff] %vm2886_vm0, %v2769_v63  ;;  %v8047_v31 = vpop.f32.mrb[136].mxu1  ;;  %v7585_v63 = vcombine.low %v3158_v29, %v3166_v43  ;;  %v7601_v43 = vcombine.low %v3174_v42, %v3182_v48  ;;  %v10863_v42 = vld [vmem:[%s12641_s3 + $0x708] sm:$0xff] }
 0x218   : > { %v8048_v18 = vpop.f32.mrb[137].mxu1  ;;  %v9584_v48 = vld [vmem:[%s9981_s13 + $0x208] sm:$0xff]  }
 0x219   : > { %v8049_v12 = vadd.f32 %v8048_v18, %v8047_v31  ;;  %v8050_v57 = vpop.f32.mrb[138].mxu1 }
 0x21a   : > { %v8051_v23 = vpop.f32.mrb[139].mxu1 }
 0x21b   : > { %v2774_v60 = vadd.f32 %v8049_v12, %v10468_v24  ;;  %v8052_v49 = vadd.f32 %v8051_v23, %v8050_v57  ;;  %v3221_v24 = vld [vmem:[%s12641_s3 + $0x780] sm:$0xff]  ;;  %v10833_v23 = vld [vmem:[%s12641_s3 + $0x688] sm:$0xff] }
 0x21c   : > { %5807 = vmatmul.mubr.bf16.gmra.mrb[100].mxu0 %v7553_v22  ;;  %5678 = vmatmul.mubr.bf16.gmra.mrb[244].mxu1 %v7615_v47  ;;  %v7648_v37 = vcombine.high %v3221_v24, %v3229_v56  ;;  %v7647_v14 = vcombine.low %v3221_v24, %v3229_v56  ;;  %v7412_v47 = vcombine.high %v2983_v26, %v2991_v52 }
 0x21d   : > { %5814 = vmatprep.mubr.bf16.mxu0 %v7570_v25  ;;  %2899 = vst.msk [vmem:[%s10748_s19 + $0x70] sm:$0xff] %vm2886_vm0, %v2774_v60  ;;  %v2777_v44 = vadd.f32 %v8052_v49, %v10472_v11  ;;  %5685 = vmatprep.mubr.bf16.mxu1 %v7632_v54  ;;  %v2999_v49 = vld [vmem:[%s12641_s3 + $0x90] sm:$0xff] }
 0x21f   : > { %2902 = vst.msk [vmem:[%s10748_s19 + $0x88] sm:$0xff] %vm2886_vm0, %v2777_v44  ;;  %v8053_v11 = vpop.f32.mrb[140].mxu1 }
 0x220   : > { %v8054_v61 = vpop.f32.mrb[141].mxu1 }
 0x221   : > { %v8055_v17 = vadd.f32 %v8054_v61, %v8053_v11  ;;  %v8056_v41 = vpop.f32.mrb[142].mxu1  ;;  %v7411_v11 = vcombine.low %v2983_v26, %v2991_v52  ;;  %v10879_v26 = vld [vmem:[%s12641_s3 + $0x150] sm:$0xff] }
 0x222   : > { %v8057_v4 = vpop.f32.mrb[143].mxu1  ;;  %v9587_v52 = vld [vmem:[%s9981_s13 + $0x250] sm:$0xff]  }
 0x223   : > { %v2782_v5 = vadd.f32 %v8055_v17, %v10486_v32  ;;  %v8058_v34 = vadd.f32 %v8057_v4, %v8056_v41  ;;  %v9580_v17 = vld [vmem:[%s9981_s13 + $0x200] sm:$0xff]   ;;  %v9583_v4 = vld [vmem:[%s9981_s13 + $0x248] sm:$0xff]  }
 0x224   : > { %5815 = vmatmul.mubr.bf16.gmra.mrb[104].mxu0 %v7569_v20  ;;  %5686 = vmatmul.mubr.bf16.gmra.mrb[248].mxu1 %v7631_v59 }
 0x225   : > { %5822 = vmatprep.mubr.bf16.mxu0 %v7586_v39  ;;  %2905 = vst.msk [vmem:[%s10748_s19 + $0xa0] sm:$0xff] %vm2886_vm0, %v2782_v5  ;;  %v2785_v10 = vadd.f32 %v8058_v34, %v10490_v35  ;;  %5693 = vmatprep.mubr.bf16.mxu1 %v7648_v37 }
 0x227   : > { %v2242_v32 = vpop.f32.mrb[0].mxu0  ;;  %2908 = vst.msk [vmem:[%s10748_s19 + $0xb8] sm:$0xff] %vm2886_vm0, %v2785_v10  ;;  %v8059_v35 = vpop.f32.mrb[144].mxu1 }
 0x228   : > { %2884 = vst [vmem:[%s10748_s19] sm:$0xff] %v2242_v32  ;;  %v2244_v3 = vpop.f32.mrb[1].mxu0  ;;  %v8060_v33 = vpop.f32.mrb[145].mxu1 }
 0x229   : > { %2885 = vst [vmem:[%s10748_s19 + $0x8] sm:$0xff] %v2244_v3  ;;  %v2246_v2 = vpop.f32.mrb[2].mxu0  ;;  %v8061_v31 = vadd.f32 %v8060_v33, %v8059_v35  ;;  %v8062_v22 = vpop.f32.mrb[146].mxu1 }
 0x22a   : > { %2888 = vst [vmem:[%s10748_s19 + $0x18] sm:$0xff] %v2246_v2  ;;  %v2248_v18 = vpop.f32.mrb[3].mxu0  ;;  %v8063_v25 = vpop.f32.mrb[147].mxu1 }
 0x22b   : > { %2889 = vst [vmem:[%s10748_s19 + $0x20] sm:$0xff] %v2248_v18  ;;  %v2790_v12 = vadd.f32 %v8061_v31, %v10505_v53  ;;  %v8064_v57 = vadd.f32 %v8063_v25, %v8062_v22  ;;  %v10838_v53 = vld [vmem:[%s12641_s3 + $0x6c8] sm:$0xff]  ;;  %v9588_v25 = vld [vmem:[%s9981_s13 + $0x210] sm:$0xff]  }
 0x22c   : > { %5823 = vmatmul.mubr.bf16.gmra.mrb[108].mxu0 %v7585_v63  ;;  %5694 = vmatmul.mubr.bf16.gmra.mrb[252].mxu1 %v7647_v14  ;;  %v7618_v20 = vcombine.high %v10833_v23, %v10838_v53  ;;  %v7617_v63 = vcombine.low %v10833_v23, %v10838_v53 }
 0x22d   : > { %5830 = vmatprep.mubr.bf16.mxu0 %v7602_v15  ;;  %2911 = vst.msk [vmem:[%s10748_s19 + $0xd0] sm:$0xff] %vm2886_vm0, %v2790_v12  ;;  %v2793_v54 = vadd.f32 %v8064_v57, %v10511_v27  ;;  %5895 = vmatprep.mubr.bf16.mxu1 %v7412_v47  ;;  %v3007_v27 = vld [vmem:[%s12641_s3 + $0xd0] sm:$0xff]  ;;  %v9591_v57 = vld [vmem:[%s9981_s13 + $0x258] sm:$0xff]  }
 0x22e   : > { %v7428_v41 = vcombine.high %v2999_v49, %v3007_v27  ;;  %v7427_v14 = vcombine.low %v2999_v49, %v3007_v27  ;;  %v9592_v49 = vld [vmem:[%s9981_s13 + $0x218] sm:$0xff]  }
 0x22f   : > { %v2252_v60 = vpop.f32.mrb[4].mxu0  ;;  %2914 = vst.msk [vmem:[%s10748_s19 + $0xe8] sm:$0xff] %vm2886_vm0, %v2793_v54  ;;  %v8065_v44 = vpop.f32.mrb[148].mxu1 }
 0x230   : > { %2891 = vst [vmem:[%s10748_s19 + $0x30] sm:$0xff] %v2252_v60  ;;  %v2254_v29 = vpop.f32.mrb[5].mxu0  ;;  %v8066_v24 = vpop.f32.mrb[149].mxu1  ;;  %v10903_v60 = vld [vmem:[%s12641_s3 + $0x788] sm:$0xff] }
 0x231   : > { %2892 = vst [vmem:[%s10748_s19 + $0x38] sm:$0xff] %v2254_v29  ;;  %v2256_v56 = vpop.f32.mrb[6].mxu0  ;;  %v8067_v61 = vadd.f32 %v8066_v24, %v8065_v44  ;;  %v8068_v59 = vpop.f32.mrb[150].mxu1  ;;  %v10919_v44 = vld [vmem:[%s12641_s3 + $0x1d0] sm:$0xff]  ;;  %v9595_v29 = vld [vmem:[%s9981_s13 + $0x260] sm:$0xff]  }
 0x232   : > { %2894 = vst [vmem:[%s10748_s19 + $0x48] sm:$0xff] %v2256_v56  ;;  %v2258_v39 = vpop.f32.mrb[7].mxu0  ;;  %v8069_v37 = vpop.f32.mrb[151].mxu1 }
 0x233   : > { %2895 = vst [vmem:[%s10748_s19 + $0x50] sm:$0xff] %v2258_v39  ;;  %v2798_v5 = vadd.f32 %v8067_v61, %v10522_v51  ;;  %v8070_v34 = vadd.f32 %v8069_v37, %v8068_v59  ;;  %v10868_v51 = vld [vmem:[%s12641_s3 + $0x748] sm:$0xff] }
 0x234   : > { %5831 = vmatmul.mubr.bf16.gmra.mrb[112].mxu0 %v7601_v43  ;;  %5896 = vmatmul.mubr.bf16.vlgmr.msra.gmra.mrb[0].mxu1 %v7411_v11  ;;  %v7634_v15 = vcombine.high %v10863_v42, %v10868_v51  ;;  %v7633_v56 = vcombine.low %v10863_v42, %v10868_v51 }
 0x235   : > { %5838 = vmatprep.mubr.bf16.mxu0 %v7618_v20  ;;  %2917 = vst.msk [vmem:[%s10748_s19 + $0x100] sm:$0xff] %vm2886_vm0, %v2798_v5  ;;  %v2801_v10 = vadd.f32 %v8070_v34, %v10527_v28  ;;  %8580 = vmatpush3.bf16.msra.mxu1 %v9580_v17  ;;  %v10874_v28 = vld [vmem:[%s12641_s3 + $0x110] sm:$0xff]  ;;  %v9599_v34 = vld [vmem:[%s9981_s13 + $0x268] sm:$0xff]  }
 0x236   : > { %5903 = vmatprep.mubr.bf16.mxu1 %v7428_v41  ;;  %8581 = vmatprep.subr.bf16.mxu1 %v9583_v4  ;;  %v7444_v47 = vcombine.high %v10874_v28, %v10879_v26  ;;  %v7443_v61 = vcombine.low %v10874_v28, %v10879_v26  ;;  %v9596_v4 = vld [vmem:[%s9981_s13 + $0x220] sm:$0xff]   ;;  %v10961_v26 = vld [vmem:[%s12641_s3 + $0x250] sm:$0xff] }
 0x237   : > { %v2262_v32 = vpop.f32.mrb[8].mxu0  ;;  %2920 = vst.msk [vmem:[%s10748_s19 + $0x118] sm:$0xff] %vm2886_vm0, %v2801_v10  ;;  %v8071_v35 = vpop.f32.mrb[152].mxu1 }
 0x238   : > { %2897 = vst [vmem:[%s10748_s19 + $0x60] sm:$0xff] %v2262_v32  ;;  %v2264_v3 = vpop.f32.mrb[9].mxu0  ;;  %v8072_v33 = vpop.f32.mrb[153].mxu1  ;;  %v9600_v32 = vld [vmem:[%s9981_s13 + $0x228] sm:$0xff]  }
 0x239   : > { %2898 = vst [vmem:[%s10748_s19 + $0x68] sm:$0xff] %v2264_v3  ;;  %v2266_v2 = vpop.f32.mrb[10].mxu0  ;;  %v8073_v31 = vadd.f32 %v8072_v33, %v8071_v35  ;;  %v8074_v22 = vpop.f32.mrb[154].mxu1  ;;  %8582 = vmatpush3.bf16.msra.mxu1 %v9584_v48  ;;  %v10945_v48 = vld [vmem:[%s12641_s3 + $0x18] sm:$0xff] }
 0x23a   : > { %2900 = vst [vmem:[%s10748_s19 + $0x78] sm:$0xff] %v2266_v2  ;;  %v2268_v18 = vpop.f32.mrb[11].mxu0  ;;  %v8075_v12 = vpop.f32.mrb[155].mxu1  ;;  %8583 = vmatprep.subr.bf16.mxu1 %v9587_v52  ;;  %v9603_v52 = vld [vmem:[%s9981_s13 + $0x270] sm:$0xff]  }
 0x23b   : > { %2901 = vst [vmem:[%s10748_s19 + $0x80] sm:$0xff] %v2268_v18  ;;  %v2806_v54 = vadd.f32 %v8073_v31, %v10540_v9  ;;  %v8076_v23 = vadd.f32 %v8075_v12, %v8074_v22  ;;  %v10908_v9 = vld [vmem:[%s12641_s3 + $0x7c8] sm:$0xff] }
 0x23c   : > { %5839 = vmatmul.mubr.bf16.gmra.mrb[116].mxu0 %v7617_v63  ;;  %5904 = vmatmul.mubr.bf16.gmra.mrb[4].mxu1 %v7427_v14  ;;  %v7650_v59 = vcombine.high %v10903_v60, %v10908_v9  ;;  %v7649_v63 = vcombine.low %v10903_v60, %v10908_v9  ;;  %v10987_v60 = vld [vmem:[%s12641_s3 + $0x290] sm:$0xff]  ;;  %v9608_v9 = vld [vmem:[%s9981_s13 + $0x238] sm:$0xff]  }
 0x23d   : > { %5846 = vmatprep.mubr.bf16.mxu0 %v7634_v15  ;;  %2923 = vst.msk [vmem:[%s10748_s19 + $0x130] sm:$0xff] %vm2886_vm0, %v2806_v54  ;;  %v2809_v53 = vadd.f32 %v8076_v23, %v10545_v62  ;;  %5911 = vmatprep.mubr.bf16.mxu1 %v7444_v47  ;;  %v10914_v62 = vld [vmem:[%s12641_s3 + $0x190] sm:$0xff] }
 0x23e   : > { %8584 = vmatpush3.bf16.msra.mxu1 %v9588_v25  ;;  %v7460_v37 = vcombine.high %v10914_v62, %v10919_v44  ;;  %v7459_v14 = vcombine.low %v10914_v62, %v10919_v44  ;;  %v9604_v25 = vld [vmem:[%s9981_s13 + $0x230] sm:$0xff]   ;;  %v9611_v62 = vld [vmem:[%s9981_s13 + $0x340] sm:$0xff]  }
 0x23f   : > { %v2272_v27 = vpop.f32.mrb[12].mxu0  ;;  %8585 = vmatprep.subr.bf16.mxu1 %v9591_v57  ;;  %2926 = vst.msk [vmem:[%s10748_s19 + $0x148] sm:$0xff] %vm2886_vm0, %v2809_v53  ;;  %v8077_v43 = vpop.f32.mrb[156].mxu1  ;;  %v9607_v57 = vld [vmem:[%s9981_s13 + $0x278] sm:$0xff]  }
 0x240   : > { %2903 = vst [vmem:[%s10748_s19 + $0x90] sm:$0xff] %v2272_v27  ;;  %v2274_v24 = vpop.f32.mrb[13].mxu0  ;;  %v8078_v11 = vpop.f32.mrb[157].mxu1  ;;  %v11003_v27 = vld [vmem:[%s12641_s3 + $0xd8] sm:$0xff] }
 0x241   : > { %2904 = vst [vmem:[%s10748_s19 + $0x98] sm:$0xff] %v2274_v24  ;;  %v2276_v20 = vpop.f32.mrb[14].mxu0  ;;  %v8079_v39 = vadd.f32 %v8078_v11, %v8077_v43  ;;  %v8080_v17 = vpop.f32.mrb[158].mxu1 }
 0x242   : > { %2906 = vst [vmem:[%s10748_s19 + $0xa8] sm:$0xff] %v2276_v20  ;;  %v2278_v41 = vpop.f32.mrb[15].mxu0  ;;  %8586 = vmatpush3.bf16.msra.mxu1 %v9592_v49  ;;  %v8081_v5 = vpop.f32.mrb[159].mxu1  ;;  %v9586_v20 = vld [vmem:[%s9981_s13 + $0x280] sm:$0xff]  }
 0x243   : > { %2907 = vst [vmem:[%s10748_s19 + $0xb0] sm:$0xff] %v2278_v41  ;;  %8587 = vmatprep.subr.bf16.mxu1 %v9595_v29  ;;  %v2814_v10 = vadd.f32 %v8079_v39, %v10558_v19  ;;  %v8082_v42 = vadd.f32 %v8081_v5, %v8080_v17  ;;  %v10950_v19 = vld [vmem:[%s12641_s3 + $0x58] sm:$0xff] }
 0x244   : > { %5847 = vmatmul.mubr.bf16.gmra.mrb[120].mxu0 %v7633_v56  ;;  %5912 = vmatmul.mubr.bf16.gmra.mrb[8].mxu1 %v7443_v61  ;;  %v7414_v15 = vcombine.high %v10945_v48, %v10950_v19  ;;  %v7413_v43 = vcombine.low %v10945_v48, %v10950_v19  ;;  %v9593_v48 = vld [vmem:[%s9981_s13 + $0x2d0] sm:$0xff]  }
 0x245   : > { %5854 = vmatprep.mubr.bf16.mxu0 %v7650_v59  ;;  %2929 = vst.msk [vmem:[%s10748_s19 + $0x160] sm:$0xff] %vm2886_vm0, %v2814_v10  ;;  %v2817_v51 = vadd.f32 %v8082_v42, %v10563_v8  ;;  %5919 = vmatprep.mubr.bf16.mxu1 %v7460_v37  ;;  %v10956_v8 = vld [vmem:[%s12641_s3 + $0x210] sm:$0xff]  ;;  %v9590_v10 = vld [vmem:[%s9981_s13 + $0x288] sm:$0xff]  }
 0x246   : > { %8588 = vmatpush3.bf16.msra.mxu1 %v9596_v4  ;;  %v7476_v47 = vcombine.high %v10956_v8, %v10961_v26  ;;  %v7475_v11 = vcombine.low %v10956_v8, %v10961_v26  ;;  %v9589_v4 = vld [vmem:[%s9981_s13 + $0x2c8] sm:$0xff]  }
 0x247   : > { %v2282_v28 = vpop.f32.mrb[16].mxu0  ;;  %8589 = vmatprep.subr.bf16.mxu1 %v9599_v34  ;;  %2932 = vst.msk [vmem:[%s10748_s19 + $0x178] sm:$0xff] %vm2886_vm0, %v2817_v51  ;;  %v8083_v35 = vpop.f32.mrb[160].mxu1  ;;  %v11030_v51 = vld [vmem:[%s12641_s3 + $0x118] sm:$0xff] }
 0x248   : > { %2909 = vst [vmem:[%s10748_s19 + $0xc0] sm:$0xff] %v2282_v28  ;;  %v2284_v3 = vpop.f32.mrb[17].mxu0  ;;  %v8084_v33 = vpop.f32.mrb[161].mxu1 }
 0x249   : > { %2910 = vst [vmem:[%s10748_s19 + $0xc8] sm:$0xff] %v2284_v3  ;;  %v2286_v2 = vpop.f32.mrb[18].mxu0  ;;  %v8085_v31 = vadd.f32 %v8084_v33, %v8083_v35  ;;  %v8086_v22 = vpop.f32.mrb[162].mxu1 }
 0x24a   : > { %2912 = vst [vmem:[%s10748_s19 + $0xd8] sm:$0xff] %v2286_v2  ;;  %v2288_v18 = vpop.f32.mrb[19].mxu0  ;;  %8590 = vmatpush3.bf16.msra.mxu1 %v9600_v32  ;;  %v8087_v12 = vpop.f32.mrb[163].mxu1  ;;  %v11041_v32 = vld [vmem:[%s12641_s3 + $0x310] sm:$0xff] }
 0x24b   : > { %2913 = vst [vmem:[%s10748_s19 + $0xe0] sm:$0xff] %v2288_v18  ;;  %8591 = vmatprep.subr.bf16.mxu1 %v9603_v52  ;;  %v2822_v54 = vadd.f32 %v8085_v31, %v10582_v16  ;;  %v8088_v23 = vadd.f32 %v8087_v12, %v8086_v22  ;;  %v10992_v16 = vld [vmem:[%s12641_s3 + $0x2d0] sm:$0xff]  ;;  %v9597_v18 = vld [vmem:[%s9981_s13 + $0x2d8] sm:$0xff]  }
 0x24c   : > { %5855 = vmatmul.mubr.bf16.gmra.mrb[124].mxu0 %v7649_v63  ;;  %5920 = vmatmul.mubr.bf16.gmra.mrb[12].mxu1 %v7459_v14  ;;  %v7492_v17 = vcombine.high %v10987_v60, %v10992_v16  ;;  %v7491_v3 = vcombine.low %v10987_v60, %v10992_v16  ;;  %v9594_v31 = vld [vmem:[%s9981_s13 + $0x290] sm:$0xff]   ;;  %v9601_v60 = vld [vmem:[%s9981_s13 + $0x2e0] sm:$0xff]  }
 0x24d   : > { %6056 = vmatprep.mubr.bf16.mxu0 %v7414_v15  ;;  %2935 = vst.msk [vmem:[%s10748_s19 + $0x190] sm:$0xff] %vm2886_vm0, %v2822_v54  ;;  %v2825_v53 = vadd.f32 %v8088_v23, %v10586_v1  ;;  %5927 = vmatprep.mubr.bf16.mxu1 %v7476_v47  ;;  %v10998_v1 = vld [vmem:[%s12641_s3 + $0x98] sm:$0xff] }
 0x24e   : > { %8592 = vmatpush3.bf16.msra.mxu1 %v9604_v25  ;;  %v7430_v41 = vcombine.high %v10998_v1, %v11003_v27  ;;  %v7429_v26 = vcombine.low %v10998_v1, %v11003_v27  ;;  %v9598_v54 = vld [vmem:[%s9981_s13 + $0x298] sm:$0xff]  }
 0x24f   : > { %v2292_v49 = vpop.f32.mrb[20].mxu0  ;;  %8593 = vmatprep.subr.bf16.mxu1 %v9607_v57  ;;  %2938 = vst.msk [vmem:[%s10748_s19 + $0x1a8] sm:$0xff] %vm2886_vm0, %v2825_v53  ;;  %v8089_v44 = vpop.f32.mrb[164].mxu1  ;;  %v11071_v57 = vld [vmem:[%s12641_s3 + $0x198] sm:$0xff]  ;;  %v11087_v53 = vld [vmem:[%s12641_s3 + $0x3d0] sm:$0xff] }
 0x250   : > { %2915 = vst [vmem:[%s10748_s19 + $0xf0] sm:$0xff] %v2292_v49  ;;  %v2294_v29 = vpop.f32.mrb[21].mxu0  ;;  %v8090_v24 = vpop.f32.mrb[165].mxu1 }
 0x251   : > { %2916 = vst [vmem:[%s10748_s19 + $0xf8] sm:$0xff] %v2294_v29  ;;  %v2296_v56 = vpop.f32.mrb[22].mxu0  ;;  %v8091_v61 = vadd.f32 %v8090_v24, %v8089_v44  ;;  %v8092_v59 = vpop.f32.mrb[166].mxu1 }
 0x252   : > { %2918 = vst [vmem:[%s10748_s19 + $0x108] sm:$0xff] %v2296_v56  ;;  %v2298_v39 = vpop.f32.mrb[23].mxu0  ;;  %8594 = vmatpush3.bf16.msra.mxu1 %v9608_v9  ;;  %v8093_v37 = vpop.f32.mrb[167].mxu1 }
 0x253   : > { %2919 = vst [vmem:[%s10748_s19 + $0x110] sm:$0xff] %v2298_v39  ;;  %8803 = vmatprep.subr.bf16.mxu1 %v9611_v62  ;;  %v2830_v5 = vadd.f32 %v8091_v61, %v10605_v50  ;;  %v8094_v34 = vadd.f32 %v8093_v37, %v8092_v59  ;;  %v11035_v50 = vld [vmem:[%s12641_s3 + $0x158] sm:$0xff]  ;;  %v9605_v61 = vld [vmem:[%s9981_s13 + $0x2e8] sm:$0xff]  }
 0x254   : > { %6057 = vmatmul.mubr.bf16.vlgmr.msra.gmra.mrb[128].mxu0 %v7413_v43  ;;  %5928 = vmatmul.mubr.bf16.gmra.mrb[16].mxu1 %v7475_v11  ;;  %v7446_v63 = vcombine.high %v11030_v51, %v11035_v50  ;;  %v7445_v49 = vcombine.low %v11030_v51, %v11035_v50  ;;  %v9602_v11 = vld [vmem:[%s9981_s13 + $0x2a0] sm:$0xff]   ;;  %v9606_v37 = vld [vmem:[%s9981_s13 + $0x2a8] sm:$0xff]  }
 0x255   : > { %8692 = vmatpush3.bf16.msra.mxu0 %v9586_v20  ;;  %2941 = vst.msk [vmem:[%s10748_s19 + $0x1c0] sm:$0xff] %vm2886_vm0, %v2830_v5  ;;  %v2833_v42 = vadd.f32 %v8094_v34, %v10609_v13  ;;  %5935 = vmatprep.mubr.bf16.mxu1 %v7492_v17  ;;  %v11046_v13 = vld [vmem:[%s12641_s3 + $0x350] sm:$0xff] }
 0x256   : > { %6064 = vmatprep.mubr.bf16.mxu0 %v7430_v41  ;;  %8693 = vmatprep.subr.bf16.mxu0 %v9589_v4  ;;  %v7508_v15 = vcombine.high %v11041_v32, %v11046_v13  ;;  %v7507_v62 = vcombine.low %v11041_v32, %v11046_v13  ;;  %v11113_v41 = vld [vmem:[%s12641_s3 + $0x218] sm:$0xff]  ;;  %v11129_v5 = vld [vmem:[%s12641_s3 + $0x450] sm:$0xff] }
 0x257   : > { %v2302_v19 = vpop.f32.mrb[24].mxu0  ;;  %2944 = vst.msk [vmem:[%s10748_s19 + $0x1d8] sm:$0xff] %vm2886_vm0, %v2833_v42  ;;  %v8095_v28 = vpop.f32.mrb[168].mxu1  ;;  %v9609_v34 = vld [vmem:[%s9981_s13 + $0x2f0] sm:$0xff]  }
 0x258   : > { %2921 = vst [vmem:[%s10748_s19 + $0x120] sm:$0xff] %v2302_v19  ;;  %v2304_v8 = vpop.f32.mrb[25].mxu0  ;;  %v8096_v52 = vpop.f32.mrb[169].mxu1 }
 0x259   : > { %2922 = vst [vmem:[%s10748_s19 + $0x128] sm:$0xff] %v2304_v8  ;;  %v2306_v35 = vpop.f32.mrb[26].mxu0  ;;  %8694 = vmatpush3.bf16.msra.mxu0 %v9590_v10  ;;  %v8097_v33 = vadd.f32 %v8096_v52, %v8095_v28  ;;  %v8098_v2 = vpop.f32.mrb[170].mxu1  ;;  %v9610_v52 = vld [vmem:[%s9981_s13 + $0x2b0] sm:$0xff]  }
 0x25a   : > { %2924 = vst [vmem:[%s10748_s19 + $0x138] sm:$0xff] %v2306_v35  ;;  %v2308_v14 = vpop.f32.mrb[27].mxu0  ;;  %8695 = vmatprep.subr.bf16.mxu0 %v9593_v48  ;;  %v8099_v22 = vpop.f32.mrb[171].mxu1 }
 0x25b   : > { %2925 = vst [vmem:[%s10748_s19 + $0x140] sm:$0xff] %v2308_v14  ;;  %v2838_v47 = vadd.f32 %v8097_v33, %v10627_v30  ;;  %v8100_v25 = vadd.f32 %v8099_v22, %v8098_v2  ;;  %v11076_v30 = vld [vmem:[%s12641_s3 + $0x1d8] sm:$0xff]  ;;  %v3127_v22 = vld [vmem:[%s12641_s3 + $0x490] sm:$0xff] }
 0x25c   : > { %6065 = vmatmul.mubr.bf16.gmra.mrb[132].mxu0 %v7429_v26  ;;  %5936 = vmatmul.mubr.bf16.gmra.mrb[20].mxu1 %v7491_v3  ;;  %v7462_v44 = vcombine.high %v11071_v57, %v11076_v30  ;;  %v7461_v51 = vcombine.low %v11071_v57, %v11076_v30  ;;  %v9613_v3 = vld [vmem:[%s9981_s13 + $0x2f8] sm:$0xff]  }
 0x25d   : > { %6072 = vmatprep.mubr.bf16.mxu0 %v7446_v63  ;;  %2947 = vst.msk [vmem:[%s10748_s19 + $0x1f0] sm:$0xff] %vm2886_vm0, %v2838_v47  ;;  %v2841_v12 = vadd.f32 %v8100_v25, %v10630_v0  ;;  %5943 = vmatprep.mubr.bf16.mxu1 %v7508_v15  ;;  %v11082_v0 = vld [vmem:[%s12641_s3 + $0x390] sm:$0xff]  ;;  %v3064_v14 = vld [vmem:[%s12641_s3 + $0x298] sm:$0xff] }
 0x25e   : > { %8696 = vmatpush3.bf16.msra.mxu0 %v9594_v31  ;;  %v7524_v56 = vcombine.high %v11082_v0, %v11087_v53  ;;  %v7523_v19 = vcombine.low %v11082_v0, %v11087_v53  ;;  %v9614_v15 = vld [vmem:[%s9981_s13 + $0x2b8] sm:$0xff]  }
 0x25f   : > { %v2312_v23 = vpop.f32.mrb[28].mxu0  ;;  %8697 = vmatprep.subr.bf16.mxu0 %v9597_v18  ;;  %2950 = vst.msk [vmem:[%s10748_s19 + $0x208] sm:$0xff] %vm2886_vm0, %v2841_v12  ;;  %v8101_v16 = vpop.f32.mrb[172].mxu1  ;;  %v11166_v18 = vld [vmem:[%s9981_s13 + $0x3c0] sm:$0xff]  }
 0x260   : > { %2927 = vst [vmem:[%s10748_s19 + $0x150] sm:$0xff] %v2312_v23  ;;  %v2314_v9 = vpop.f32.mrb[29].mxu0  ;;  %v8102_v1 = vpop.f32.mrb[173].mxu1 }
 0x261   : > { %2928 = vst [vmem:[%s10748_s19 + $0x158] sm:$0xff] %v2314_v9  ;;  %v2316_v27 = vpop.f32.mrb[30].mxu0  ;;  %v8103_v29 = vadd.f32 %v8102_v1, %v8101_v16  ;;  %v8104_v43 = vpop.f32.mrb[174].mxu1 }
 0x262   : > { %2930 = vst [vmem:[%s10748_s19 + $0x168] sm:$0xff] %v2316_v27  ;;  %v2318_v24 = vpop.f32.mrb[31].mxu0  ;;  %8698 = vmatpush3.bf16.msra.mxu0 %v9598_v54  ;;  %v8105_v20 = vpop.f32.mrb[175].mxu1 }
 0x263   : > { %2931 = vst [vmem:[%s10748_s19 + $0x170] sm:$0xff] %v2318_v24  ;;  %8699 = vmatprep.subr.bf16.mxu0 %v9601_v60  ;;  %v2846_v59 = vadd.f32 %v8103_v29, %v10649_v36  ;;  %v8106_v39 = vadd.f32 %v8105_v20, %v8104_v43  ;;  %v11118_v36 = vld [vmem:[%s12641_s3 + $0x258] sm:$0xff]  ;;  %v3143_v29 = vld [vmem:[%s12641_s3 + $0x510] sm:$0xff] }
 0x264   : > { %6073 = vmatmul.mubr.bf16.gmra.mrb[136].mxu0 %v7445_v49  ;;  %5944 = vmatmul.mubr.bf16.gmra.mrb[24].mxu1 %v7507_v62  ;;  %v7478_v32 = vcombine.high %v11113_v41, %v11118_v36  ;;  %v7477_v12 = vcombine.low %v11113_v41, %v11118_v36  ;;  %v3080_v62 = vld [vmem:[%s12641_s3 + $0x318] sm:$0xff]  ;;  %v3151_v43 = vld [vmem:[%s12641_s3 + $0x550] sm:$0xff] }
 0x265   : > { %6080 = vmatprep.mubr.bf16.mxu0 %v7462_v44  ;;  %2953 = vst.msk [vmem:[%s10748_s19 + $0x220] sm:$0xff] %vm2886_vm0, %v2846_v59  ;;  %v2849_v17 = vadd.f32 %v8106_v39, %v10652_v55  ;;  %5951 = vmatprep.mubr.bf16.mxu1 %v7524_v56  ;;  %v11124_v55 = vld [vmem:[%s12641_s3 + $0x410] sm:$0xff]  ;;  %v3088_v44 = vld [vmem:[%s12641_s3 + $0x358] sm:$0xff]  ;;  %v7572_v36 = vcombine.high %v3143_v29, %v3151_v43 }
 0x266   : > { %8700 = vmatpush3.bf16.msra.mxu0 %v9602_v11  ;;  %v7540_v26 = vcombine.high %v11124_v55, %v11129_v5  ;;  %v7539_v54 = vcombine.low %v11124_v55, %v11129_v5  ;;  %v7510_v59 = vcombine.high %v3080_v62, %v3088_v44 }
 0x267   : > { %v2322_v4 = vpop.f32.mrb[32].mxu0  ;;  %8701 = vmatprep.subr.bf16.mxu0 %v9605_v61  ;;  %2956 = vst.msk [vmem:[%s10748_s19 + $0x238] sm:$0xff] %vm2886_vm0, %v2849_v17  ;;  %v8107_v10 = vpop.f32.mrb[176].mxu1 }
 0x268   : > { %2933 = vst [vmem:[%s10748_s19 + $0x180] sm:$0xff] %v2322_v4  ;;  %v2324_v42 = vpop.f32.mrb[33].mxu0  ;;  %v8108_v50 = vpop.f32.mrb[177].mxu1 }
 0x269   : > { %2934 = vst [vmem:[%s10748_s19 + $0x188] sm:$0xff] %v2324_v42  ;;  %v2326_v48 = vpop.f32.mrb[34].mxu0  ;;  %v8109_v13 = vadd.f32 %v8108_v50, %v8107_v10  ;;  %v8110_v28 = vpop.f32.mrb[178].mxu1  ;;  %v3104_v10 = vld [vmem:[%s12641_s3 + $0x3d8] sm:$0xff]  ;;  %v3159_v42 = vld [vmem:[%s12641_s3 + $0x590] sm:$0xff] }
 0x26a   : > { %2936 = vst [vmem:[%s10748_s19 + $0x198] sm:$0xff] %v2326_v48  ;;  %v2328_v8 = vpop.f32.mrb[35].mxu0  ;;  %8702 = vmatpush3.bf16.msra.mxu0 %v9606_v37  ;;  %v8111_v35 = vpop.f32.mrb[179].mxu1  ;;  %v7509_v48 = vcombine.low %v3080_v62, %v3088_v44 }
 0x26b   : > { %2937 = vst [vmem:[%s10748_s19 + $0x1a0] sm:$0xff] %v2328_v8  ;;  %8703 = vmatprep.subr.bf16.mxu0 %v9609_v34  ;;  %v2854_v63 = vadd.f32 %v8109_v13, %v10671_v46  ;;  %v8112_v33 = vadd.f32 %v8111_v35, %v8110_v28  ;;  %v3072_v46 = vld [vmem:[%s12641_s3 + $0x2d8] sm:$0xff]  ;;  %v7571_v13 = vcombine.low %v3143_v29, %v3151_v43 }
 0x26c   : > { %6081 = vmatmul.mubr.bf16.gmra.mrb[140].mxu0 %v7461_v51  ;;  %5952 = vmatmul.mubr.bf16.gmra.mrb[28].mxu1 %v7523_v19  ;;  %v7494_v23 = vcombine.high %v3064_v14, %v3072_v46  ;;  %v7493_v56 = vcombine.low %v3064_v14, %v3072_v46  ;;  %v3096_v34 = vld [vmem:[%s12641_s3 + $0x398] sm:$0xff]  ;;  %v3167_v51 = vld [vmem:[%s12641_s3 + $0x5d0] sm:$0xff] }
 0x26d   : > { %6088 = vmatprep.mubr.bf16.mxu0 %v7478_v32  ;;  %2959 = vst.msk [vmem:[%s10748_s19 + $0x250] sm:$0xff] %vm2886_vm0, %v2854_v63  ;;  %v2857_v2 = vadd.f32 %v8112_v33, %v10674_v7  ;;  %5959 = vmatprep.mubr.bf16.mxu1 %v7540_v26  ;;  %v3135_v7 = vld [vmem:[%s12641_s3 + $0x4d0] sm:$0xff]  ;;  %v7526_v28 = vcombine.high %v3096_v34, %v3104_v10  ;;  %v3112_v14 = vld [vmem:[%s12641_s3 + $0x418] sm:$0xff] }
 0x26e   : > { %8704 = vmatpush3.bf16.msra.mxu0 %v9610_v52  ;;  %v7556_v16 = vcombine.high %v3127_v22, %v3135_v7  ;;  %v7555_v61 = vcombine.low %v3127_v22, %v3135_v7  ;;  %v7588_v35 = vcombine.high %v3159_v42, %v3167_v51  ;;  %v3120_v46 = vld [vmem:[%s12641_s3 + $0x458] sm:$0xff]  ;;  %v7525_v7 = vcombine.low %v3096_v34, %v3104_v10 }
 0x26f   : > { %v2332_v31 = vpop.f32.mrb[36].mxu0  ;;  %8705 = vmatprep.subr.bf16.mxu0 %v9613_v3  ;;  %2962 = vst.msk [vmem:[%s10748_s19 + $0x268] sm:$0xff] %vm2886_vm0, %v2857_v2  ;;  %v8113_v47 = vpop.f32.mrb[180].mxu1 }
 0x270   : > { %2939 = vst [vmem:[%s10748_s19 + $0x1b0] sm:$0xff] %v2332_v31  ;;  %v2334_v25 = vpop.f32.mrb[37].mxu0  ;;  %v8114_v57 = vpop.f32.mrb[181].mxu1  ;;  %v3183_v31 = vld [vmem:[%s12641_s3 + $0x650] sm:$0xff] }
 0x271   : > { %2940 = vst [vmem:[%s10748_s19 + $0x1b8] sm:$0xff] %v2334_v25  ;;  %v2336_v30 = vpop.f32.mrb[38].mxu0  ;;  %v8115_v0 = vadd.f32 %v8114_v57, %v8113_v47  ;;  %v8116_v53 = vpop.f32.mrb[182].mxu1  ;;  %v7542_v57 = vcombine.high %v3112_v14, %v3120_v46 }
 0x272   : > { %2942 = vst [vmem:[%s10748_s19 + $0x1c8] sm:$0xff] %v2336_v30  ;;  %v2338_v60 = vpop.f32.mrb[39].mxu0  ;;  %8706 = vmatpush3.bf16.msra.mxu0 %v9614_v15  ;;  %v8117_v9 = vpop.f32.mrb[183].mxu1  ;;  %v3175_v15 = vld [vmem:[%s12641_s3 + $0x610] sm:$0xff] }
 0x273   : > { %2943 = vst [vmem:[%s10748_s19 + $0x1d0] sm:$0xff] %v2338_v60  ;;  %8915 = vmatprep.subr.bf16.mxu0 %v11166_v18  ;;  %v2862_v49 = vadd.f32 %v8115_v0, %v10691_v45  ;;  %v8118_v1 = vadd.f32 %v8117_v9, %v8116_v53  ;;  %v7604_v0 = vcombine.high %v3175_v15, %v3183_v31  ;;  %v3136_v9 = vld [vmem:[%s12641_s3 + $0x4d8] sm:$0xff] }
 0x274   : > { %6089 = vmatmul.mubr.bf16.gmra.mrb[144].mxu0 %v7477_v12  ;;  %5960 = vmatmul.mubr.bf16.gmra.mrb[32].mxu1 %v7539_v54  ;;  %v7587_v12 = vcombine.low %v3159_v42, %v3167_v51 }
 0x275   : > { %6096 = vmatprep.mubr.bf16.mxu0 %v7494_v23  ;;  %2965 = vst.msk [vmem:[%s10748_s19 + $0x280] sm:$0xff] %vm2886_vm0, %v2862_v49  ;;  %v2865_v27 = vadd.f32 %v8118_v1, %v10694_v40  ;;  %5967 = vmatprep.mubr.bf16.mxu1 %v7556_v16  ;;  %v3128_v16 = vld [vmem:[%s12641_s3 + $0x498] sm:$0xff]  ;;  %v3191_v1 = vld [vmem:[%s12641_s3 + $0x690] sm:$0xff] }
 0x276   : > { %v7557_v34 = vcombine.low %v3128_v16, %v3136_v9 }
 0x277   : > { %v2342_v45 = vpop.f32.mrb[40].mxu0  ;;  %2968 = vst.msk [vmem:[%s10748_s19 + $0x298] sm:$0xff] %vm2886_vm0, %v2865_v27  ;;  %v8119_v40 = vpop.f32.mrb[184].mxu1  ;;  %v3199_v27 = vld [vmem:[%s12641_s3 + $0x6d0] sm:$0xff] }
 0x278   : > { %2945 = vst [vmem:[%s10748_s19 + $0x1e0] sm:$0xff] %v2342_v45  ;;  %v2344_v24 = vpop.f32.mrb[41].mxu0  ;;  %v8120_v11 = vpop.f32.mrb[185].mxu1  ;;  %v7541_v45 = vcombine.low %v3112_v14, %v3120_v46  ;;  %v7619_v42 = vcombine.low %v3191_v1, %v3199_v27 }
 0x279   : > { %2946 = vst [vmem:[%s10748_s19 + $0x1e8] sm:$0xff] %v2344_v24  ;;  %v2346_v20 = vpop.f32.mrb[42].mxu0  ;;  %v8121_v39 = vadd.f32 %v8120_v11, %v8119_v40  ;;  %v8122_v17 = vpop.f32.mrb[186].mxu1  ;;  %v7603_v40 = vcombine.low %v3175_v15, %v3183_v31  ;;  %v7558_v24 = vcombine.high %v3128_v16, %v3136_v9 }
 0x27a   : > { %2948 = vst [vmem:[%s10748_s19 + $0x1f8] sm:$0xff] %v2346_v20  ;;  %v2348_v41 = vpop.f32.mrb[43].mxu0  ;;  %v8123_v37 = vpop.f32.mrb[187].mxu1 }
 0x27b   : > { %2949 = vst [vmem:[%s10748_s19 + $0x200] sm:$0xff] %v2348_v41  ;;  %v2870_v4 = vadd.f32 %v8121_v39, %v10709_v6  ;;  %v8124_v55 = vadd.f32 %v8123_v37, %v8122_v17  ;;  %v3144_v17 = vld [vmem:[%s12641_s3 + $0x518] sm:$0xff]  ;;  %v3207_v37 = vld [vmem:[%s12641_s3 + $0x710] sm:$0xff] }
 0x27c   : > { %6097 = vmatmul.mubr.bf16.gmra.mrb[148].mxu0 %v7493_v56  ;;  %5968 = vmatmul.mubr.bf16.gmra.mrb[36].mxu1 %v7555_v61  ;;  %v7620_v61 = vcombine.high %v3191_v1, %v3199_v27  ;;  %v3152_v41 = vld [vmem:[%s12641_s3 + $0x558] sm:$0xff] }
 0x27d   : > { %6104 = vmatprep.mubr.bf16.mxu0 %v7510_v59  ;;  %2971 = vst.msk [vmem:[%s10748_s19 + $0x2b0] sm:$0xff] %vm2886_vm0, %v2870_v4  ;;  %v2873_v5 = vadd.f32 %v8124_v55, %v10712_v38  ;;  %5975 = vmatprep.mubr.bf16.mxu1 %v7572_v36  ;;  %v3215_v4 = vld [vmem:[%s12641_s3 + $0x750] sm:$0xff]  ;;  %v7574_v51 = vcombine.high %v3144_v17, %v3152_v41 }
 0x27e   : > { %v7635_v46 = vcombine.low %v3207_v37, %v3215_v4 }
 0x27f   : > { %v2352_v6 = vpop.f32.mrb[44].mxu0  ;;  %2974 = vst.msk [vmem:[%s10748_s19 + $0x2c8] sm:$0xff] %vm2886_vm0, %v2873_v5  ;;  %v8125_v38 = vpop.f32.mrb[188].mxu1 }
 0x280   : > { %2951 = vst [vmem:[%s10748_s19 + $0x210] sm:$0xff] %v2352_v6  ;;  %v2354_v50 = vpop.f32.mrb[45].mxu0  ;;  %v8126_v19 = vpop.f32.mrb[189].mxu1 }
 0x281   : > { %2952 = vst [vmem:[%s10748_s19 + $0x218] sm:$0xff] %v2354_v50  ;;  %v2356_v32 = vpop.f32.mrb[46].mxu0  ;;  %v8127_v8 = vadd.f32 %v8126_v19, %v8125_v38  ;;  %v8128_v26 = vpop.f32.mrb[190].mxu1  ;;  %v7636_v19 = vcombine.high %v3207_v37, %v3215_v4 }
 0x282   : > { %2954 = vst [vmem:[%s10748_s19 + $0x228] sm:$0xff] %v2356_v32  ;;  %v2358_v52 = vpop.f32.mrb[47].mxu0  ;;  %v8129_v3 = vpop.f32.mrb[191].mxu1 }
 0x283   : > { %2955 = vst [vmem:[%s10748_s19 + $0x230] sm:$0xff] %v2358_v52  ;;  %v2878_v63 = vadd.f32 %v8127_v8, %v10727_v21  ;;  %v8130_v33 = vadd.f32 %v8129_v3, %v8128_v26  ;;  %v3168_v8 = vld [vmem:[%s12641_s3 + $0x5d8] sm:$0xff]  ;;  %v3223_v52 = vld [vmem:[%s12641_s3 + $0x790] sm:$0xff] }
 0x284   : > { %6105 = vmatmul.mubr.bf16.gmra.mrb[152].mxu0 %v7509_v48  ;;  %5976 = vmatmul.mubr.bf16.gmra.mrb[40].mxu1 %v7571_v13 }
 0x285   : > { %6112 = vmatprep.mubr.bf16.mxu0 %v7526_v28  ;;  %2977 = vst.msk [vmem:[%s10748_s19 + $0x2e0] sm:$0xff] %vm2886_vm0, %v2878_v63  ;;  %v2881_v2 = vadd.f32 %v8130_v33, %v10730_v58  ;;  %5983 = vmatprep.mubr.bf16.mxu1 %v7588_v35  ;;  %v3160_v28 = vld [vmem:[%s12641_s3 + $0x598] sm:$0xff]  ;;  %v3231_v35 = vld [vmem:[%s12641_s3 + $0x7d0] sm:$0xff]  ;;  %v7573_v33 = vcombine.low %v3144_v17, %v3152_v41  ;;  %v3001_v41 = vld [vmem:[%s12641_s3 + $0xa0] sm:$0xff] }
 0x286   : > { %v7589_v16 = vcombine.low %v3160_v28, %v3168_v8  ;;  %v7651_v27 = vcombine.low %v3223_v52, %v3231_v35 }
 0x287   : > { %v2362_v21 = vpop.f32.mrb[48].mxu0  ;;  %2980 = vst.msk [vmem:[%s10748_s19 + $0x2f8] sm:$0xff] %vm2886_vm0, %v2881_v2  ;;  %v8147_v22 = vpop.f32.mrb[192].mxu1 }
 0x288   : > { %2957 = vst [vmem:[%s10748_s19 + $0x240] sm:$0xff] %v2362_v21  ;;  %v2364_v58 = vpop.f32.mrb[49].mxu0  ;;  %v8148_v25 = vpop.f32.mrb[193].mxu1  ;;  %v7590_v21 = vcombine.high %v3160_v28, %v3168_v8 }
 0x289   : > { %2958 = vst [vmem:[%s10748_s19 + $0x248] sm:$0xff] %v2364_v58  ;;  %v2366_v47 = vpop.f32.mrb[50].mxu0  ;;  %v11244_v54 = vadd.f32 %v8148_v25, %v8147_v22  ;;  %v8150_v23 = vpop.f32.mrb[194].mxu1  ;;  %v7652_v22 = vcombine.high %v3223_v52, %v3231_v35  ;;  %v3176_v25 = vld [vmem:[%s12641_s3 + $0x618] sm:$0xff] }
 0x28a   : > { %2960 = vst [vmem:[%s10748_s19 + $0x258] sm:$0xff] %v2366_v47  ;;  %v2368_v30 = vpop.f32.mrb[51].mxu0  ;;  %v8151_v53 = vpop.f32.mrb[195].mxu1 }
 0x28b   : > { %2961 = vst [vmem:[%s10748_s19 + $0x260] sm:$0xff] %v2368_v30  ;;  %v11247_v60 = vadd.f32 %v8151_v53, %v8150_v23  ;;  %v2985_v30 = vld [vmem:[%s12641_s3 + $0x20] sm:$0xff] }
 0x28c   : > { %6113 = vmatmul.mubr.bf16.gmra.mrb[156].mxu0 %v7525_v7  ;;  %5984 = vmatmul.mubr.bf16.gmra.mrb[44].mxu1 %v7587_v12  ;;  %v3184_v12 = vld [vmem:[%s12641_s3 + $0x658] sm:$0xff]  ;;  %v2993_v23 = vld [vmem:[%s12641_s3 + $0x60] sm:$0xff] }
 0x28d   : > { %6120 = vmatprep.mubr.bf16.mxu0 %v7542_v57  ;;  %5991 = vmatprep.mubr.bf16.mxu1 %v7604_v0  ;;  %v7605_v4 = vcombine.low %v3176_v25, %v3184_v12 }
 0x28f   : > { %v2372_v49 = vpop.f32.mrb[52].mxu0  ;;  %v8153_v44 = vpop.f32.mrb[196].mxu1 }
 0x290   : > { %2963 = vst [vmem:[%s10748_s19 + $0x270] sm:$0xff] %v2372_v49  ;;  %v2374_v62 = vpop.f32.mrb[53].mxu0  ;;  %v8154_v43 = vpop.f32.mrb[197].mxu1 }
 0x291   : > { %2964 = vst [vmem:[%s10748_s19 + $0x278] sm:$0xff] %v2374_v62  ;;  %v2376_v29 = vpop.f32.mrb[54].mxu0  ;;  %v11264_v11 = vadd.f32 %v8154_v43, %v8153_v44  ;;  %v8156_v20 = vpop.f32.mrb[198].mxu1  ;;  %v7606_v62 = vcombine.high %v3176_v25, %v3184_v12  ;;  %v7416_v43 = vcombine.high %v2985_v30, %v2993_v23 }
 0x292   : > { %2966 = vst [vmem:[%s10748_s19 + $0x288] sm:$0xff] %v2376_v29  ;;  %v2378_v56 = vpop.f32.mrb[55].mxu0  ;;  %v8157_v59 = vpop.f32.mrb[199].mxu1 }
 0x293   : > { %2967 = vst [vmem:[%s10748_s19 + $0x290] sm:$0xff] %v2378_v56  ;;  %v11267_v39 = vadd.f32 %v8157_v59, %v8156_v20  ;;  %v3192_v59 = vld [vmem:[%s12641_s3 + $0x698] sm:$0xff] }
 0x294   : > { %6121 = vmatmul.mubr.bf16.gmra.mrb[160].mxu0 %v7541_v45  ;;  %5992 = vmatmul.mubr.bf16.gmra.mrb[48].mxu1 %v7603_v40 }
 0x295   : > { %6128 = vmatprep.mubr.bf16.mxu0 %v7558_v24  ;;  %5999 = vmatprep.mubr.bf16.mxu1 %v7620_v61 }
 0x297   : > { %v2382_v36 = vpop.f32.mrb[56].mxu0  ;;  %v8159_v5 = vpop.f32.mrb[200].mxu1 }
 0x298   : > { %2969 = vst [vmem:[%s10748_s19 + $0x2a0] sm:$0xff] %v2382_v36  ;;  %v2384_v55 = vpop.f32.mrb[57].mxu0  ;;  %v8160_v6 = vpop.f32.mrb[201].mxu1 }
 0x299   : > { %2970 = vst [vmem:[%s10748_s19 + $0x2a8] sm:$0xff] %v2384_v55  ;;  %v2386_v10 = vpop.f32.mrb[58].mxu0  ;;  %v11284_v50 = vadd.f32 %v8160_v6, %v8159_v5  ;;  %v8162_v48 = vpop.f32.mrb[202].mxu1 }
 0x29a   : > { %2972 = vst [vmem:[%s10748_s19 + $0x2b8] sm:$0xff] %v2386_v10  ;;  %v2388_v38 = vpop.f32.mrb[59].mxu0  ;;  %v8163_v32 = vpop.f32.mrb[203].mxu1  ;;  %v7415_v10 = vcombine.low %v2985_v30, %v2993_v23 }
 0x29b   : > { %2973 = vst [vmem:[%s10748_s19 + $0x2c0] sm:$0xff] %v2388_v38  ;;  %v11287_v13 = vadd.f32 %v8163_v32, %v8162_v48  ;;  %v9612_v48 = vld [vmem:[%s9981_s13 + $0x300] sm:$0xff]  }
 0x29c   : > { %6129 = vmatmul.mubr.bf16.gmra.mrb[164].mxu0 %v7557_v34  ;;  %6000 = vmatmul.mubr.bf16.gmra.mrb[52].mxu1 %v7619_v42 }
 0x29d   : > { %6136 = vmatprep.mubr.bf16.mxu0 %v7574_v51  ;;  %6007 = vmatprep.mubr.bf16.mxu1 %v7636_v19 }
 0x29f   : > { %v2392_v26 = vpop.f32.mrb[60].mxu0  ;;  %v8165_v63 = vpop.f32.mrb[204].mxu1 }
 0x2a0   : > { %2975 = vst [vmem:[%s10748_s19 + $0x2d0] sm:$0xff] %v2392_v26  ;;  %v2394_v3 = vpop.f32.mrb[61].mxu0  ;;  %v8166_v14 = vpop.f32.mrb[205].mxu1  ;;  %v9615_v26 = vld [vmem:[%s9981_s13 + $0x348] sm:$0xff]  }
 0x2a1   : > { %2976 = vst [vmem:[%s10748_s19 + $0x2d8] sm:$0xff] %v2394_v3  ;;  %v2396_v2 = vpop.f32.mrb[62].mxu0  ;;  %v11304_v31 = vadd.f32 %v8166_v14, %v8165_v63  ;;  %v8168_v58 = vpop.f32.mrb[206].mxu1  ;;  %v3208_v3 = vld [vmem:[%s12641_s3 + $0x718] sm:$0xff]  ;;  %v9616_v63 = vld [vmem:[%s9981_s13 + $0x308] sm:$0xff]   ;;  %v9619_v14 = vld [vmem:[%s9981_s13 + $0x350] sm:$0xff]  }
 0x2a2   : > { %2978 = vst [vmem:[%s10748_s19 + $0x2e8] sm:$0xff] %v2396_v2  ;;  %v2398_v15 = vpop.f32.mrb[63].mxu0  ;;  %v8169_v7 = vpop.f32.mrb[207].mxu1  ;;  %v3017_v2 = vld [vmem:[%s12641_s3 + $0x120] sm:$0xff] }
 0x2a3   : > { %2979 = vst [vmem:[%s10748_s19 + $0x2f0] sm:$0xff] %v2398_v15  ;;  %v11307_v47 = vadd.f32 %v8169_v7, %v8168_v58 }
 0x2a4   : > { %6137 = vmatmul.mubr.bf16.gmra.mrb[168].mxu0 %v7573_v33  ;;  %6008 = vmatmul.mubr.bf16.gmra.mrb[56].mxu1 %v7635_v46 }
 0x2a5   : > { %6144 = vmatprep.mubr.bf16.mxu0 %v7590_v21  ;;  %6015 = vmatprep.mubr.bf16.mxu1 %v7652_v22 }
 0x2a7   : > { %v8259_v57 = vpop.f32.mrb[64].mxu0  ;;  %v8171_v53 = vpop.f32.mrb[208].mxu1 }
 0x2a8   : > { %v8260_v0 = vpop.f32.mrb[65].mxu0  ;;  %v8172_v1 = vpop.f32.mrb[209].mxu1 }
 0x2a9   : > { %v8261_v9 = vadd.f32 %v8260_v0, %v8259_v57  ;;  %v8262_v49 = vpop.f32.mrb[66].mxu0  ;;  %v11321_v44 = vadd.f32 %v8172_v1, %v8171_v53  ;;  %v8174_v29 = vpop.f32.mrb[210].mxu1  ;;  %v9620_v53 = vld [vmem:[%s9981_s13 + $0x310] sm:$0xff]   ;;  %v9623_v1 = vld [vmem:[%s9981_s13 + $0x358] sm:$0xff]  }
 0x2aa   : > { %v8263_v45 = vpop.f32.mrb[67].mxu0  ;;  %v8175_v56 = vpop.f32.mrb[211].mxu1 }
 0x2ab   : > { %v11324_v40 = vadd.f32 %v8261_v9, %v11244_v54  ;;  %v8264_v24 = vadd.f32 %v8263_v45, %v8262_v49  ;;  %v11326_v20 = vadd.f32 %v8175_v56, %v8174_v29  ;;  %v3200_v54 = vld [vmem:[%s12641_s3 + $0x6d8] sm:$0xff]  ;;  %v9627_v56 = vld [vmem:[%s9981_s13 + $0x360] sm:$0xff]  }
 0x2ac   : > { %6145 = vmatmul.mubr.bf16.gmra.mrb[172].mxu0 %v7589_v16  ;;  %6016 = vmatmul.mubr.bf16.gmra.mrb[60].mxu1 %v7651_v27  ;;  %v7622_v6 = vcombine.high %v3192_v59, %v3200_v54  ;;  %v7621_v15 = vcombine.low %v3192_v59, %v3200_v54  ;;  %v11384_v45 = vld [vmem:[%s12641_s3 + $0x798] sm:$0xff] }
 0x2ad   : > { %v11329_v61 = vadd.f32 %v8264_v24, %v11247_v60  ;;  %6152 = vmatprep.mubr.bf16.mxu0 %v7606_v62  ;;  %6217 = vmatprep.mubr.bf16.mxu1 %v7416_v43  ;;  %v3009_v60 = vld [vmem:[%s12641_s3 + $0xe0] sm:$0xff]  ;;  %v9624_v29 = vld [vmem:[%s9981_s13 + $0x318] sm:$0xff]  }
 0x2ae   : > { %v7432_v19 = vcombine.high %v3001_v41, %v3009_v60  ;;  %v7431_v25 = vcombine.low %v3001_v41, %v3009_v60  ;;  %v3041_v24 = vld [vmem:[%s12641_s3 + $0x1e0] sm:$0xff] }
 0x2af   : > { %v8265_v17 = vpop.f32.mrb[68].mxu0  ;;  %v8177_v37 = vpop.f32.mrb[212].mxu1 }
 0x2b0   : > { %v8266_v36 = vpop.f32.mrb[69].mxu0  ;;  %v8178_v34 = vpop.f32.mrb[213].mxu1 }
 0x2b1   : > { %v8267_v55 = vadd.f32 %v8266_v36, %v8265_v17  ;;  %v8268_v5 = vpop.f32.mrb[70].mxu0  ;;  %v11343_v42 = vadd.f32 %v8178_v34, %v8177_v37  ;;  %v8180_v38 = vpop.f32.mrb[214].mxu1 }
 0x2b2   : > { %v8269_v51 = vpop.f32.mrb[71].mxu0  ;;  %v8181_v8 = vpop.f32.mrb[215].mxu1 }
 0x2b3   : > { %v11347_v32 = vadd.f32 %v8267_v55, %v11264_v11  ;;  %v8270_v28 = vadd.f32 %v8269_v51, %v8268_v5  ;;  %v11350_v52 = vadd.f32 %v8181_v8, %v8180_v38  ;;  %v3216_v11 = vld [vmem:[%s12641_s3 + $0x758] sm:$0xff] }
 0x2b4   : > { %6153 = vmatmul.mubr.bf16.gmra.mrb[176].mxu0 %v7605_v4  ;;  %6218 = vmatmul.mubr.bf16.vlgmr.msra.gmra.mrb[64].mxu1 %v7415_v10  ;;  %v7638_v12 = vcombine.high %v3208_v3, %v3216_v11  ;;  %v7637_v17 = vcombine.low %v3208_v3, %v3216_v11  ;;  %v9632_v3 = vld [vmem:[%s9981_s13 + $0x328] sm:$0xff]  }
 0x2b5   : > { %v11353_v35 = vadd.f32 %v8270_v28, %v11267_v39  ;;  %6160 = vmatprep.mubr.bf16.mxu0 %v7622_v6  ;;  %8804 = vmatpush3.bf16.msra.mxu1 %v9612_v48  ;;  %v3025_v39 = vld [vmem:[%s12641_s3 + $0x160] sm:$0xff] }
 0x2b6   : > { %6225 = vmatprep.mubr.bf16.mxu1 %v7432_v19  ;;  %8805 = vmatprep.subr.bf16.mxu1 %v9615_v26  ;;  %v7448_v0 = vcombine.high %v3017_v2, %v3025_v39  ;;  %v7447_v37 = vcombine.low %v3017_v2, %v3025_v39  ;;  %v9628_v6 = vld [vmem:[%s9981_s13 + $0x320] sm:$0xff]   ;;  %v9631_v19 = vld [vmem:[%s9981_s13 + $0x368] sm:$0xff]  }
 0x2b7   : > { %v8271_v33 = vpop.f32.mrb[72].mxu0  ;;  %v8183_v21 = vpop.f32.mrb[216].mxu1  ;;  %v2986_v26 = vld [vmem:[%s12641_s3 + $0x28] sm:$0xff] }
 0x2b8   : > { %v8272_v46 = vpop.f32.mrb[73].mxu0  ;;  %v8184_v7 = vpop.f32.mrb[217].mxu1 }
 0x2b9   : > { %v8273_v58 = vadd.f32 %v8272_v46, %v8271_v33  ;;  %v8274_v22 = vpop.f32.mrb[74].mxu0  ;;  %v11369_v57 = vadd.f32 %v8184_v7, %v8183_v21  ;;  %v8186_v23 = vpop.f32.mrb[218].mxu1  ;;  %8806 = vmatpush3.bf16.msra.mxu1 %v9616_v63  ;;  %v3049_v63 = vld [vmem:[%s12641_s3 + $0x220] sm:$0xff]  ;;  %v9635_v33 = vld [vmem:[%s9981_s13 + $0x370] sm:$0xff]  }
 0x2ba   : > { %v8275_v30 = vpop.f32.mrb[75].mxu0  ;;  %v8187_v49 = vpop.f32.mrb[219].mxu1  ;;  %8807 = vmatprep.subr.bf16.mxu1 %v9619_v14 }
 0x2bb   : > { %v11373_v16 = vadd.f32 %v8273_v58, %v11284_v50  ;;  %v8276_v9 = vadd.f32 %v8275_v30, %v8274_v22  ;;  %v11376_v27 = vadd.f32 %v8187_v49, %v8186_v23  ;;  %v3232_v50 = vld [vmem:[%s12641_s3 + $0x7d8] sm:$0xff]  ;;  %v9636_v23 = vld [vmem:[%s9981_s13 + $0x330] sm:$0xff]  }
 0x2bc   : > { %6161 = vmatmul.mubr.bf16.gmra.mrb[180].mxu0 %v7621_v15  ;;  %6226 = vmatmul.mubr.bf16.gmra.mrb[68].mxu1 %v7431_v25  ;;  %v7654_v4 = vcombine.high %v11384_v45, %v3232_v50  ;;  %v7653_v14 = vcombine.low %v11384_v45, %v3232_v50  ;;  %v9639_v49 = vld [vmem:[%s9981_s13 + $0x378] sm:$0xff]   ;;  %v11440_v50 = vld [vmem:[%s12641_s3 + $0x2a0] sm:$0xff] }
 0x2bd   : > { %v11379_v62 = vadd.f32 %v8276_v9, %v11287_v13  ;;  %6168 = vmatprep.mubr.bf16.mxu0 %v7638_v12  ;;  %6233 = vmatprep.mubr.bf16.mxu1 %v7448_v0  ;;  %v3033_v13 = vld [vmem:[%s12641_s3 + $0x1a0] sm:$0xff] }
 0x2be   : > { %8808 = vmatpush3.bf16.msra.mxu1 %v9620_v53  ;;  %v7464_v10 = vcombine.high %v3033_v13, %v3041_v24  ;;  %v7463_v58 = vcombine.low %v3033_v13, %v3041_v24  ;;  %v3010_v13 = vld [vmem:[%s12641_s3 + $0xe8] sm:$0xff] }
 0x2bf   : > { %v8277_v43 = vpop.f32.mrb[76].mxu0  ;;  %8809 = vmatprep.subr.bf16.mxu1 %v9623_v1  ;;  %v8189_v54 = vpop.f32.mrb[220].mxu1 }
 0x2c0   : > { %v8278_v59 = vpop.f32.mrb[77].mxu0  ;;  %v8190_v36 = vpop.f32.mrb[221].mxu1 }
 0x2c1   : > { %v8279_v41 = vadd.f32 %v8278_v59, %v8277_v43  ;;  %v8280_v60 = vpop.f32.mrb[78].mxu0  ;;  %v11398_v55 = vadd.f32 %v8190_v36, %v8189_v54  ;;  %v8192_v34 = vpop.f32.mrb[222].mxu1  ;;  %v3073_v43 = vld [vmem:[%s12641_s3 + $0x2e0] sm:$0xff] }
 0x2c2   : > { %v8281_v5 = vpop.f32.mrb[79].mxu0  ;;  %8810 = vmatpush3.bf16.msra.mxu1 %v9624_v29  ;;  %v8193_v48 = vpop.f32.mrb[223].mxu1  ;;  %v11453_v36 = vld [vmem:[%s9981_s13 + $0x380] sm:$0xff]  }
 0x2c3   : > { %v11402_v51 = vadd.f32 %v8279_v41, %v11304_v31  ;;  %v8282_v38 = vadd.f32 %v8281_v5, %v8280_v60  ;;  %8811 = vmatprep.subr.bf16.mxu1 %v9627_v56  ;;  %v11405_v28 = vadd.f32 %v8193_v48, %v8192_v34  ;;  %v2994_v31 = vld [vmem:[%s12641_s3 + $0x68] sm:$0xff]  ;;  %v7496_v34 = vcombine.high %v11440_v50, %v3073_v43 }
 0x2c4   : > { %6169 = vmatmul.mubr.bf16.gmra.mrb[184].mxu0 %v7637_v17  ;;  %6234 = vmatmul.mubr.bf16.gmra.mrb[72].mxu1 %v7447_v37  ;;  %v7418_v22 = vcombine.high %v2986_v26, %v2994_v31  ;;  %v7417_v59 = vcombine.low %v2986_v26, %v2994_v31 }
 0x2c5   : > { %v11408_v8 = vadd.f32 %v8282_v38, %v11307_v47  ;;  %6176 = vmatprep.mubr.bf16.mxu0 %v7654_v4  ;;  %6241 = vmatprep.mubr.bf16.mxu1 %v7464_v10  ;;  %v3057_v47 = vld [vmem:[%s12641_s3 + $0x260] sm:$0xff] }
 0x2c6   : > { %8812 = vmatpush3.bf16.msra.mxu1 %v9628_v6  ;;  %v7480_v30 = vcombine.high %v3049_v63, %v3057_v47  ;;  %v7479_v60 = vcombine.low %v3049_v63, %v3057_v47  ;;  %v3089_v47 = vld [vmem:[%s12641_s3 + $0x360] sm:$0xff] }
 0x2c7   : > { %v8283_v11 = vpop.f32.mrb[80].mxu0  ;;  %8813 = vmatprep.subr.bf16.mxu1 %v9631_v19  ;;  %v8195_v39 = vpop.f32.mrb[224].mxu1  ;;  %v11462_v19 = vld [vmem:[%s9981_s13 + $0x3c8] sm:$0xff]  }
 0x2c8   : > { %v8284_v2 = vpop.f32.mrb[81].mxu0  ;;  %v8196_v15 = vpop.f32.mrb[225].mxu1 }
 0x2c9   : > { %v8285_v46 = vadd.f32 %v8284_v2, %v8283_v11  ;;  %v8286_v21 = vpop.f32.mrb[82].mxu0  ;;  %v11425_v7 = vadd.f32 %v8196_v15, %v8195_v39  ;;  %v8198_v12 = vpop.f32.mrb[226].mxu1  ;;  %v11481_v11 = vld [vmem:[%s9981_s13 + $0x3d0] sm:$0xff]   ;;  %v7495_v15 = vcombine.low %v11440_v50, %v3073_v43  ;;  %v11502_v50 = vld [vmem:[%s9981_s13 + $0x3d8] sm:$0xff]   ;;  %v11512_v43 = vld [vmem:[%s12641_s3 + $0x1a8] sm:$0xff] }
 0x2ca   : > { %v8287_v25 = vpop.f32.mrb[83].mxu0  ;;  %8814 = vmatpush3.bf16.msra.mxu1 %v9632_v3  ;;  %v8199_v9 = vpop.f32.mrb[227].mxu1  ;;  %v11472_v3 = vld [vmem:[%s9981_s13 + $0x388] sm:$0xff]  }
 0x2cb   : > { %v11429_v0 = vadd.f32 %v8285_v46, %v11321_v44  ;;  %v8288_v53 = vadd.f32 %v8287_v25, %v8286_v21  ;;  %8815 = vmatprep.subr.bf16.mxu1 %v9635_v33  ;;  %v11432_v1 = vadd.f32 %v8199_v9, %v8198_v12  ;;  %v9640_v44 = vld [vmem:[%s9981_s13 + $0x338] sm:$0xff]  }
 0x2cc   : > { %6177 = vmatmul.mubr.bf16.gmra.mrb[188].mxu0 %v7653_v14  ;;  %6242 = vmatmul.mubr.bf16.gmra.mrb[76].mxu1 %v7463_v58 }
 0x2cd   : > { %v11435_v45 = vadd.f32 %v8288_v53, %v11326_v20  ;;  %6378 = vmatprep.mubr.bf16.mxu0 %v7418_v22  ;;  %6249 = vmatprep.mubr.bf16.mxu1 %v7480_v30  ;;  %v3002_v20 = vld [vmem:[%s12641_s3 + $0xa8] sm:$0xff] }
 0x2ce   : > { %8816 = vmatpush3.bf16.msra.mxu1 %v9636_v23  ;;  %v7434_v10 = vcombine.high %v3002_v20, %v3010_v13  ;;  %v7433_v39 = vcombine.low %v3002_v20, %v3010_v13  ;;  %v11496_v23 = vld [vmem:[%s9981_s13 + $0x390] sm:$0xff]   ;;  %v11519_v20 = vld [vmem:[%s9981_s13 + $0x398] sm:$0xff]  }
 0x2cf   : > { %v8289_v29 = vpop.f32.mrb[84].mxu0  ;;  %8817 = vmatprep.subr.bf16.mxu1 %v9639_v49  ;;  %v8201_v56 = vpop.f32.mrb[228].mxu1 }
 0x2d0   : > { %v8290_v24 = vpop.f32.mrb[85].mxu0  ;;  %v8202_v41 = vpop.f32.mrb[229].mxu1 }
 0x2d1   : > { %v8291_v54 = vadd.f32 %v8290_v24, %v8289_v29  ;;  %v8292_v17 = vpop.f32.mrb[86].mxu0  ;;  %v11455_v37 = vadd.f32 %v8202_v41, %v8201_v56  ;;  %v8204_v5 = vpop.f32.mrb[230].mxu1  ;;  %v3105_v24 = vld [vmem:[%s12641_s3 + $0x3e0] sm:$0xff] }
 0x2d2   : > { %v8293_v4 = vpop.f32.mrb[87].mxu0  ;;  %8818 = vmatpush3.bf16.msra.mxu1 %v9640_v44  ;;  %v8205_v48 = vpop.f32.mrb[231].mxu1  ;;  %v11529_v56 = vld [vmem:[%s9981_s13 + $0x3e0] sm:$0xff]  }
 0x2d3   : > { %v11459_v6 = vadd.f32 %v8291_v54, %v11343_v42  ;;  %v8294_v38 = vadd.f32 %v8293_v4, %v8292_v17  ;;  %9027 = vmatprep.subr.bf16.mxu1 %v11166_v18  ;;  %v11465_v26 = vadd.f32 %v8205_v48, %v8204_v5  ;;  %v3018_v42 = vld [vmem:[%s12641_s3 + $0x128] sm:$0xff] }
 0x2d4   : > { %6379 = vmatmul.mubr.bf16.vlgmr.msra.gmra.mrb[192].mxu0 %v7417_v59  ;;  %6250 = vmatmul.mubr.bf16.gmra.mrb[80].mxu1 %v7479_v60  ;;  %v3026_v18 = vld [vmem:[%s12641_s3 + $0x168] sm:$0xff] }
 0x2d5   : > { %v11468_v31 = vadd.f32 %v8294_v38, %v11350_v52  ;;  %8916 = vmatpush3.bf16.msra.mxu0 %v11453_v36  ;;  %6257 = vmatprep.mubr.bf16.mxu1 %v7496_v34  ;;  %v3081_v52 = vld [vmem:[%s12641_s3 + $0x320] sm:$0xff]  ;;  %v7450_v58 = vcombine.high %v3018_v42, %v3026_v18  ;;  %v7449_v17 = vcombine.low %v3018_v42, %v3026_v18 }
 0x2d6   : > { %6386 = vmatprep.mubr.bf16.mxu0 %v7434_v10  ;;  %8917 = vmatprep.subr.bf16.mxu0 %v11462_v19  ;;  %v7512_v30 = vcombine.high %v3081_v52, %v3089_v47  ;;  %v7511_v5 = vcombine.low %v3081_v52, %v3089_v47  ;;  %v11543_v52 = vld [vmem:[%s9981_s13 + $0x3e8] sm:$0xff]  }
 0x2d7   : > { %v8295_v63 = vpop.f32.mrb[88].mxu0  ;;  %v8207_v2 = vpop.f32.mrb[232].mxu1 }
 0x2d8   : > { %v8296_v33 = vpop.f32.mrb[89].mxu0  ;;  %v8208_v21 = vpop.f32.mrb[233].mxu1 }
 0x2d9   : > { %v8297_v14 = vadd.f32 %v8296_v33, %v8295_v63  ;;  %v8298_v46 = vpop.f32.mrb[90].mxu0  ;;  %8918 = vmatpush3.bf16.msra.mxu0 %v11472_v3  ;;  %v11492_v22 = vadd.f32 %v8208_v21, %v8207_v2  ;;  %v8210_v12 = vpop.f32.mrb[234].mxu1  ;;  %v11536_v33 = vld [vmem:[%s9981_s13 + $0x3a0] sm:$0xff]  }
 0x2da   : > { %v8299_v25 = vpop.f32.mrb[91].mxu0  ;;  %8919 = vmatprep.subr.bf16.mxu0 %v11481_v11  ;;  %v8211_v49 = vpop.f32.mrb[235].mxu1 }
 0x2db   : > { %v11499_v53 = vadd.f32 %v8297_v14, %v11369_v57  ;;  %v8300_v9 = vadd.f32 %v8299_v25, %v8298_v46  ;;  %v11504_v44 = vadd.f32 %v8211_v49, %v8210_v12  ;;  %v3042_v57 = vld [vmem:[%s12641_s3 + $0x1e8] sm:$0xff] }
 0x2dc   : > { %6387 = vmatmul.mubr.bf16.gmra.mrb[196].mxu0 %v7433_v39  ;;  %6258 = vmatmul.mubr.bf16.gmra.mrb[84].mxu1 %v7495_v15  ;;  %v7466_v34 = vcombine.high %v11512_v43, %v3042_v57  ;;  %v3058_v14 = vld [vmem:[%s12641_s3 + $0x268] sm:$0xff]  ;;  %v3121_v15 = vld [vmem:[%s12641_s3 + $0x460] sm:$0xff] }
 0x2dd   : > { %v11507_v29 = vadd.f32 %v8300_v9, %v11376_v27  ;;  %6394 = vmatprep.mubr.bf16.mxu0 %v7450_v58  ;;  %6265 = vmatprep.mubr.bf16.mxu1 %v7512_v30  ;;  %v3097_v27 = vld [vmem:[%s12641_s3 + $0x3a0] sm:$0xff]  ;;  %v11558_v46 = vld [vmem:[%s9981_s13 + $0x3a8] sm:$0xff]   ;;  %v11568_v58 = vld [vmem:[%s9981_s13 + $0x3f0] sm:$0xff]   ;;  %v7465_v30 = vcombine.low %v11512_v43, %v3042_v57 }
 0x2de   : > { %8920 = vmatpush3.bf16.msra.mxu0 %v11496_v23  ;;  %v7528_v63 = vcombine.high %v3097_v27, %v3105_v24 }
 0x2df   : > { %v8301_v13 = vpop.f32.mrb[92].mxu0  ;;  %8921 = vmatprep.subr.bf16.mxu0 %v11502_v50  ;;  %v8213_v54 = vpop.f32.mrb[236].mxu1 }
 0x2e0   : > { %v8302_v59 = vpop.f32.mrb[93].mxu0  ;;  %v8214_v4 = vpop.f32.mrb[237].mxu1 }
 0x2e1   : > { %v8303_v41 = vadd.f32 %v8302_v59, %v8301_v13  ;;  %v8304_v60 = vpop.f32.mrb[94].mxu0  ;;  %v11532_v10 = vadd.f32 %v8214_v4, %v8213_v54  ;;  %v8216_v48 = vpop.f32.mrb[238].mxu1  ;;  %v7527_v59 = vcombine.low %v3097_v27, %v3105_v24 }
 0x2e2   : > { %v8305_v38 = vpop.f32.mrb[95].mxu0  ;;  %8922 = vmatpush3.bf16.msra.mxu0 %v11519_v20  ;;  %v8217_v18 = vpop.f32.mrb[239].mxu1 }
 0x2e3   : > { %v11539_v2 = vadd.f32 %v8303_v41, %v11398_v55  ;;  %v8306_v42 = vadd.f32 %v8305_v38, %v8304_v60  ;;  %8923 = vmatprep.subr.bf16.mxu0 %v11529_v56  ;;  %v11545_v47 = vadd.f32 %v8217_v18, %v8216_v48  ;;  %v3050_v55 = vld [vmem:[%s12641_s3 + $0x228] sm:$0xff]  ;;  %v11582_v38 = vld [vmem:[%s9981_s13 + $0x3f8] sm:$0xff]   ;;  %v3137_v18 = vld [vmem:[%s12641_s3 + $0x4e0] sm:$0xff] }
 0x2e4   : > { %6395 = vmatmul.mubr.bf16.gmra.mrb[200].mxu0 %v7449_v17  ;;  %6266 = vmatmul.mubr.bf16.gmra.mrb[88].mxu1 %v7511_v5  ;;  %v7482_v54 = vcombine.high %v3050_v55, %v3058_v14  ;;  %v11575_v5 = vld [vmem:[%s9981_s13 + $0x3b0] sm:$0xff]   ;;  %12649 = vst [vmem:[#allocation3_spill] sm:$0xff] %v11582_v38  ;;  %v3074_v48 = vld [vmem:[%s12641_s3 + $0x2e8] sm:$0xff] }
 0x2e5   : > { %v11548_v39 = vadd.f32 %v8306_v42, %v11405_v28  ;;  %6402 = vmatprep.mubr.bf16.mxu0 %v7466_v34  ;;  %6273 = vmatprep.mubr.bf16.mxu1 %v7528_v63  ;;  %v3113_v28 = vld [vmem:[%s12641_s3 + $0x420] sm:$0xff]  ;;  %12648 = vst [vmem:[#allocation2_spill] sm:$0xff] %v11575_v5  ;;  %v11597_v63 = vld [vmem:[%s9981_s13 + $0x3b8] sm:$0xff]  }
 0x2e6   : > { %8924 = vmatpush3.bf16.msra.mxu0 %v11536_v33  ;;  %v7544_v4 = vcombine.high %v3113_v28, %v3121_v15  ;;  %12650 = vst [vmem:[#allocation4_spill] sm:$0xff] %v11597_v63 }
 0x2e7   : > { %v8307_v21 = vpop.f32.mrb[96].mxu0  ;;  %8925 = vmatprep.subr.bf16.mxu0 %v11543_v52  ;;  %v8219_v12 = vpop.f32.mrb[240].mxu1 }
 0x2e8   : > { %v8308_v25 = vpop.f32.mrb[97].mxu0  ;;  %v8220_v13 = vpop.f32.mrb[241].mxu1 }
 0x2e9   : > { %v8309_v9 = vadd.f32 %v8308_v25, %v8307_v21  ;;  %v8310_v49 = vpop.f32.mrb[98].mxu0  ;;  %v11571_v17 = vadd.f32 %v8220_v13, %v8219_v12  ;;  %v8222_v60 = vpop.f32.mrb[242].mxu1  ;;  %v7481_v12 = vcombine.low %v3050_v55, %v3058_v14  ;;  %v7543_v13 = vcombine.low %v3113_v28, %v3121_v15  ;;  %v3082_v14 = vld [vmem:[%s12641_s3 + $0x328] sm:$0xff]  ;;  %v3145_v15 = vld [vmem:[%s12641_s3 + $0x520] sm:$0xff] }
 0x2ea   : > { %v8311_v41 = vpop.f32.mrb[99].mxu0  ;;  %8926 = vmatpush3.bf16.msra.mxu0 %v11558_v46  ;;  %v8223_v57 = vpop.f32.mrb[243].mxu1 }
 0x2eb   : > { %v11578_v34 = vadd.f32 %v8309_v9, %v11425_v7  ;;  %v8312_v43 = vadd.f32 %v8311_v41, %v8310_v49  ;;  %8927 = vmatprep.subr.bf16.mxu0 %v11568_v58  ;;  %v11584_v27 = vadd.f32 %v8223_v57, %v8222_v60  ;;  %v3066_v7 = vld [vmem:[%s12641_s3 + $0x2a8] sm:$0xff] }
 0x2ec   : > { %6403 = vmatmul.mubr.bf16.gmra.mrb[204].mxu0 %v7465_v30  ;;  %6274 = vmatmul.mubr.bf16.gmra.mrb[92].mxu1 %v7527_v59  ;;  %v7498_v59 = vcombine.high %v3066_v7, %v3074_v48 }
 0x2ed   : > { %v11587_v24 = vadd.f32 %v8312_v43, %v11432_v1  ;;  %6410 = vmatprep.mubr.bf16.mxu0 %v7482_v54  ;;  %6281 = vmatprep.mubr.bf16.mxu1 %v7544_v4  ;;  %v3129_v1 = vld [vmem:[%s12641_s3 + $0x4a0] sm:$0xff] }
 0x2ee   : > { %8928 = vmatpush3.bf16.msra.mxu0 %v11575_v5  ;;  %v7560_v4 = vcombine.high %v3129_v1, %v3137_v18 }
 0x2ef   : > { %v8313_v42 = vpop.f32.mrb[100].mxu0  ;;  %8929 = vmatprep.subr.bf16.mxu0 %v11582_v38  ;;  %v8225_v25 = vpop.f32.mrb[244].mxu1 }
 0x2f0   : > { %v8314_v21 = vpop.f32.mrb[101].mxu0  ;;  %v8226_v49 = vpop.f32.mrb[245].mxu1 }
 0x2f1   : > { %v8315_v30 = vadd.f32 %v8314_v21, %v8313_v42  ;;  %v8316_v9 = vpop.f32.mrb[102].mxu0  ;;  %v11606_v54 = vadd.f32 %v8226_v49, %v8225_v25  ;;  %v8228_v60 = vpop.f32.mrb[246].mxu1  ;;  %v7497_v21 = vcombine.low %v3066_v7, %v3074_v48  ;;  %v3098_v48 = vld [vmem:[%s12641_s3 + $0x3a8] sm:$0xff] }
 0x2f2   : > { %v8317_v41 = vpop.f32.mrb[103].mxu0  ;;  %8930 = vmatpush3.bf16.msra.mxu0 %v11597_v63  ;;  %v8229_v38 = vpop.f32.mrb[247].mxu1 }
 0x2f3   : > { %v11610_v43 = vadd.f32 %v8315_v30, %v11455_v37  ;;  %v8318_v57 = vadd.f32 %v8317_v41, %v8316_v9  ;;  %v11612_v5 = vadd.f32 %v8229_v38, %v8228_v60  ;;  %v3090_v37 = vld [vmem:[%s12641_s3 + $0x368] sm:$0xff]  ;;  %v7559_v9 = vcombine.low %v3129_v1, %v3137_v18  ;;  %v3161_v18 = vld [vmem:[%s12641_s3 + $0x5a0] sm:$0xff] }
 0x2f4   : > { %6411 = vmatmul.mubr.bf16.gmra.mrb[208].mxu0 %v7481_v12  ;;  %6282 = vmatmul.mubr.bf16.gmra.mrb[96].mxu1 %v7543_v13  ;;  %v7514_v49 = vcombine.high %v3082_v14, %v3090_v37 }
 0x2f5   : > { %12651 = vst [vmem:[#allocation5_spill] sm:$0xff] %v11610_v43  ;;  %v11615_v55 = vadd.f32 %v8318_v57, %v11465_v26  ;;  %6418 = vmatprep.mubr.bf16.mxu0 %v7498_v59  ;;  %6289 = vmatprep.mubr.bf16.mxu1 %v7560_v4  ;;  %v3153_v26 = vld [vmem:[%s12641_s3 + $0x560] sm:$0xff] }
 0x2f6   : > { %v7576_v60 = vcombine.high %v3145_v15, %v3153_v26 }
 0x2f7   : > { %12652 = vst [vmem:[#allocation6_spill] sm:$0xff] %v11615_v55  ;;  %v8319_v28 = vpop.f32.mrb[104].mxu0  ;;  %v8231_v42 = vpop.f32.mrb[248].mxu1 }
 0x2f8   : > { %v8320_v38 = vpop.f32.mrb[105].mxu0  ;;  %v8232_v30 = vpop.f32.mrb[249].mxu1 }
 0x2f9   : > { %v8321_v25 = vadd.f32 %v8320_v38, %v8319_v28  ;;  %v8322_v12 = vpop.f32.mrb[106].mxu0  ;;  %v11629_v13 = vadd.f32 %v8232_v30, %v8231_v42  ;;  %v8234_v41 = vpop.f32.mrb[250].mxu1  ;;  %v7513_v38 = vcombine.low %v3082_v14, %v3090_v37  ;;  %v3114_v37 = vld [vmem:[%s12641_s3 + $0x428] sm:$0xff] }
 0x2fa   : > { %v8323_v59 = vpop.f32.mrb[107].mxu0  ;;  %v8235_v55 = vpop.f32.mrb[251].mxu1 }
 0x2fb   : > { %v11632_v4 = vadd.f32 %v8321_v25, %v11492_v22  ;;  %v8324_v57 = vadd.f32 %v8323_v59, %v8322_v12  ;;  %v11634_v43 = vadd.f32 %v8235_v55, %v8234_v41  ;;  %v3106_v22 = vld [vmem:[%s12641_s3 + $0x3e8] sm:$0xff]  ;;  %v7575_v12 = vcombine.low %v3145_v15, %v3153_v26  ;;  %v3177_v26 = vld [vmem:[%s12641_s3 + $0x620] sm:$0xff] }
 0x2fc   : > { %6419 = vmatmul.mubr.bf16.gmra.mrb[212].mxu0 %v7497_v21  ;;  %6290 = vmatmul.mubr.bf16.gmra.mrb[100].mxu1 %v7559_v9  ;;  %v7530_v30 = vcombine.high %v3098_v48, %v3106_v22 }
 0x2fd   : > { %12653 = vst [vmem:[#allocation7_spill] sm:$0xff] %v11632_v4  ;;  %v11637_v7 = vadd.f32 %v8324_v57, %v11504_v44  ;;  %6426 = vmatprep.mubr.bf16.mxu0 %v7514_v49  ;;  %6297 = vmatprep.mubr.bf16.mxu1 %v7576_v60  ;;  %v3169_v44 = vld [vmem:[%s12641_s3 + $0x5e0] sm:$0xff] }
 0x2fe   : > { %v7592_v41 = vcombine.high %v3161_v18, %v3169_v44 }
 0x2ff   : > { %12654 = vst [vmem:[#allocation8_spill] sm:$0xff] %v11637_v7  ;;  %v8325_v1 = vpop.f32.mrb[108].mxu0  ;;  %v8237_v28 = vpop.f32.mrb[252].mxu1 }
 0x300   : > { %v8326_v55 = vpop.f32.mrb[109].mxu0  ;;  %v8238_v25 = vpop.f32.mrb[253].mxu1 }
 0x301   : > { %v8327_v42 = vadd.f32 %v8326_v55, %v8325_v1  ;;  %v8328_v21 = vpop.f32.mrb[110].mxu0  ;;  %v11651_v9 = vadd.f32 %v8238_v25, %v8237_v28  ;;  %v8240_v59 = vpop.f32.mrb[254].mxu1  ;;  %v7529_v55 = vcombine.low %v3098_v48, %v3106_v22 }
 0x302   : > { %v8329_v49 = vpop.f32.mrb[111].mxu0  ;;  %v8241_v7 = vpop.f32.mrb[255].mxu1 }
 0x303   : > { %v11654_v60 = vadd.f32 %v8327_v42, %v11532_v10  ;;  %v8330_v57 = vadd.f32 %v8329_v49, %v8328_v21  ;;  %v11656_v4 = vadd.f32 %v8241_v7, %v8240_v59  ;;  %v3122_v10 = vld [vmem:[%s12641_s3 + $0x468] sm:$0xff]  ;;  %v7591_v21 = vcombine.low %v3161_v18, %v3169_v44  ;;  %v3201_v44 = vld [vmem:[%s12641_s3 + $0x6e0] sm:$0xff] }
 0x304   : > { %6427 = vmatmul.mubr.bf16.gmra.mrb[216].mxu0 %v7513_v38  ;;  %6298 = vmatmul.mubr.bf16.gmra.mrb[104].mxu1 %v7575_v12  ;;  %v7546_v25 = vcombine.high %v3114_v37, %v3122_v10 }
 0x305   : > { %12655 = vst [vmem:[#allocation9_spill] sm:$0xff] %v11654_v60  ;;  %v11659_v14 = vadd.f32 %v8330_v57, %v11545_v47  ;;  %6434 = vmatprep.mubr.bf16.mxu0 %v7530_v30  ;;  %6305 = vmatprep.mubr.bf16.mxu1 %v7592_v41  ;;  %v3185_v47 = vld [vmem:[%s12641_s3 + $0x660] sm:$0xff] }
 0x306   : > { %v7608_v59 = vcombine.high %v3177_v26, %v3185_v47 }
 0x307   : > { %12656 = vst [vmem:[#allocation10_spill] sm:$0xff] %v11659_v14  ;;  %v8331_v15 = vpop.f32.mrb[112].mxu0  ;;  %v8371_v7 = vpop.f32.mrb[0].mxu1 }
 0x308   : > { %v8332_v1 = vpop.f32.mrb[113].mxu0  ;;  %v8372_v38 = vpop.f32.mrb[1].mxu1 }
 0x309   : > { %v8333_v28 = vadd.f32 %v8332_v1, %v8331_v15  ;;  %v8334_v42 = vpop.f32.mrb[114].mxu0  ;;  %v8373_v12 = vadd.f32 %v8372_v38, %v8371_v7  ;;  %v8374_v30 = vpop.f32.mrb[2].mxu1 }
 0x30a   : > { %v8335_v49 = vpop.f32.mrb[115].mxu0  ;;  %v8375_v14 = vpop.f32.mrb[3].mxu1 }
 0x30b   : > { %v11674_v41 = vadd.f32 %v8333_v28, %v11571_v17  ;;  %v8336_v57 = vadd.f32 %v8335_v49, %v8334_v42  ;;  %v11677_v60 = vadd.f32 %v8373_v12, %v11324_v40  ;;  %v8376_v63 = vadd.f32 %v8375_v14, %v8374_v30  ;;  %v3130_v17 = vld [vmem:[%s12641_s3 + $0x4a8] sm:$0xff] }
 0x30c   : > { %6435 = vmatmul.mubr.bf16.gmra.mrb[220].mxu0 %v7529_v55  ;;  %6306 = vmatmul.mubr.bf16.gmra.mrb[108].mxu1 %v7591_v21  ;;  %v3138_v40 = vld [vmem:[%s12641_s3 + $0x4e8] sm:$0xff]  ;;  %v7545_v14 = vcombine.low %v3114_v37, %v3122_v10  ;;  %v7607_v55 = vcombine.low %v3177_v26, %v3185_v47  ;;  %v3217_v47 = vld [vmem:[%s12641_s3 + $0x760] sm:$0xff] }
 0x30d   : > { %v11680_v48 = vadd.f32 %v8336_v57, %v11584_v27  ;;  %6442 = vmatprep.mubr.bf16.mxu0 %v7546_v25  ;;  %v11683_v22 = vadd.f32 %v8376_v63, %v11329_v61  ;;  %6313 = vmatprep.mubr.bf16.mxu1 %v7608_v59  ;;  %v3193_v27 = vld [vmem:[%s12641_s3 + $0x6a0] sm:$0xff]  ;;  %v7562_v28 = vcombine.high %v3130_v17, %v3138_v40 }
 0x30e   : > { %v7624_v25 = vcombine.high %v3193_v27, %v3201_v44 }
 0x30f   : > { %v8337_v18 = vpop.f32.mrb[116].mxu0  ;;  %v8377_v61 = vpop.f32.mrb[4].mxu1 }
 0x310   : > { %v8338_v63 = vpop.f32.mrb[117].mxu0  ;;  %v8378_v7 = vpop.f32.mrb[5].mxu1 }
 0x311   : > { %v8339_v15 = vadd.f32 %v8338_v63, %v8337_v18  ;;  %v8340_v1 = vpop.f32.mrb[118].mxu0  ;;  %v8379_v38 = vadd.f32 %v8378_v7, %v8377_v61  ;;  %v8380_v42 = vpop.f32.mrb[6].mxu1  ;;  %v7561_v61 = vcombine.low %v3130_v17, %v3138_v40  ;;  %v7623_v7 = vcombine.low %v3193_v27, %v3201_v44  ;;  %v3233_v44 = vld [vmem:[%s12641_s3 + $0x7e0] sm:$0xff] }
 0x312   : > { %v8341_v21 = vpop.f32.mrb[119].mxu0  ;;  %v8381_v49 = vpop.f32.mrb[7].mxu1 }
 0x313   : > { %v11698_v12 = vadd.f32 %v8339_v15, %v11606_v54  ;;  %v8342_v30 = vadd.f32 %v8341_v21, %v8340_v1  ;;  %v11701_v59 = vadd.f32 %v8379_v38, %v11347_v32  ;;  %v8382_v57 = vadd.f32 %v8381_v49, %v8380_v42  ;;  %v3146_v54 = vld [vmem:[%s12641_s3 + $0x528] sm:$0xff] }
 0x314   : > { %6443 = vmatmul.mubr.bf16.gmra.mrb[224].mxu0 %v7545_v14  ;;  %6314 = vmatmul.mubr.bf16.gmra.mrb[112].mxu1 %v7607_v55  ;;  %v3154_v32 = vld [vmem:[%s12641_s3 + $0x568] sm:$0xff] }
 0x315   : > { %v11704_v37 = vadd.f32 %v8342_v30, %v11612_v5  ;;  %6450 = vmatprep.mubr.bf16.mxu0 %v7562_v28  ;;  %v11707_v10 = vadd.f32 %v8382_v57, %v11353_v35  ;;  %6321 = vmatprep.mubr.bf16.mxu1 %v7624_v25  ;;  %v3209_v5 = vld [vmem:[%s12641_s3 + $0x720] sm:$0xff]  ;;  %v7578_v1 = vcombine.high %v3146_v54, %v3154_v32 }
 0x316   : > { %v7640_v42 = vcombine.high %v3209_v5, %v3217_v47 }
 0x317   : > { %v8343_v26 = vpop.f32.mrb[120].mxu0  ;;  %v8383_v35 = vpop.f32.mrb[8].mxu1 }
 0x318   : > { %v8344_v18 = vpop.f32.mrb[121].mxu0  ;;  %v8384_v14 = vpop.f32.mrb[9].mxu1 }
 0x319   : > { %v8345_v63 = vadd.f32 %v8344_v18, %v8343_v26  ;;  %v8346_v15 = vpop.f32.mrb[122].mxu0  ;;  %v8385_v55 = vadd.f32 %v8384_v14, %v8383_v35  ;;  %v8386_v28 = vpop.f32.mrb[10].mxu1  ;;  %v7577_v35 = vcombine.low %v3146_v54, %v3154_v32  ;;  %v7639_v14 = vcombine.low %v3209_v5, %v3217_v47  ;;  %v2995_v47 = vld [vmem:[%s12641_s3 + $0x70] sm:$0xff] }
 0x31a   : > { %v8347_v38 = vpop.f32.mrb[123].mxu0  ;;  %v8387_v30 = vpop.f32.mrb[11].mxu1 }
 0x31b   : > { %v11722_v21 = vadd.f32 %v8345_v63, %v11629_v13  ;;  %v8348_v25 = vadd.f32 %v8347_v38, %v8346_v15  ;;  %v11725_v49 = vadd.f32 %v8385_v55, %v11373_v16  ;;  %v8388_v57 = vadd.f32 %v8387_v30, %v8386_v28  ;;  %v3162_v13 = vld [vmem:[%s12641_s3 + $0x5a8] sm:$0xff] }
 0x31c   : > { %6451 = vmatmul.mubr.bf16.gmra.mrb[228].mxu0 %v7561_v61  ;;  %6322 = vmatmul.mubr.bf16.gmra.mrb[116].mxu1 %v7623_v7  ;;  %v3170_v16 = vld [vmem:[%s12641_s3 + $0x5e8] sm:$0xff] }
 0x31d   : > { %v11728_v17 = vadd.f32 %v8348_v25, %v11634_v43  ;;  %6458 = vmatprep.mubr.bf16.mxu0 %v7578_v1  ;;  %v11731_v40 = vadd.f32 %v8388_v57, %v11379_v62  ;;  %6329 = vmatprep.mubr.bf16.mxu1 %v7640_v42  ;;  %v3225_v43 = vld [vmem:[%s12641_s3 + $0x7a0] sm:$0xff]  ;;  %v7594_v15 = vcombine.high %v3162_v13, %v3170_v16 }
 0x31e   : > { %v7656_v28 = vcombine.high %v3225_v43, %v3233_v44 }
 0x31f   : > { %v8349_v27 = vpop.f32.mrb[124].mxu0  ;;  %v8389_v62 = vpop.f32.mrb[12].mxu1 }
 0x320   : > { %v8350_v26 = vpop.f32.mrb[125].mxu0  ;;  %v8390_v61 = vpop.f32.mrb[13].mxu1 }
 0x321   : > { %v8351_v18 = vadd.f32 %v8350_v26, %v8349_v27  ;;  %v8352_v63 = vpop.f32.mrb[126].mxu0  ;;  %v8391_v7 = vadd.f32 %v8390_v61, %v8389_v62  ;;  %v8392_v1 = vpop.f32.mrb[14].mxu1  ;;  %v7593_v62 = vcombine.low %v3162_v13, %v3170_v16  ;;  %v7655_v61 = vcombine.low %v3225_v43, %v3233_v44  ;;  %v3011_v44 = vld [vmem:[%s12641_s3 + $0xf0] sm:$0xff] }
 0x322   : > { %v8353_v55 = vpop.f32.mrb[127].mxu0  ;;  %v8393_v25 = vpop.f32.mrb[15].mxu1 }
 0x323   : > { %v11746_v38 = vadd.f32 %v8351_v18, %v11651_v9  ;;  %v8354_v42 = vadd.f32 %v8353_v55, %v8352_v63  ;;  %v11749_v30 = vadd.f32 %v8391_v7, %v11402_v51  ;;  %v8394_v57 = vadd.f32 %v8393_v25, %v8392_v1  ;;  %v3178_v9 = vld [vmem:[%s12641_s3 + $0x628] sm:$0xff] }
 0x324   : > { %6459 = vmatmul.mubr.bf16.gmra.mrb[232].mxu0 %v7577_v35  ;;  %6330 = vmatmul.mubr.bf16.gmra.mrb[120].mxu1 %v7639_v14  ;;  %v3186_v51 = vld [vmem:[%s12641_s3 + $0x668] sm:$0xff] }
 0x325   : > { %v11752_v54 = vadd.f32 %v8354_v42, %v11656_v4  ;;  %6466 = vmatprep.mubr.bf16.mxu0 %v7594_v15  ;;  %v11755_v32 = vadd.f32 %v8394_v57, %v11408_v8  ;;  %6337 = vmatprep.mubr.bf16.mxu1 %v7656_v28  ;;  %v2987_v4 = vld [vmem:[%s12641_s3 + $0x30] sm:$0xff]  ;;  %v7610_v63 = vcombine.high %v3178_v9, %v3186_v51 }
 0x326   : > { %v7420_v1 = vcombine.high %v2987_v4, %v2995_v47 }
 0x327   : > { %v8483_v5 = vpop.f32.mrb[128].mxu0  ;;  %v8395_v8 = vpop.f32.mrb[16].mxu1 }
 0x328   : > { %v8484_v27 = vpop.f32.mrb[129].mxu0  ;;  %v8396_v26 = vpop.f32.mrb[17].mxu1 }
 0x329   : > { %v8485_v35 = vadd.f32 %v8484_v27, %v8483_v5  ;;  %v8486_v18 = vpop.f32.mrb[130].mxu0  ;;  %v8397_v14 = vadd.f32 %v8396_v26, %v8395_v8  ;;  %v8398_v15 = vpop.f32.mrb[18].mxu1  ;;  %v7609_v8 = vcombine.low %v3178_v9, %v3186_v51 }
 0x32a   : > { %v8487_v7 = vpop.f32.mrb[131].mxu0  ;;  %v8399_v28 = vpop.f32.mrb[19].mxu1 }
 0x32b   : > { %v11770_v55 = vadd.f32 %v8485_v35, %v11677_v60  ;;  %v8488_v42 = vadd.f32 %v8487_v7, %v8486_v18  ;;  %v11773_v25 = vadd.f32 %v8397_v14, %v11429_v0  ;;  %v8400_v57 = vadd.f32 %v8399_v28, %v8398_v15  ;;  %v3194_v60 = vld [vmem:[%s12641_s3 + $0x6a8] sm:$0xff] }
 0x32c   : > { %6467 = vmatmul.mubr.bf16.gmra.mrb[236].mxu0 %v7593_v62  ;;  %6338 = vmatmul.mubr.bf16.gmra.mrb[124].mxu1 %v7655_v61  ;;  %v3202_v0 = vld [vmem:[%s12641_s3 + $0x6e8] sm:$0xff]  ;;  %v7419_v35 = vcombine.low %v2987_v4, %v2995_v47 }
 0x32d   : > { %v11776_v13 = vadd.f32 %v8488_v42, %v11683_v22  ;;  %6474 = vmatprep.mubr.bf16.mxu0 %v7610_v63  ;;  %v11779_v16 = vadd.f32 %v8400_v57, %v11435_v45  ;;  %6539 = vmatprep.mubr.bf16.mxu1 %v7420_v1  ;;  %v3003_v22 = vld [vmem:[%s12641_s3 + $0xb0] sm:$0xff]  ;;  %v7626_v18 = vcombine.high %v3194_v60, %v3202_v0 }
 0x32e   : > { %v7436_v15 = vcombine.high %v3003_v22, %v3011_v44 }
 0x32f   : > { %v8489_v43 = vpop.f32.mrb[132].mxu0  ;;  %v8401_v45 = vpop.f32.mrb[20].mxu1 }
 0x330   : > { %v8490_v5 = vpop.f32.mrb[133].mxu0  ;;  %v8402_v27 = vpop.f32.mrb[21].mxu1 }
 0x331   : > { %v8491_v62 = vadd.f32 %v8490_v5, %v8489_v43  ;;  %v8492_v26 = vpop.f32.mrb[134].mxu0  ;;  %v8403_v61 = vadd.f32 %v8402_v27, %v8401_v45  ;;  %v8404_v63 = vpop.f32.mrb[22].mxu1  ;;  %v7625_v43 = vcombine.low %v3194_v60, %v3202_v0  ;;  %v7435_v27 = vcombine.low %v3003_v22, %v3011_v44 }
 0x332   : > { %v8493_v14 = vpop.f32.mrb[135].mxu0  ;;  %v8405_v1 = vpop.f32.mrb[23].mxu1 }
 0x333   : > { %v11794_v7 = vadd.f32 %v8491_v62, %v11701_v59  ;;  %v8494_v28 = vadd.f32 %v8493_v14, %v8492_v26  ;;  %v11797_v42 = vadd.f32 %v8403_v61, %v11459_v6  ;;  %v8406_v57 = vadd.f32 %v8405_v1, %v8404_v63  ;;  %v3210_v59 = vld [vmem:[%s12641_s3 + $0x728] sm:$0xff] }
 0x334   : > { %6475 = vmatmul.mubr.bf16.gmra.mrb[240].mxu0 %v7609_v8  ;;  %6540 = vmatmul.mubr.bf16.vlgmr.msra.gmra.mrb[128].mxu1 %v7419_v35  ;;  %v3218_v6 = vld [vmem:[%s12641_s3 + $0x768] sm:$0xff] }
 0x335   : > { %v11800_v9 = vadd.f32 %v8494_v28, %v11707_v10  ;;  %6482 = vmatprep.mubr.bf16.mxu0 %v7626_v18  ;;  %v11803_v51 = vadd.f32 %v8406_v57, %v11468_v31  ;;  %9035 = vmatpush3.bf16.msra.mxu1 %v11453_v36  ;;  %v3019_v10 = vld [vmem:[%s12641_s3 + $0x130] sm:$0xff]  ;;  %v7642_v62 = vcombine.high %v3210_v59, %v3218_v6 }
 0x336   : > { %6547 = vmatprep.mubr.bf16.mxu1 %v7436_v15  ;;  %v3027_v31 = vld [vmem:[%s12641_s3 + $0x170] sm:$0xff]  ;;  %9028 = vmatprep.subr.bf16.mxu1 %v11462_v19  ;;  %v7641_v1 = vcombine.low %v3210_v59, %v3218_v6 }
 0x337   : > { %v8495_v4 = vpop.f32.mrb[136].mxu0  ;;  %v8407_v36 = vpop.f32.mrb[24].mxu1  ;;  %v7452_v61 = vcombine.high %v3019_v10, %v3027_v31 }
 0x338   : > { %v8496_v47 = vpop.f32.mrb[137].mxu0  ;;  %v8408_v45 = vpop.f32.mrb[25].mxu1 }
 0x339   : > { %v8497_v5 = vadd.f32 %v8496_v47, %v8495_v4  ;;  %v8498_v8 = vpop.f32.mrb[138].mxu0  ;;  %v8409_v26 = vadd.f32 %v8408_v45, %v8407_v36  ;;  %v8410_v35 = vpop.f32.mrb[26].mxu1  ;;  %9036 = vmatpush3.bf16.msra.mxu1 %v11472_v3  ;;  %v3226_v3 = vld [vmem:[%s12641_s3 + $0x7a8] sm:$0xff]  ;;  %v7451_v36 = vcombine.low %v3019_v10, %v3027_v31 }
 0x33a   : > { %v8499_v18 = vpop.f32.mrb[139].mxu0  ;;  %v8411_v14 = vpop.f32.mrb[27].mxu1  ;;  %9029 = vmatprep.subr.bf16.mxu1 %v11481_v11  ;;  %v3234_v11 = vld [vmem:[%s12641_s3 + $0x7e8] sm:$0xff] }
 0x33b   : > { %v11821_v63 = vadd.f32 %v8497_v5, %v11725_v49  ;;  %v8500_v15 = vadd.f32 %v8499_v18, %v8498_v8  ;;  %v11825_v19 = vadd.f32 %v8409_v26, %v11499_v53  ;;  %v8412_v60 = vadd.f32 %v8411_v14, %v8410_v35  ;;  %v3035_v49 = vld [vmem:[%s12641_s3 + $0x1b0] sm:$0xff] }
 0x33c   : > { %6483 = vmatmul.mubr.bf16.gmra.mrb[244].mxu0 %v7625_v43  ;;  %6548 = vmatmul.mubr.bf16.gmra.mrb[132].mxu1 %v7435_v27  ;;  %v7658_v47 = vcombine.high %v3226_v3, %v3234_v11  ;;  %v7657_v26 = vcombine.low %v3226_v3, %v3234_v11 }
 0x33d   : > { %v11828_v0 = vadd.f32 %v8500_v15, %v11731_v40  ;;  %6490 = vmatprep.mubr.bf16.mxu0 %v7642_v62  ;;  %v11831_v22 = vadd.f32 %v8412_v60, %v11507_v29  ;;  %6555 = vmatprep.mubr.bf16.mxu1 %v7452_v61  ;;  %v3043_v29 = vld [vmem:[%s12641_s3 + $0x1f0] sm:$0xff] }
 0x33e   : > { %9037 = vmatpush3.bf16.msra.mxu1 %v11496_v23  ;;  %v7468_v5 = vcombine.high %v3035_v49, %v3043_v29  ;;  %v7467_v14 = vcombine.low %v3035_v49, %v3043_v29  ;;  %v12658_v29 = vld [vmem:[#allocation3_spill] sm:$0xff] }
 0x33f   : > { %v8501_v53 = vpop.f32.mrb[140].mxu0  ;;  %9030 = vmatprep.subr.bf16.mxu1 %v11502_v50  ;;  %v8413_v40 = vpop.f32.mrb[28].mxu1 }
 0x340   : > { %v8502_v44 = vpop.f32.mrb[141].mxu0  ;;  %v8414_v28 = vpop.f32.mrb[29].mxu1 }
 0x341   : > { %v8503_v57 = vadd.f32 %v8502_v44, %v8501_v53  ;;  %v8504_v4 = vpop.f32.mrb[142].mxu0  ;;  %v8415_v23 = vadd.f32 %v8414_v28, %v8413_v40  ;;  %v8416_v43 = vpop.f32.mrb[30].mxu1 }
 0x342   : > { %v8505_v45 = vpop.f32.mrb[143].mxu0  ;;  %9038 = vmatpush3.bf16.msra.mxu1 %v11519_v20  ;;  %v8417_v27 = vpop.f32.mrb[31].mxu1  ;;  %v2988_v20 = vld [vmem:[%s12641_s3 + $0x38] sm:$0xff] }
 0x343   : > { %v11849_v8 = vadd.f32 %v8503_v57, %v11749_v30  ;;  %v8506_v62 = vadd.f32 %v8505_v45, %v8504_v4  ;;  %9031 = vmatprep.subr.bf16.mxu1 %v11529_v56  ;;  %v11853_v50 = vadd.f32 %v8415_v23, %v11539_v2  ;;  %v8418_v59 = vadd.f32 %v8417_v27, %v8416_v43  ;;  %v2996_v56 = vld [vmem:[%s12641_s3 + $0x78] sm:$0xff]  ;;  %v3051_v30 = vld [vmem:[%s12641_s3 + $0x230] sm:$0xff] }
 0x344   : > { %6491 = vmatmul.mubr.bf16.gmra.mrb[248].mxu0 %v7641_v1  ;;  %6556 = vmatmul.mubr.bf16.gmra.mrb[136].mxu1 %v7451_v36  ;;  %v7422_v15 = vcombine.high %v2988_v20, %v2996_v56  ;;  %v7421_v36 = vcombine.low %v2988_v20, %v2996_v56 }
 0x345   : > { %v11856_v6 = vadd.f32 %v8506_v62, %v11755_v32  ;;  %6498 = vmatprep.mubr.bf16.mxu0 %v7658_v47  ;;  %v11859_v10 = vadd.f32 %v8418_v59, %v11548_v39  ;;  %6563 = vmatprep.mubr.bf16.mxu1 %v7468_v5  ;;  %v3059_v39 = vld [vmem:[%s12641_s3 + $0x270] sm:$0xff] }
 0x346   : > { %9039 = vmatpush3.bf16.msra.mxu1 %v11536_v33  ;;  %v7484_v40 = vcombine.high %v3051_v30, %v3059_v39  ;;  %v7483_v45 = vcombine.low %v3051_v30, %v3059_v39  ;;  %v12661_v30 = vld [vmem:[#allocation6_spill] sm:$0xff] }
 0x347   : > { %v8507_v2 = vpop.f32.mrb[144].mxu0  ;;  %9032 = vmatprep.subr.bf16.mxu1 %v11543_v52  ;;  %v8419_v32 = vpop.f32.mrb[32].mxu1 }
 0x348   : > { %v8508_v31 = vpop.f32.mrb[145].mxu0  ;;  %v8420_v35 = vpop.f32.mrb[33].mxu1 }
 0x349   : > { %v8509_v18 = vadd.f32 %v8508_v31, %v8507_v2  ;;  %v8510_v61 = vpop.f32.mrb[146].mxu0  ;;  %v8421_v33 = vadd.f32 %v8420_v35, %v8419_v32  ;;  %v8422_v60 = vpop.f32.mrb[34].mxu1  ;;  %v12659_v32 = vld [vmem:[#allocation4_spill] sm:$0xff] }
 0x34a   : > { %v8511_v53 = vpop.f32.mrb[147].mxu0  ;;  %9040 = vmatpush3.bf16.msra.mxu1 %v11558_v46  ;;  %v8423_v1 = vpop.f32.mrb[35].mxu1  ;;  %v3004_v46 = vld [vmem:[%s12641_s3 + $0xb8] sm:$0xff] }
 0x34b   : > { %v11877_v44 = vadd.f32 %v8509_v18, %v11773_v25  ;;  %v8512_v28 = vadd.f32 %v8511_v53, %v8510_v61  ;;  %9033 = vmatprep.subr.bf16.mxu1 %v11568_v58  ;;  %v11881_v52 = vadd.f32 %v8421_v33, %v11578_v34  ;;  %v8424_v3 = vadd.f32 %v8423_v1, %v8422_v60  ;;  %v3012_v58 = vld [vmem:[%s12641_s3 + $0xf8] sm:$0xff]  ;;  %v12657_v34 = vld [vmem:[#allocation2_spill] sm:$0xff]  ;;  %v3091_v33 = vld [vmem:[%s12641_s3 + $0x370] sm:$0xff] }
 0x34c   : > { %6499 = vmatmul.mubr.bf16.gmra.mrb[252].mxu0 %v7657_v26  ;;  %6564 = vmatmul.mubr.bf16.gmra.mrb[140].mxu1 %v7467_v14  ;;  %v7438_v5 = vcombine.high %v3004_v46, %v3012_v58  ;;  %v12660_v18 = vld [vmem:[#allocation5_spill] sm:$0xff] }
 0x34d   : > { %v11884_v11 = vadd.f32 %v8512_v28, %v11779_v16  ;;  %6700 = vmatprep.mubr.bf16.mxu0 %v7422_v15  ;;  %v11887_v49 = vadd.f32 %v8424_v3, %v11587_v24  ;;  %6571 = vmatprep.mubr.bf16.mxu1 %v7484_v40  ;;  %v3067_v16 = vld [vmem:[%s12641_s3 + $0x2b0] sm:$0xff]  ;;  %v3028_v14 = vld [vmem:[%s12641_s3 + $0x178] sm:$0xff]  ;;  %v7437_v40 = vcombine.low %v3004_v46, %v3012_v58 }
 0x34e   : > { %9041 = vmatpush3.bf16.msra.mxu1 %v12657_v34  ;;  %v3075_v24 = vld [vmem:[%s12641_s3 + $0x2f0] sm:$0xff] }
 0x34f   : > { %v8513_v25 = vpop.f32.mrb[148].mxu0  ;;  %9034 = vmatprep.subr.bf16.mxu1 %v12658_v29  ;;  %v8425_v57 = vpop.f32.mrb[36].mxu1  ;;  %v7500_v2 = vcombine.high %v3067_v16, %v3075_v24  ;;  %v7499_v34 = vcombine.low %v3067_v16, %v3075_v24  ;;  %v12663_v58 = vld [vmem:[#allocation8_spill] sm:$0xff]  ;;  %v3044_v24 = vld [vmem:[%s12641_s3 + $0x1f8] sm:$0xff] }
 0x350   : > { %v8514_v4 = vpop.f32.mrb[149].mxu0  ;;  %v8426_v47 = vpop.f32.mrb[37].mxu1 }
 0x351   : > { %v8515_v23 = vadd.f32 %v8514_v4, %v8513_v25  ;;  %v8516_v43 = vpop.f32.mrb[150].mxu0  ;;  %v8427_v27 = vadd.f32 %v8426_v47, %v8425_v57  ;;  %v8428_v62 = vpop.f32.mrb[38].mxu1 }
 0x352   : > { %v8517_v59 = vpop.f32.mrb[151].mxu0  ;;  %9042 = vmatpush3.bf16.msra.mxu1 %v12659_v32  ;;  %v8429_v26 = vpop.f32.mrb[39].mxu1 }
 0x353   : > { %v11905_v31 = vadd.f32 %v8515_v23, %v11797_v42  ;;  %v8518_v35 = vadd.f32 %v8517_v59, %v8516_v43  ;;  %v11908_v61 = vadd.f32 %v8427_v27, %v12660_v18  ;;  %v8430_v20 = vadd.f32 %v8429_v26, %v8428_v62  ;;  %v3020_v42 = vld [vmem:[%s12641_s3 + $0x138] sm:$0xff]  ;;  %v3107_v59 = vld [vmem:[%s12641_s3 + $0x3f0] sm:$0xff] }
 0x354   : > { %6701 = vmatmul.mubr.bf16.vlgmr.msra.gmra.mrb[0].mxu0 %v7421_v36  ;;  %6572 = vmatmul.mubr.bf16.gmra.mrb[144].mxu1 %v7483_v45  ;;  %v7454_v25 = vcombine.high %v3020_v42, %v3028_v14  ;;  %v12662_v45 = vld [vmem:[#allocation7_spill] sm:$0xff]  ;;  %v7453_v26 = vcombine.low %v3020_v42, %v3028_v14  ;;  %v12665_v14 = vld [vmem:[#allocation10_spill] sm:$0xff] }
 0x355   : > { %v11911_v56 = vadd.f32 %v8518_v35, %v11803_v51  ;;  %6708 = vmatprep.mubr.bf16.mxu0 %v7438_v5  ;;  %v11914_v39 = vadd.f32 %v8430_v20, %v12661_v30  ;;  %6579 = vmatprep.mubr.bf16.mxu1 %v7500_v2  ;;  %v3083_v51 = vld [vmem:[%s12641_s3 + $0x330] sm:$0xff] }
 0x356   : > { %v7516_v36 = vcombine.high %v3083_v51, %v3091_v33  ;;  %v7515_v30 = vcombine.low %v3083_v51, %v3091_v33  ;;  %v3060_v33 = vld [vmem:[%s12641_s3 + $0x278] sm:$0xff] }
 0x357   : > { %v8519_v15 = vpop.f32.mrb[152].mxu0  ;;  %v8431_v60 = vpop.f32.mrb[40].mxu1 }
 0x358   : > { %v8520_v53 = vpop.f32.mrb[153].mxu0  ;;  %v8432_v1 = vpop.f32.mrb[41].mxu1 }
 0x359   : > { %v8521_v28 = vadd.f32 %v8520_v53, %v8519_v15  ;;  %v8522_v3 = vpop.f32.mrb[154].mxu0  ;;  %v8433_v29 = vadd.f32 %v8432_v1, %v8431_v60  ;;  %v8434_v57 = vpop.f32.mrb[42].mxu1 }
 0x35a   : > { %v8523_v4 = vpop.f32.mrb[155].mxu0  ;;  %v8435_v23 = vpop.f32.mrb[43].mxu1 }
 0x35b   : > { %v11929_v47 = vadd.f32 %v8521_v28, %v11825_v19  ;;  %v8524_v43 = vadd.f32 %v8523_v4, %v8522_v3  ;;  %v11932_v5 = vadd.f32 %v8433_v29, %v12662_v45  ;;  %v8436_v27 = vadd.f32 %v8435_v23, %v8434_v57  ;;  %v3036_v19 = vld [vmem:[%s12641_s3 + $0x1b8] sm:$0xff] }
 0x35c   : > { %6709 = vmatmul.mubr.bf16.gmra.mrb[4].mxu0 %v7437_v40  ;;  %6580 = vmatmul.mubr.bf16.gmra.mrb[148].mxu1 %v7499_v34  ;;  %v7470_v15 = vcombine.high %v3036_v19, %v3044_v24  ;;  %v7469_v45 = vcombine.low %v3036_v19, %v3044_v24 }
 0x35d   : > { %v11935_v46 = vadd.f32 %v8524_v43, %v11831_v22  ;;  %6716 = vmatprep.mubr.bf16.mxu0 %v7454_v25  ;;  %v11938_v16 = vadd.f32 %v8436_v27, %v12663_v58  ;;  %6587 = vmatprep.mubr.bf16.mxu1 %v7516_v36  ;;  %v3099_v22 = vld [vmem:[%s12641_s3 + $0x3b0] sm:$0xff]  ;;  %v12664_v25 = vld [vmem:[#allocation9_spill] sm:$0xff] }
 0x35e   : > { %v7532_v1 = vcombine.high %v3099_v22, %v3107_v59  ;;  %v3123_v36 = vld [vmem:[%s12641_s3 + $0x470] sm:$0xff] }
 0x35f   : > { %v8525_v62 = vpop.f32.mrb[156].mxu0  ;;  %v8437_v2 = vpop.f32.mrb[44].mxu1 }
 0x360   : > { %v8526_v32 = vpop.f32.mrb[157].mxu0  ;;  %v8438_v35 = vpop.f32.mrb[45].mxu1 }
 0x361   : > { %v8527_v18 = vadd.f32 %v8526_v32, %v8525_v62  ;;  %v8528_v20 = vpop.f32.mrb[158].mxu0  ;;  %v8439_v60 = vadd.f32 %v8438_v35, %v8437_v2  ;;  %v8440_v53 = vpop.f32.mrb[46].mxu1  ;;  %v7531_v2 = vcombine.low %v3099_v22, %v3107_v59  ;;  %v3139_v59 = vld [vmem:[%s12641_s3 + $0x4f0] sm:$0xff] }
 0x362   : > { %v8529_v40 = vpop.f32.mrb[159].mxu0  ;;  %v8441_v3 = vpop.f32.mrb[47].mxu1 }
 0x363   : > { %v11953_v28 = vadd.f32 %v8527_v18, %v11853_v50  ;;  %v8530_v34 = vadd.f32 %v8529_v40, %v8528_v20  ;;  %v11956_v29 = vadd.f32 %v8439_v60, %v12664_v25  ;;  %v8442_v57 = vadd.f32 %v8441_v3, %v8440_v53  ;;  %v3052_v50 = vld [vmem:[%s12641_s3 + $0x238] sm:$0xff] }
 0x364   : > { %6717 = vmatmul.mubr.bf16.gmra.mrb[8].mxu0 %v7453_v26  ;;  %6588 = vmatmul.mubr.bf16.gmra.mrb[152].mxu1 %v7515_v30  ;;  %v7486_v32 = vcombine.high %v3052_v50, %v3060_v33  ;;  %v7485_v3 = vcombine.low %v3052_v50, %v3060_v33 }
 0x365   : > { %v11959_v42 = vadd.f32 %v8530_v34, %v11859_v10  ;;  %6724 = vmatprep.mubr.bf16.mxu0 %v7470_v15  ;;  %v11962_v51 = vadd.f32 %v8442_v57, %v12665_v14  ;;  %6595 = vmatprep.mubr.bf16.mxu1 %v7532_v1  ;;  %v3115_v10 = vld [vmem:[%s12641_s3 + $0x430] sm:$0xff] }
 0x366   : > { %v7548_v20 = vcombine.high %v3115_v10, %v3123_v36  ;;  %v7547_v14 = vcombine.low %v3115_v10, %v3123_v36  ;;  %v3155_v36 = vld [vmem:[%s12641_s3 + $0x570] sm:$0xff] }
 0x367   : > { %v8531_v4 = vpop.f32.mrb[160].mxu0  ;;  %v8443_v23 = vpop.f32.mrb[48].mxu1 }
 0x368   : > { %v8532_v43 = vpop.f32.mrb[161].mxu0  ;;  %v8444_v27 = vpop.f32.mrb[49].mxu1 }
 0x369   : > { %v8533_v58 = vadd.f32 %v8532_v43, %v8531_v4  ;;  %v8534_v62 = vpop.f32.mrb[162].mxu0  ;;  %v8445_v26 = vadd.f32 %v8444_v27, %v8443_v23  ;;  %v8446_v35 = vpop.f32.mrb[50].mxu1 }
 0x36a   : > { %v8535_v18 = vpop.f32.mrb[163].mxu0  ;;  %v8447_v15 = vpop.f32.mrb[51].mxu1 }
 0x36b   : > { %v11977_v30 = vadd.f32 %v8533_v58, %v11881_v52  ;;  %v8536_v60 = vadd.f32 %v8535_v18, %v8534_v62  ;;  %v11980_v53 = vadd.f32 %v8445_v26, %v11674_v41  ;;  %v8448_v40 = vadd.f32 %v8447_v15, %v8446_v35  ;;  %v3068_v52 = vld [vmem:[%s12641_s3 + $0x2b8] sm:$0xff] }
 0x36c   : > { %6725 = vmatmul.mubr.bf16.gmra.mrb[12].mxu0 %v7469_v45  ;;  %6596 = vmatmul.mubr.bf16.gmra.mrb[156].mxu1 %v7531_v2  ;;  %v3076_v41 = vld [vmem:[%s12641_s3 + $0x2f8] sm:$0xff] }
 0x36d   : > { %v11983_v19 = vadd.f32 %v8536_v60, %v11887_v49  ;;  %6732 = vmatprep.mubr.bf16.mxu0 %v7486_v32  ;;  %v11986_v24 = vadd.f32 %v8448_v40, %v11680_v48  ;;  %6603 = vmatprep.mubr.bf16.mxu1 %v7548_v20  ;;  %v3131_v49 = vld [vmem:[%s12641_s3 + $0x4b0] sm:$0xff]  ;;  %v7502_v4 = vcombine.high %v3068_v52, %v3076_v41 }
 0x36e   : > { %v7564_v27 = vcombine.high %v3131_v49, %v3139_v59  ;;  %v7501_v18 = vcombine.low %v3068_v52, %v3076_v41  ;;  %v7563_v40 = vcombine.low %v3131_v49, %v3139_v59  ;;  %v3171_v59 = vld [vmem:[%s12641_s3 + $0x5f0] sm:$0xff] }
 0x36f   : > { %v8537_v22 = vpop.f32.mrb[164].mxu0  ;;  %v8449_v48 = vpop.f32.mrb[52].mxu1 }
 0x370   : > { %v8538_v1 = vpop.f32.mrb[165].mxu0  ;;  %v8450_v34 = vpop.f32.mrb[53].mxu1 }
 0x371   : > { %v8539_v25 = vadd.f32 %v8538_v1, %v8537_v22  ;;  %v8540_v57 = vpop.f32.mrb[166].mxu0  ;;  %v8451_v23 = vadd.f32 %v8450_v34, %v8449_v48  ;;  %v8452_v43 = vpop.f32.mrb[54].mxu1 }
 0x372   : > { %v8541_v45 = vpop.f32.mrb[167].mxu0  ;;  %v8453_v62 = vpop.f32.mrb[55].mxu1 }
 0x373   : > { %v12001_v58 = vadd.f32 %v8539_v25, %v11908_v61  ;;  %v8542_v2 = vadd.f32 %v8541_v45, %v8540_v57  ;;  %v12004_v32 = vadd.f32 %v8451_v23, %v11698_v12  ;;  %v8454_v26 = vadd.f32 %v8453_v62, %v8452_v43  ;;  %v3084_v61 = vld [vmem:[%s12641_s3 + $0x338] sm:$0xff] }
 0x374   : > { %6733 = vmatmul.mubr.bf16.gmra.mrb[16].mxu0 %v7485_v3  ;;  %6604 = vmatmul.mubr.bf16.gmra.mrb[160].mxu1 %v7547_v14  ;;  %v3092_v12 = vld [vmem:[%s12641_s3 + $0x378] sm:$0xff] }
 0x375   : > { %v12007_v50 = vadd.f32 %v8542_v2, %v11914_v39  ;;  %6740 = vmatprep.mubr.bf16.mxu0 %v7502_v4  ;;  %v12010_v33 = vadd.f32 %v8454_v26, %v11704_v37  ;;  %6611 = vmatprep.mubr.bf16.mxu1 %v7564_v27  ;;  %v3147_v39 = vld [vmem:[%s12641_s3 + $0x530] sm:$0xff]  ;;  %v7518_v22 = vcombine.high %v3084_v61, %v3092_v12 }
 0x376   : > { %v7580_v34 = vcombine.high %v3147_v39, %v3155_v36  ;;  %v7517_v45 = vcombine.low %v3084_v61, %v3092_v12  ;;  %v7579_v26 = vcombine.low %v3147_v39, %v3155_v36  ;;  %v3187_v36 = vld [vmem:[%s12641_s3 + $0x670] sm:$0xff] }
 0x377   : > { %v8543_v10 = vpop.f32.mrb[168].mxu0  ;;  %v8455_v37 = vpop.f32.mrb[56].mxu1 }
 0x378   : > { %v8544_v35 = vpop.f32.mrb[169].mxu0  ;;  %v8456_v20 = vpop.f32.mrb[57].mxu1 }
 0x379   : > { %v8545_v15 = vadd.f32 %v8544_v35, %v8543_v10  ;;  %v8546_v60 = vpop.f32.mrb[170].mxu0  ;;  %v8457_v48 = vadd.f32 %v8456_v20, %v8455_v37  ;;  %v8458_v1 = vpop.f32.mrb[58].mxu1 }
 0x37a   : > { %v8547_v3 = vpop.f32.mrb[171].mxu0  ;;  %v8459_v57 = vpop.f32.mrb[59].mxu1 }
 0x37b   : > { %v12025_v25 = vadd.f32 %v8545_v15, %v11932_v5  ;;  %v8548_v14 = vadd.f32 %v8547_v3, %v8546_v60  ;;  %v12028_v4 = vadd.f32 %v8457_v48, %v11722_v21  ;;  %v8460_v23 = vadd.f32 %v8459_v57, %v8458_v1  ;;  %v3100_v5 = vld [vmem:[%s12641_s3 + $0x3b8] sm:$0xff] }
 0x37c   : > { %6741 = vmatmul.mubr.bf16.gmra.mrb[20].mxu0 %v7501_v18  ;;  %6612 = vmatmul.mubr.bf16.gmra.mrb[164].mxu1 %v7563_v40  ;;  %v3108_v21 = vld [vmem:[%s12641_s3 + $0x3f8] sm:$0xff] }
 0x37d   : > { %v12031_v52 = vadd.f32 %v8548_v14, %v11938_v16  ;;  %6748 = vmatprep.mubr.bf16.mxu0 %v7518_v22  ;;  %v12034_v41 = vadd.f32 %v8460_v23, %v11728_v17  ;;  %6619 = vmatprep.mubr.bf16.mxu1 %v7580_v34  ;;  %v3163_v16 = vld [vmem:[%s12641_s3 + $0x5b0] sm:$0xff]  ;;  %v7534_v10 = vcombine.high %v3100_v5, %v3108_v21 }
 0x37e   : > { %v7596_v20 = vcombine.high %v3163_v16, %v3171_v59  ;;  %v7533_v3 = vcombine.low %v3100_v5, %v3108_v21  ;;  %v7595_v23 = vcombine.low %v3163_v16, %v3171_v59  ;;  %v3203_v59 = vld [vmem:[%s12641_s3 + $0x6f0] sm:$0xff] }
 0x37f   : > { %v8549_v49 = vpop.f32.mrb[172].mxu0  ;;  %v8461_v17 = vpop.f32.mrb[60].mxu1 }
 0x380   : > { %v8550_v43 = vpop.f32.mrb[173].mxu0  ;;  %v8462_v27 = vpop.f32.mrb[61].mxu1 }
 0x381   : > { %v8551_v62 = vadd.f32 %v8550_v43, %v8549_v49  ;;  %v8552_v2 = vpop.f32.mrb[174].mxu0  ;;  %v8463_v37 = vadd.f32 %v8462_v27, %v8461_v17  ;;  %v8464_v35 = vpop.f32.mrb[62].mxu1 }
 0x382   : > { %v8553_v18 = vpop.f32.mrb[175].mxu0  ;;  %v8465_v60 = vpop.f32.mrb[63].mxu1 }
 0x383   : > { %v12049_v15 = vadd.f32 %v8551_v62, %v11956_v29  ;;  %v8554_v40 = vadd.f32 %v8553_v18, %v8552_v2  ;;  %v12052_v22 = vadd.f32 %v8463_v37, %v11746_v38  ;;  %v8466_v48 = vadd.f32 %v8465_v60, %v8464_v35  ;;  %v3116_v29 = vld [vmem:[%s12641_s3 + $0x438] sm:$0xff] }
 0x384   : > { %6749 = vmatmul.mubr.bf16.gmra.mrb[24].mxu0 %v7517_v45  ;;  %6620 = vmatmul.mubr.bf16.gmra.mrb[168].mxu1 %v7579_v26  ;;  %v3124_v38 = vld [vmem:[%s12641_s3 + $0x478] sm:$0xff] }
 0x385   : > { %v12055_v61 = vadd.f32 %v8554_v40, %v11962_v51  ;;  %6756 = vmatprep.mubr.bf16.mxu0 %v7534_v10  ;;  %v12058_v12 = vadd.f32 %v8466_v48, %v11752_v54  ;;  %6627 = vmatprep.mubr.bf16.mxu1 %v7596_v20  ;;  %v3179_v51 = vld [vmem:[%s12641_s3 + $0x630] sm:$0xff]  ;;  %v7550_v49 = vcombine.high %v3116_v29, %v3124_v38 }
 0x386   : > { %v7612_v27 = vcombine.high %v3179_v51, %v3187_v36  ;;  %v7549_v18 = vcombine.low %v3116_v29, %v3124_v38  ;;  %v7611_v48 = vcombine.low %v3179_v51, %v3187_v36  ;;  %v3219_v36 = vld [vmem:[%s12641_s3 + $0x770] sm:$0xff] }
 0x387   : > { %v8555_v39 = vpop.f32.mrb[176].mxu0  ;;  %v8595_v54 = vpop.f32.mrb[64].mxu1 }
 0x388   : > { %v8556_v1 = vpop.f32.mrb[177].mxu0  ;;  %v8596_v57 = vpop.f32.mrb[65].mxu1 }
 0x389   : > { %v8557_v34 = vadd.f32 %v8556_v1, %v8555_v39  ;;  %v8558_v14 = vpop.f32.mrb[178].mxu0  ;;  %v8597_v17 = vadd.f32 %v8596_v57, %v8595_v54  ;;  %v8598_v43 = vpop.f32.mrb[66].mxu1 }
 0x38a   : > { %v8559_v45 = vpop.f32.mrb[179].mxu0  ;;  %v8599_v26 = vpop.f32.mrb[67].mxu1 }
 0x38b   : > { %v12073_v62 = vadd.f32 %v8557_v34, %v11980_v53  ;;  %v8560_v2 = vadd.f32 %v8559_v45, %v8558_v14  ;;  %v12076_v10 = vadd.f32 %v8597_v17, %v11770_v55  ;;  %v8600_v37 = vadd.f32 %v8599_v26, %v8598_v43  ;;  %v3132_v53 = vld [vmem:[%s12641_s3 + $0x4b8] sm:$0xff] }
 0x38c   : > { %6757 = vmatmul.mubr.bf16.gmra.mrb[28].mxu0 %v7533_v3  ;;  %6628 = vmatmul.mubr.bf16.gmra.mrb[172].mxu1 %v7595_v23  ;;  %v3140_v55 = vld [vmem:[%s12641_s3 + $0x4f8] sm:$0xff] }
 0x38d   : > { %v12079_v5 = vadd.f32 %v8560_v2, %v11986_v24  ;;  %6764 = vmatprep.mubr.bf16.mxu0 %v7550_v49  ;;  %v12082_v21 = vadd.f32 %v8600_v37, %v11776_v13  ;;  %6635 = vmatprep.mubr.bf16.mxu1 %v7612_v27  ;;  %v3195_v24 = vld [vmem:[%s12641_s3 + $0x6b0] sm:$0xff]  ;;  %v7566_v39 = vcombine.high %v3132_v53, %v3140_v55 }
 0x38e   : > { %v7628_v34 = vcombine.high %v3195_v24, %v3203_v59  ;;  %v7565_v45 = vcombine.low %v3132_v53, %v3140_v55  ;;  %v7627_v37 = vcombine.low %v3195_v24, %v3203_v59  ;;  %v3235_v59 = vld [vmem:[%s12641_s3 + $0x7f0] sm:$0xff] }
 0x38f   : > { %v8561_v16 = vpop.f32.mrb[180].mxu0  ;;  %v8601_v13 = vpop.f32.mrb[68].mxu1 }
 0x390   : > { %v8562_v35 = vpop.f32.mrb[181].mxu0  ;;  %v8602_v60 = vpop.f32.mrb[69].mxu1 }
 0x391   : > { %v8563_v20 = vadd.f32 %v8562_v35, %v8561_v16  ;;  %v8564_v40 = vpop.f32.mrb[182].mxu0  ;;  %v8603_v54 = vadd.f32 %v8602_v60, %v8601_v13  ;;  %v8604_v1 = vpop.f32.mrb[70].mxu1 }
 0x392   : > { %v8565_v3 = vpop.f32.mrb[183].mxu0  ;;  %v8605_v23 = vpop.f32.mrb[71].mxu1 }
 0x393   : > { %v12097_v57 = vadd.f32 %v8563_v20, %v12004_v32  ;;  %v8566_v14 = vadd.f32 %v8565_v3, %v8564_v40  ;;  %v12100_v49 = vadd.f32 %v8603_v54, %v11794_v7  ;;  %v8606_v17 = vadd.f32 %v8605_v23, %v8604_v1  ;;  %v3148_v32 = vld [vmem:[%s12641_s3 + $0x538] sm:$0xff] }
 0x394   : > { %6765 = vmatmul.mubr.bf16.gmra.mrb[32].mxu0 %v7549_v18  ;;  %6636 = vmatmul.mubr.bf16.gmra.mrb[176].mxu1 %v7611_v48  ;;  %v3156_v7 = vld [vmem:[%s12641_s3 + $0x578] sm:$0xff] }
 0x395   : > { %v12103_v29 = vadd.f32 %v8566_v14, %v12010_v33  ;;  %6772 = vmatprep.mubr.bf16.mxu0 %v7566_v39  ;;  %v12106_v38 = vadd.f32 %v8606_v17, %v11800_v9  ;;  %6643 = vmatprep.mubr.bf16.mxu1 %v7628_v34  ;;  %v3211_v33 = vld [vmem:[%s12641_s3 + $0x730] sm:$0xff]  ;;  %v7582_v16 = vcombine.high %v3148_v32, %v3156_v7 }
 0x396   : > { %v7644_v20 = vcombine.high %v3211_v33, %v3219_v36  ;;  %v7581_v3 = vcombine.low %v3148_v32, %v3156_v7  ;;  %v7643_v17 = vcombine.low %v3211_v33, %v3219_v36  ;;  %v3220_v36 = vld [vmem:[%s12641_s3 + $0x778] sm:$0xff] }
 0x397   : > { %v8567_v51 = vpop.f32.mrb[184].mxu0  ;;  %v8607_v9 = vpop.f32.mrb[72].mxu1 }
 0x398   : > { %v8568_v43 = vpop.f32.mrb[185].mxu0  ;;  %v8608_v2 = vpop.f32.mrb[73].mxu1 }
 0x399   : > { %v8569_v27 = vadd.f32 %v8568_v43, %v8567_v51  ;;  %v8570_v26 = vpop.f32.mrb[186].mxu0  ;;  %v8609_v13 = vadd.f32 %v8608_v2, %v8607_v9  ;;  %v8610_v35 = vpop.f32.mrb[74].mxu1 }
 0x39a   : > { %v8571_v18 = vpop.f32.mrb[187].mxu0  ;;  %v8611_v48 = vpop.f32.mrb[75].mxu1 }
 0x39b   : > { %v12121_v60 = vadd.f32 %v8569_v27, %v12028_v4  ;;  %v8572_v40 = vadd.f32 %v8571_v18, %v8570_v26  ;;  %v12124_v39 = vadd.f32 %v8609_v13, %v11821_v63  ;;  %v8612_v54 = vadd.f32 %v8611_v48, %v8610_v35  ;;  %v3164_v4 = vld [vmem:[%s12641_s3 + $0x5b8] sm:$0xff] }
 0x39c   : > { %6773 = vmatmul.mubr.bf16.gmra.mrb[36].mxu0 %v7565_v45  ;;  %6644 = vmatmul.mubr.bf16.gmra.mrb[180].mxu1 %v7627_v37  ;;  %v3172_v63 = vld [vmem:[%s12641_s3 + $0x5f8] sm:$0xff] }
 0x39d   : > { %v12127_v53 = vadd.f32 %v8572_v40, %v12034_v41  ;;  %6780 = vmatprep.mubr.bf16.mxu0 %v7582_v16  ;;  %v12130_v55 = vadd.f32 %v8612_v54, %v11828_v0  ;;  %6651 = vmatprep.mubr.bf16.mxu1 %v7644_v20  ;;  %v3227_v41 = vld [vmem:[%s12641_s3 + $0x7b0] sm:$0xff]  ;;  %v7598_v51 = vcombine.high %v3164_v4, %v3172_v63 }
 0x39e   : > { %v7660_v27 = vcombine.high %v3227_v41, %v3235_v59  ;;  %v7597_v18 = vcombine.low %v3164_v4, %v3172_v63  ;;  %v7659_v54 = vcombine.low %v3227_v41, %v3235_v59  ;;  %v3236_v59 = vld [vmem:[%s12641_s3 + $0x7f8] sm:$0xff] }
 0x39f   : > { %v8573_v24 = vpop.f32.mrb[188].mxu0  ;;  %v8613_v0 = vpop.f32.mrb[76].mxu1 }
 0x3a0   : > { %v8574_v1 = vpop.f32.mrb[189].mxu0  ;;  %v8614_v14 = vpop.f32.mrb[77].mxu1 }
 0x3a1   : > { %v8575_v34 = vadd.f32 %v8574_v1, %v8573_v24  ;;  %v8576_v23 = vpop.f32.mrb[190].mxu0  ;;  %v8615_v9 = vadd.f32 %v8614_v14, %v8613_v0  ;;  %v8616_v43 = vpop.f32.mrb[78].mxu1 }
 0x3a2   : > { %v8577_v45 = vpop.f32.mrb[191].mxu0  ;;  %v8617_v37 = vpop.f32.mrb[79].mxu1 }
 0x3a3   : > { %v12145_v2 = vadd.f32 %v8575_v34, %v12052_v22  ;;  %v8578_v26 = vadd.f32 %v8577_v45, %v8576_v23  ;;  %v12148_v16 = vadd.f32 %v8615_v9, %v11849_v8  ;;  %v8618_v13 = vadd.f32 %v8617_v37, %v8616_v43  ;;  %v3180_v22 = vld [vmem:[%s12641_s3 + $0x638] sm:$0xff] }
 0x3a4   : > { %6781 = vmatmul.mubr.bf16.gmra.mrb[40].mxu0 %v7581_v3  ;;  %6652 = vmatmul.mubr.bf16.gmra.mrb[184].mxu1 %v7643_v17  ;;  %v3188_v8 = vld [vmem:[%s12641_s3 + $0x678] sm:$0xff] }
 0x3a5   : > { %v12151_v32 = vadd.f32 %v8578_v26, %v12058_v12  ;;  %6788 = vmatprep.mubr.bf16.mxu0 %v7598_v51  ;;  %v12154_v7 = vadd.f32 %v8618_v13, %v11856_v6  ;;  %6659 = vmatprep.mubr.bf16.mxu1 %v7660_v27  ;;  %v3212_v12 = vld [vmem:[%s12641_s3 + $0x738] sm:$0xff]  ;;  %v7614_v24 = vcombine.high %v3180_v22, %v3188_v8 }
 0x3a6   : > { %v7646_v34 = vcombine.high %v3212_v12, %v3220_v36  ;;  %v7613_v45 = vcombine.low %v3180_v22, %v3188_v8  ;;  %v7645_v13 = vcombine.low %v3212_v12, %v3220_v36 }
 0x3a7   : > { %v8707_v33 = vpop.f32.mrb[192].mxu0  ;;  %v8619_v6 = vpop.f32.mrb[80].mxu1 }
 0x3a8   : > { %v8708_v35 = vpop.f32.mrb[193].mxu0  ;;  %v8620_v20 = vpop.f32.mrb[81].mxu1 }
 0x3a9   : > { %v8709_v40 = vadd.f32 %v8708_v35, %v8707_v33  ;;  %v8710_v48 = vpop.f32.mrb[194].mxu0  ;;  %v8621_v0 = vadd.f32 %v8620_v20, %v8619_v6  ;;  %v8622_v1 = vpop.f32.mrb[82].mxu1 }
 0x3aa   : > { %v8711_v3 = vpop.f32.mrb[195].mxu0  ;;  %v8623_v23 = vpop.f32.mrb[83].mxu1 }
 0x3ab   : > { %v12169_v14 = vadd.f32 %v8709_v40, %v12076_v10  ;;  %v8712_v17 = vadd.f32 %v8711_v3, %v8710_v48  ;;  %v12172_v51 = vadd.f32 %v8621_v0, %v11877_v44  ;;  %v8624_v9 = vadd.f32 %v8623_v23, %v8622_v1  ;;  %v3196_v10 = vld [vmem:[%s12641_s3 + $0x6b8] sm:$0xff] }
 0x3ac   : > { %6789 = vmatmul.mubr.bf16.gmra.mrb[44].mxu0 %v7597_v18  ;;  %6660 = vmatmul.mubr.bf16.gmra.mrb[188].mxu1 %v7659_v54  ;;  %v3204_v44 = vld [vmem:[%s12641_s3 + $0x6f8] sm:$0xff] }
 0x3ad   : > { %v12175_v4 = vadd.f32 %v8712_v17, %v12082_v21  ;;  %6796 = vmatprep.mubr.bf16.mxu0 %v7614_v24  ;;  %v12178_v63 = vadd.f32 %v8624_v9, %v11884_v11  ;;  %6812 = vmatprep.mubr.bf16.mxu1 %v7646_v34  ;;  %v3228_v21 = vld [vmem:[%s12641_s3 + $0x7b8] sm:$0xff]  ;;  %v7630_v33 = vcombine.high %v3196_v10, %v3204_v44 }
 0x3ae   : > { %v7662_v20 = vcombine.high %v3228_v21, %v3236_v59  ;;  %v7629_v1 = vcombine.low %v3196_v10, %v3204_v44 }
 0x3af   : > { %v8713_v41 = vpop.f32.mrb[196].mxu0  ;;  %v8625_v11 = vpop.f32.mrb[84].mxu1 }
 0x3b0   : > { %v8714_v43 = vpop.f32.mrb[197].mxu0  ;;  %v8626_v27 = vpop.f32.mrb[85].mxu1 }
 0x3b1   : > { %v8715_v26 = vadd.f32 %v8714_v43, %v8713_v41  ;;  %v8716_v37 = vpop.f32.mrb[198].mxu0  ;;  %v8627_v6 = vadd.f32 %v8626_v27, %v8625_v11  ;;  %v8628_v35 = vpop.f32.mrb[86].mxu1 }
 0x3b2   : > { %v8717_v18 = vpop.f32.mrb[199].mxu0  ;;  %v8629_v48 = vpop.f32.mrb[87].mxu1 }
 0x3b3   : > { %v12193_v40 = vadd.f32 %v8715_v26, %v12100_v49  ;;  %v8718_v54 = vadd.f32 %v8717_v18, %v8716_v37  ;;  %v12196_v24 = vadd.f32 %v8627_v6, %v11905_v31  ;;  %v8630_v0 = vadd.f32 %v8629_v48, %v8628_v35 }
 0x3b4   : > { %6797 = vmatmul.mubr.bf16.gmra.mrb[48].mxu0 %v7613_v45  ;;  %6813 = vmatmul.mubr.bf16.vlgmr.msra.gmra.mrb[192].mxu1 %v7645_v13  ;;  %v7661_v31 = vcombine.low %v3228_v21, %v3236_v59 }
 0x3b5   : > { %v12199_v22 = vadd.f32 %v8718_v54, %v12106_v38  ;;  %6804 = vmatprep.mubr.bf16.mxu0 %v7630_v33  ;;  %v12202_v8 = vadd.f32 %v8630_v0, %v11911_v56  ;;  %6820 = vmatprep.mubr.bf16.mxu1 %v7662_v20 }
 0x3b7   : > { %v8719_v12 = vpop.f32.mrb[200].mxu0  ;;  %v8631_v36 = vpop.f32.mrb[88].mxu1 }
 0x3b8   : > { %v8720_v49 = vpop.f32.mrb[201].mxu0  ;;  %v8632_v3 = vpop.f32.mrb[89].mxu1 }
 0x3b9   : > { %v8721_v34 = vadd.f32 %v8720_v49, %v8719_v12  ;;  %v8722_v23 = vpop.f32.mrb[202].mxu0  ;;  %v8633_v17 = vadd.f32 %v8632_v3, %v8631_v36  ;;  %v8634_v9 = vpop.f32.mrb[90].mxu1 }
 0x3ba   : > { %v8723_v41 = vpop.f32.mrb[203].mxu0  ;;  %v8635_v11 = vpop.f32.mrb[91].mxu1 }
 0x3bb   : > { %v12205_v38 = vadd.f32 %v8721_v34, %v12124_v39  ;;  %v8724_v43 = vadd.f32 %v8723_v41, %v8722_v23  ;;  %v12208_v56 = vadd.f32 %v8633_v17, %v11929_v47  ;;  %v8636_v45 = vadd.f32 %v8635_v11, %v8634_v9 }
 0x3bc   : > { %6805 = vmatmul.mubr.bf16.gmra.mrb[52].mxu0 %v7629_v1  ;;  %6821 = vmatmul.mubr.bf16.gmra.mrb[196].mxu1 %v7661_v31 }
 0x3bd   : > { %v12211_v27 = vadd.f32 %v8724_v43, %v12130_v55  ;;  %v12214_v10 = vadd.f32 %v8636_v45, %v11935_v46 }
 0x3bf   : > { %v8725_v44 = vpop.f32.mrb[204].mxu0  ;;  %v8637_v21 = vpop.f32.mrb[92].mxu1 }
 0x3c0   : > { %v8726_v59 = vpop.f32.mrb[205].mxu0  ;;  %v8638_v26 = vpop.f32.mrb[93].mxu1 }
 0x3c1   : > { %v8727_v39 = vadd.f32 %v8726_v59, %v8725_v44  ;;  %v8728_v37 = vpop.f32.mrb[206].mxu0  ;;  %v8639_v13 = vadd.f32 %v8638_v26, %v8637_v21  ;;  %v8640_v33 = vpop.f32.mrb[94].mxu1 }
 0x3c2   : > { %v8729_v6 = vpop.f32.mrb[207].mxu0  ;;  %v8641_v35 = vpop.f32.mrb[95].mxu1 }
 0x3c3   : > { %v12217_v47 = vadd.f32 %v8727_v39, %v12148_v16  ;;  %v8730_v18 = vadd.f32 %v8729_v6, %v8728_v37  ;;  %v6276_v55 = vadd.f32 %v8639_v13, %v11953_v28  ;;  %v8642_v20 = vadd.f32 %v8641_v35, %v8640_v33 }
 0x3c5   : > { %v12221_v46 = vadd.f32 %v8730_v18, %v12154_v7  ;;  %v12224_v48 = vadd.f32 %v8642_v20, %v11959_v42 }
 0x3c7   : > { %v8731_v54 = vpop.f32.mrb[208].mxu0  ;;  %v8643_v0 = vpop.f32.mrb[96].mxu1 }
 0x3c8   : > { %v8732_v12 = vpop.f32.mrb[209].mxu0  ;;  %v8644_v36 = vpop.f32.mrb[97].mxu1 }
 0x3c9   : > { %v8733_v49 = vadd.f32 %v8732_v12, %v8731_v54  ;;  %v8734_v1 = vpop.f32.mrb[210].mxu0  ;;  %v8645_v3 = vadd.f32 %v8644_v36, %v8643_v0  ;;  %v8646_v16 = vpop.f32.mrb[98].mxu1 }
 0x3ca   : > { %v8735_v34 = vpop.f32.mrb[211].mxu0  ;;  %v8647_v28 = vpop.f32.mrb[99].mxu1 }
 0x3cb   : > { %v12227_v23 = vadd.f32 %v8733_v49, %v12172_v51  ;;  %v8736_v31 = vadd.f32 %v8735_v34, %v8734_v1  ;;  %v6284_v7 = vadd.f32 %v8645_v3, %v11977_v30  ;;  %v8648_v17 = vadd.f32 %v8647_v28, %v8646_v16 }
 0x3cd   : > { %v12231_v42 = vadd.f32 %v8736_v31, %v12178_v63  ;;  %v12234_v9 = vadd.f32 %v8648_v17, %v11983_v19 }
 0x3cf   : > { %v8737_v41 = vpop.f32.mrb[212].mxu0  ;;  %v8649_v11 = vpop.f32.mrb[100].mxu1 }
 0x3d0   : > { %v8738_v43 = vpop.f32.mrb[213].mxu0  ;;  %v8650_v45 = vpop.f32.mrb[101].mxu1 }
 0x3d1   : > { %v8739_v44 = vadd.f32 %v8738_v43, %v8737_v41  ;;  %v8740_v21 = vpop.f32.mrb[214].mxu0  ;;  %v8651_v59 = vadd.f32 %v8650_v45, %v8649_v11  ;;  %v8652_v51 = vpop.f32.mrb[102].mxu1 }
 0x3d2   : > { %v8741_v26 = vpop.f32.mrb[215].mxu0  ;;  %v8653_v30 = vpop.f32.mrb[103].mxu1 }
 0x3d3   : > { %v12237_v39 = vadd.f32 %v8739_v44, %v12196_v24  ;;  %v8742_v37 = vadd.f32 %v8741_v26, %v8740_v21  ;;  %v6292_v63 = vadd.f32 %v8651_v59, %v12001_v58  ;;  %v8654_v13 = vadd.f32 %v8653_v30, %v8652_v51 }
 0x3d5   : > { %v12241_v19 = vadd.f32 %v8742_v37, %v12202_v8  ;;  %v12244_v33 = vadd.f32 %v8654_v13, %v12007_v50 }
 0x3d7   : > { %v8743_v6 = vpop.f32.mrb[216].mxu0  ;;  %v8655_v35 = vpop.f32.mrb[104].mxu1 }
 0x3d8   : > { %v8744_v18 = vpop.f32.mrb[217].mxu0  ;;  %v8656_v20 = vpop.f32.mrb[105].mxu1 }
 0x3d9   : > { %v8745_v54 = vadd.f32 %v8744_v18, %v8743_v6  ;;  %v8746_v0 = vpop.f32.mrb[218].mxu0  ;;  %v8657_v12 = vadd.f32 %v8656_v20, %v8655_v35  ;;  %v8658_v24 = vpop.f32.mrb[106].mxu1 }
 0x3da   : > { %v8747_v36 = vpop.f32.mrb[219].mxu0  ;;  %v8659_v58 = vpop.f32.mrb[107].mxu1 }
 0x3db   : > { %v12247_v49 = vadd.f32 %v8745_v54, %v12208_v56  ;;  %v8748_v1 = vadd.f32 %v8747_v36, %v8746_v0  ;;  %v6300_v8 = vadd.f32 %v8657_v12, %v12025_v25  ;;  %v8660_v3 = vadd.f32 %v8659_v58, %v8658_v24 }
 0x3dd   : > { %v12251_v50 = vadd.f32 %v8748_v1, %v12214_v10  ;;  %v12254_v16 = vadd.f32 %v8660_v3, %v12031_v52 }
 0x3df   : > { %v8749_v34 = vpop.f32.mrb[220].mxu0  ;;  %v8661_v28 = vpop.f32.mrb[108].mxu1 }
 0x3e0   : > { %v8750_v31 = vpop.f32.mrb[221].mxu0  ;;  %v8662_v17 = vpop.f32.mrb[109].mxu1 }
 0x3e1   : > { %v8751_v41 = vadd.f32 %v8750_v31, %v8749_v34  ;;  %v8752_v11 = vpop.f32.mrb[222].mxu0  ;;  %v8663_v43 = vadd.f32 %v8662_v17, %v8661_v28  ;;  %v8664_v56 = vpop.f32.mrb[110].mxu1 }
 0x3e2   : > { %v8753_v45 = vpop.f32.mrb[223].mxu0  ;;  %v8665_v21 = vpop.f32.mrb[111].mxu1 }
 0x3e3   : > { %v12256_v44 = vadd.f32 %v8751_v41, %v6276_v55  ;;  %v8754_v25 = vadd.f32 %v8753_v45, %v8752_v11  ;;  %v6308_v59 = vadd.f32 %v8663_v43, %v12049_v15  ;;  %v8666_v10 = vadd.f32 %v8665_v21, %v8664_v56 }
 0x3e5   : > { %v12260_v51 = vadd.f32 %v8754_v25, %v12224_v48  ;;  %v12263_v52 = vadd.f32 %v8666_v10, %v12055_v61 }
 0x3e7   : > { %v8755_v26 = vpop.f32.mrb[224].mxu0  ;;  %v8667_v30 = vpop.f32.mrb[112].mxu1 }
 0x3e8   : > { %v8756_v37 = vpop.f32.mrb[225].mxu0  ;;  %v8668_v13 = vpop.f32.mrb[113].mxu1 }
 0x3e9   : > { %v8757_v6 = vadd.f32 %v8756_v37, %v8755_v26  ;;  %v8758_v35 = vpop.f32.mrb[226].mxu0  ;;  %v8669_v18 = vadd.f32 %v8668_v13, %v8667_v30  ;;  %v8670_v55 = vpop.f32.mrb[114].mxu1 }
 0x3ea   : > { %v8759_v20 = vpop.f32.mrb[227].mxu0  ;;  %v8671_v0 = vpop.f32.mrb[115].mxu1 }
 0x3eb   : > { %v12265_v54 = vadd.f32 %v8757_v6, %v6284_v7  ;;  %v8760_v15 = vadd.f32 %v8759_v20, %v8758_v35  ;;  %v6316_v12 = vadd.f32 %v8669_v18, %v12073_v62  ;;  %v8672_v48 = vadd.f32 %v8671_v0, %v8670_v55 }
 0x3ed   : > { %v12269_v24 = vadd.f32 %v8760_v15, %v12234_v9  ;;  %v12272_v61 = vadd.f32 %v8672_v48, %v12079_v5 }
 0x3ef   : > { %v8761_v36 = vpop.f32.mrb[228].mxu0  ;;  %v8673_v58 = vpop.f32.mrb[116].mxu1 }
 0x3f0   : > { %v8762_v1 = vpop.f32.mrb[229].mxu0  ;;  %v8674_v3 = vpop.f32.mrb[117].mxu1 }
 0x3f1   : > { %v8763_v34 = vadd.f32 %v8762_v1, %v8761_v36  ;;  %v8764_v28 = vpop.f32.mrb[230].mxu0  ;;  %v8675_v31 = vadd.f32 %v8674_v3, %v8673_v58  ;;  %v8676_v7 = vpop.f32.mrb[118].mxu1 }
 0x3f2   : > { %v8765_v17 = vpop.f32.mrb[231].mxu0  ;;  %v8677_v11 = vpop.f32.mrb[119].mxu1 }
 0x3f3   : > { %v12274_v41 = vadd.f32 %v8763_v34, %v6292_v63  ;;  %v8766_v62 = vadd.f32 %v8765_v17, %v8764_v28  ;;  %v6324_v43 = vadd.f32 %v8675_v31, %v12097_v57  ;;  %v8678_v9 = vadd.f32 %v8677_v11, %v8676_v7 }
 0x3f5   : > { %v12278_v56 = vadd.f32 %v8766_v62, %v12244_v33  ;;  %v12281_v5 = vadd.f32 %v8678_v9, %v12103_v29 }
 0x3f7   : > { %v8767_v45 = vpop.f32.mrb[232].mxu0  ;;  %v8679_v21 = vpop.f32.mrb[120].mxu1 }
 0x3f8   : > { %v8768_v25 = vpop.f32.mrb[233].mxu0  ;;  %v8680_v10 = vpop.f32.mrb[121].mxu1 }
 0x3f9   : > { %v8769_v26 = vadd.f32 %v8768_v25, %v8767_v45  ;;  %v8770_v30 = vpop.f32.mrb[234].mxu0  ;;  %v8681_v37 = vadd.f32 %v8680_v10, %v8679_v21  ;;  %v8682_v63 = vpop.f32.mrb[122].mxu1 }
 0x3fa   : > { %v8771_v13 = vpop.f32.mrb[235].mxu0  ;;  %v8683_v35 = vpop.f32.mrb[123].mxu1 }
 0x3fb   : > { %v12283_v6 = vadd.f32 %v8769_v26, %v6300_v8  ;;  %v8772_v57 = vadd.f32 %v8771_v13, %v8770_v30  ;;  %v6332_v18 = vadd.f32 %v8681_v37, %v12121_v60  ;;  %v8684_v33 = vadd.f32 %v8683_v35, %v8682_v63 }
 0x3fd   : > { %v12287_v55 = vadd.f32 %v8772_v57, %v12254_v16  ;;  %v12290_v29 = vadd.f32 %v8684_v33, %v12127_v53 }
 0x3ff   : > { %v8773_v20 = vpop.f32.mrb[236].mxu0  ;;  %v8685_v0 = vpop.f32.mrb[124].mxu1 }
 0x400   : > { %v8774_v15 = vpop.f32.mrb[237].mxu0  ;;  %v8686_v48 = vpop.f32.mrb[125].mxu1 }
 0x401   : > { %v8775_v36 = vadd.f32 %v8774_v15, %v8773_v20  ;;  %v8776_v58 = vpop.f32.mrb[238].mxu0  ;;  %v8687_v1 = vadd.f32 %v8686_v48, %v8685_v0  ;;  %v8688_v8 = vpop.f32.mrb[126].mxu1 }
 0x402   : > { %v8777_v3 = vpop.f32.mrb[239].mxu0  ;;  %v8689_v28 = vpop.f32.mrb[127].mxu1 }
 0x403   : > { %v12292_v34 = vadd.f32 %v8775_v36, %v6308_v59  ;;  %v8778_v60 = vadd.f32 %v8777_v3, %v8776_v58  ;;  %v6340_v31 = vadd.f32 %v8687_v1, %v12145_v2  ;;  %v8690_v16 = vadd.f32 %v8689_v28, %v8688_v8 }
 0x405   : > { %v12296_v7 = vadd.f32 %v8778_v60, %v12263_v52  ;;  %v12299_v53 = vadd.f32 %v8690_v16, %v12151_v32 }
 0x407   : > { %v8779_v17 = vpop.f32.mrb[240].mxu0  ;;  %v8819_v11 = vpop.f32.mrb[128].mxu1 }
 0x408   : > { %v8780_v62 = vpop.f32.mrb[241].mxu0  ;;  %v8820_v45 = vpop.f32.mrb[129].mxu1 }
 0x409   : > { %v8781_v9 = vadd.f32 %v8780_v62, %v8779_v17  ;;  %v8782_v21 = vpop.f32.mrb[242].mxu0  ;;  %v8821_v25 = vadd.f32 %v8820_v45, %v8819_v11  ;;  %v8822_v59 = vpop.f32.mrb[130].mxu1 }
 0x40a   : > { %v8783_v10 = vpop.f32.mrb[243].mxu0  ;;  %v8823_v2 = vpop.f32.mrb[131].mxu1 }
 0x40b   : > { %v12301_v26 = vadd.f32 %v8781_v9, %v6316_v12  ;;  %v8784_v30 = vadd.f32 %v8783_v10, %v8782_v21  ;;  %v12304_v37 = vadd.f32 %v8821_v25, %v12169_v14  ;;  %v8824_v52 = vadd.f32 %v8823_v2, %v8822_v59 }
 0x40d   : > { %v12307_v32 = vadd.f32 %v8784_v30, %v12272_v61  ;;  %v12310_v63 = vadd.f32 %v8824_v52, %v12175_v4 }
 0x40f   : > { %v8785_v13 = vpop.f32.mrb[244].mxu0  ;;  %v8825_v35 = vpop.f32.mrb[132].mxu1 }
 0x410   : > { %v8786_v57 = vpop.f32.mrb[245].mxu0  ;;  %v8826_v20 = vpop.f32.mrb[133].mxu1 }
 0x411   : > { %v8787_v33 = vadd.f32 %v8786_v57, %v8785_v13  ;;  %v8788_v0 = vpop.f32.mrb[246].mxu0  ;;  %v8827_v12 = vadd.f32 %v8826_v20, %v8825_v35  ;;  %v8828_v15 = vpop.f32.mrb[134].mxu1 }
 0x412   : > { %v8789_v48 = vpop.f32.mrb[247].mxu0  ;;  %v8829_v58 = vpop.f32.mrb[135].mxu1 }
 0x413   : > { %v12312_v36 = vadd.f32 %v8787_v33, %v6324_v43  ;;  %v8790_v14 = vadd.f32 %v8789_v48, %v8788_v0  ;;  %v12315_v1 = vadd.f32 %v8827_v12, %v12193_v40  ;;  %v8830_v61 = vadd.f32 %v8829_v58, %v8828_v15 }
 0x415   : > { %v12318_v4 = vadd.f32 %v8790_v14, %v12281_v5  ;;  %v12321_v8 = vadd.f32 %v8830_v61, %v12199_v22 }
 0x417   : > { %v8791_v3 = vpop.f32.mrb[248].mxu0  ;;  %v8831_v28 = vpop.f32.mrb[136].mxu1 }
 0x418   : > { %v8792_v60 = vpop.f32.mrb[249].mxu0  ;;  %v8832_v17 = vpop.f32.mrb[137].mxu1 }
 0x419   : > { %v8793_v16 = vadd.f32 %v8792_v60, %v8791_v3  ;;  %v8794_v11 = vpop.f32.mrb[250].mxu0  ;;  %v8833_v43 = vadd.f32 %v8832_v17, %v8831_v28  ;;  %v8834_v62 = vpop.f32.mrb[138].mxu1 }
 0x41a   : > { %v8795_v9 = vpop.f32.mrb[251].mxu0  ;;  %v8835_v21 = vpop.f32.mrb[139].mxu1 }
 0x41b   : > { %v12323_v45 = vadd.f32 %v8793_v16, %v6332_v18  ;;  %v8796_v40 = vadd.f32 %v8795_v9, %v8794_v11  ;;  %v12326_v25 = vadd.f32 %v8833_v43, %v12205_v38  ;;  %v8836_v5 = vadd.f32 %v8835_v21, %v8834_v62 }
 0x41d   : > { %v12329_v22 = vadd.f32 %v8796_v40, %v12290_v29  ;;  %v12332_v59 = vadd.f32 %v8836_v5, %v12211_v27 }
 0x41f   : > { %v8797_v10 = vpop.f32.mrb[252].mxu0  ;;  %v8837_v30 = vpop.f32.mrb[140].mxu1 }
 0x420   : > { %v8798_v2 = vpop.f32.mrb[253].mxu0  ;;  %v8838_v13 = vpop.f32.mrb[141].mxu1 }
 0x421   : > { %v8799_v52 = vadd.f32 %v8798_v2, %v8797_v10  ;;  %v8800_v35 = vpop.f32.mrb[254].mxu0  ;;  %v8839_v18 = vadd.f32 %v8838_v13, %v8837_v30  ;;  %v8840_v57 = vpop.f32.mrb[142].mxu1 }
 0x422   : > { %v8801_v33 = vpop.f32.mrb[255].mxu0  ;;  %v8841_v0 = vpop.f32.mrb[143].mxu1 }
 0x423   : > { %v12334_v20 = vadd.f32 %v8799_v52, %v6340_v31  ;;  %v8802_v38 = vadd.f32 %v8801_v33, %v8800_v35  ;;  %v12337_v12 = vadd.f32 %v8839_v18, %v12217_v47  ;;  %v8842_v29 = vadd.f32 %v8841_v0, %v8840_v57 }
 0x425   : > { %v12340_v27 = vadd.f32 %v8802_v38, %v12299_v53  ;;  %v12343_v15 = vadd.f32 %v8842_v29, %v12221_v46 }
 0x427   : > { %v8931_v48 = vpop.f32.mrb[0].mxu0  ;;  %v8843_v14 = vpop.f32.mrb[144].mxu1 }
 0x428   : > { %v8932_v58 = vpop.f32.mrb[1].mxu0  ;;  %v8844_v61 = vpop.f32.mrb[145].mxu1 }
 0x429   : > { %v8933_v3 = vadd.f32 %v8932_v58, %v8931_v48  ;;  %v8934_v28 = vpop.f32.mrb[2].mxu0  ;;  %v8845_v31 = vadd.f32 %v8844_v61, %v8843_v14  ;;  %v8846_v60 = vpop.f32.mrb[146].mxu1 }
 0x42a   : > { %v8935_v16 = vpop.f32.mrb[3].mxu0  ;;  %v8847_v17 = vpop.f32.mrb[147].mxu1 }
 0x42b   : > { %v8936_v47 = vadd.f32 %v8935_v16, %v8934_v28  ;;  %v6703_v11 = vadd.f32 %v8933_v3, %v12304_v37  ;;  %v12347_v53 = vadd.f32 %v8845_v31, %v12227_v23  ;;  %v8848_v43 = vadd.f32 %v8847_v17, %v8846_v60 }
 0x42d   : > { %v6830_v46 = vsel %vm6829_vm1, %v6703_v11, 0.0  ;;  %v6706_v62 = vadd.f32 %v8936_v47, %v12310_v63  ;;  %v12352_v9 = vadd.f32 %v8848_v43, %v12231_v42 }
 0x42e   : > { %6831 = vadd.xlane.f32.xlu0 %v6830_v46 }
 0x42f   : > { %v8937_v40 = vpop.f32.mrb[4].mxu0  ;;  %v8849_v21 = vpop.f32.mrb[148].mxu1  ;;  %v6833_v37 = vsel %vm6829_vm1, %v6706_v62, 0.0 }
 0x430   : > { %v8938_v5 = vpop.f32.mrb[5].mxu0  ;;  %v8850_v10 = vpop.f32.mrb[149].mxu1 }
 0x431   : > { %v8939_v30 = vadd.f32 %v8938_v5, %v8937_v40  ;;  %v8940_v2 = vpop.f32.mrb[6].mxu0  ;;  %v8851_v52 = vadd.f32 %v8850_v10, %v8849_v21  ;;  %v8852_v23 = vpop.f32.mrb[150].mxu1 }
 0x432   : > { %v8941_v13 = vpop.f32.mrb[7].mxu0  ;;  %6834 = vadd.xlane.f32.xlu0 %v6833_v37  ;;  %v8853_v35 = vpop.f32.mrb[151].mxu1 }
 0x433   : > { %v8942_v18 = vadd.f32 %v8941_v13, %v8940_v2  ;;  %v6711_v63 = vadd.f32 %v8939_v30, %v12315_v1  ;;  %v12357_v42 = vadd.f32 %v8851_v52, %v12237_v39  ;;  %v8854_v57 = vadd.f32 %v8853_v35, %v8852_v23 }
 0x435   : > { %v6836_v33 = vsel %vm6829_vm1, %v6711_v63, 0.0  ;;  %v6714_v38 = vadd.f32 %v8942_v18, %v12321_v8  ;;  %v12362_v0 = vadd.f32 %v8854_v57, %v12241_v19 }
 0x436   : > { %6837 = vadd.xlane.f32.xlu1 %v6836_v33 }
 0x437   : > { %v8943_v29 = vpop.f32.mrb[8].mxu0  ;;  %v8855_v48 = vpop.f32.mrb[152].mxu1  ;;  %v6839_v1 = vsel %vm6829_vm1, %v6714_v38, 0.0 }
 0x438   : > { %v8944_v14 = vpop.f32.mrb[9].mxu0  ;;  %v8856_v58 = vpop.f32.mrb[153].mxu1 }
 0x439   : > { %v8945_v61 = vadd.f32 %v8944_v14, %v8943_v29  ;;  %v8946_v3 = vpop.f32.mrb[10].mxu0  ;;  %v8857_v28 = vadd.f32 %v8856_v58, %v8855_v48  ;;  %v8858_v39 = vpop.f32.mrb[154].mxu1 }
 0x43a   : > { %v8947_v31 = vpop.f32.mrb[11].mxu0  ;;  %6840 = vadd.xlane.f32.xlu1 %v6839_v1  ;;  %v8859_v60 = vpop.f32.mrb[155].mxu1 }
 0x43b   : > { %v8948_v16 = vadd.f32 %v8947_v31, %v8946_v3  ;;  %v6719_v8 = vadd.f32 %v8945_v61, %v12326_v25  ;;  %v12367_v19 = vadd.f32 %v8857_v28, %v12247_v49  ;;  %v8860_v17 = vadd.f32 %v8859_v60, %v8858_v39 }
 0x43d   : > { %v6842_v47 = vsel %vm6829_vm1, %v6719_v8, 0.0  ;;  %v6722_v11 = vadd.f32 %v8948_v16, %v12332_v59  ;;  %v12372_v43 = vadd.f32 %v8860_v17, %v12251_v50 }
 0x43e   : > { %6843 = vadd.xlane.f32.xlu0 %v6842_v47 }
 0x43f   : > { %v8949_v46 = vpop.f32.mrb[12].mxu0  ;;  %v6845_v62 = vsel %vm6829_vm1, %v6722_v11, 0.0  ;;  %v8861_v40 = vpop.f32.mrb[156].mxu1 }
 0x440   : > { %v8950_v21 = vpop.f32.mrb[13].mxu0  ;;  %6846 = vadd.xlane.f32.xlu1 %v6845_v62  ;;  %v8862_v5 = vpop.f32.mrb[157].mxu1 }
 0x441   : > { %v8951_v25 = vadd.f32 %v8950_v21, %v8949_v46  ;;  %v8952_v10 = vpop.f32.mrb[14].mxu0  ;;  %v8863_v49 = vadd.f32 %v8862_v5, %v8861_v40  ;;  %v8864_v30 = vpop.f32.mrb[158].mxu1 }
 0x442   : > { %v8953_v2 = vpop.f32.mrb[15].mxu0  ;;  %v8865_v37 = vpop.f32.mrb[159].mxu1 }
 0x443   : > { %v8954_v52 = vadd.f32 %v8953_v2, %v8952_v10  ;;  %v6727_v59 = vadd.f32 %v8951_v25, %v12337_v12  ;;  %v12377_v50 = vadd.f32 %v8863_v49, %v12256_v44  ;;  %v8866_v23 = vadd.f32 %v8865_v37, %v8864_v30 }
 0x445   : > { %v6848_v13 = vsel %vm6829_vm1, %v6727_v59, 0.0  ;;  %v6730_v35 = vadd.f32 %v8954_v52, %v12343_v15  ;;  %v12382_v18 = vadd.f32 %v8866_v23, %v12260_v51 }
 0x446   : > { %6849 = vadd.xlane.f32.xlu0 %v6848_v13 }
 0x447   : > { %v8955_v63 = vpop.f32.mrb[16].mxu0  ;;  %v6851_v57 = vsel %vm6829_vm1, %v6730_v35, 0.0  ;;  %v8867_v33 = vpop.f32.mrb[160].mxu1 }
 0x448   : > { %v8956_v38 = vpop.f32.mrb[17].mxu0  ;;  %6852 = vadd.xlane.f32.xlu1 %v6851_v57  ;;  %v8868_v29 = vpop.f32.mrb[161].mxu1 }
 0x449   : > { %v8957_v12 = vadd.f32 %v8956_v38, %v8955_v63  ;;  %v8958_v48 = vpop.f32.mrb[18].mxu0  ;;  %v8869_v44 = vadd.f32 %v8868_v29, %v8867_v33  ;;  %v8870_v14 = vpop.f32.mrb[162].mxu1 }
 0x44a   : > { %v8959_v58 = vpop.f32.mrb[19].mxu0  ;;  %v8871_v61 = vpop.f32.mrb[163].mxu1 }
 0x44b   : > { %v8960_v3 = vadd.f32 %v8959_v58, %v8958_v48  ;;  %v6735_v15 = vadd.f32 %v8957_v12, %v12347_v53  ;;  %v12387_v51 = vadd.f32 %v8869_v44, %v12265_v54  ;;  %v8872_v1 = vadd.f32 %v8871_v61, %v8870_v14 }
 0x44d   : > { %v6854_v28 = vsel %vm6829_vm1, %v6735_v15, 0.0  ;;  %v6738_v39 = vadd.f32 %v8960_v3, %v12352_v9  ;;  %v12392_v31 = vadd.f32 %v8872_v1, %v12269_v24 }
 0x44e   : > { %6855 = vadd.xlane.f32.xlu0 %v6854_v28 }
 0x44f   : > { %v8961_v60 = vpop.f32.mrb[20].mxu0  ;;  %v6857_v16 = vsel %vm6829_vm1, %v6738_v39, 0.0  ;;  %v8873_v8 = vpop.f32.mrb[164].mxu1 }
 0x450   : > { %v8962_v17 = vpop.f32.mrb[21].mxu0  ;;  %6858 = vadd.xlane.f32.xlu1 %v6857_v16  ;;  %v8874_v47 = vpop.f32.mrb[165].mxu1 }
 0x451   : > { %v8963_v53 = vadd.f32 %v8962_v17, %v8961_v60  ;;  %v8964_v11 = vpop.f32.mrb[22].mxu0  ;;  %v8875_v54 = vadd.f32 %v8874_v47, %v8873_v8  ;;  %v8876_v46 = vpop.f32.mrb[166].mxu1 }
 0x452   : > { %v8965_v62 = vpop.f32.mrb[23].mxu0  ;;  %v8877_v40 = vpop.f32.mrb[167].mxu1 }
 0x453   : > { %v8966_v21 = vadd.f32 %v8965_v62, %v8964_v11  ;;  %v6743_v9 = vadd.f32 %v8963_v53, %v12357_v42  ;;  %v12397_v24 = vadd.f32 %v8875_v54, %v12274_v41  ;;  %v8878_v5 = vadd.f32 %v8877_v40, %v8876_v46 }
 0x455   : > { %v6860_v25 = vsel %vm6829_vm1, %v6743_v9, 0.0  ;;  %v6746_v10 = vadd.f32 %v8966_v21, %v12362_v0  ;;  %v12402_v49 = vadd.f32 %v8878_v5, %v12278_v56 }
 0x456   : > { %6861 = vadd.xlane.f32.xlu0 %v6860_v25 }
 0x457   : > { %v8967_v30 = vpop.f32.mrb[24].mxu0  ;;  %v6863_v2 = vsel %vm6829_vm1, %v6746_v10, 0.0  ;;  %v8879_v37 = vpop.f32.mrb[168].mxu1 }
 0x458   : > { %v8968_v52 = vpop.f32.mrb[25].mxu0  ;;  %6864 = vadd.xlane.f32.xlu1 %v6863_v2  ;;  %v8880_v59 = vpop.f32.mrb[169].mxu1 }
 0x459   : > { %v8969_v42 = vadd.f32 %v8968_v52, %v8967_v30  ;;  %v8970_v23 = vpop.f32.mrb[26].mxu0  ;;  %v8881_v41 = vadd.f32 %v8880_v59, %v8879_v37  ;;  %v8882_v13 = vpop.f32.mrb[170].mxu1 }
 0x45a   : > { %v8971_v35 = vpop.f32.mrb[27].mxu0  ;;  %v8883_v63 = vpop.f32.mrb[171].mxu1 }
 0x45b   : > { %v8972_v57 = vadd.f32 %v8971_v35, %v8970_v23  ;;  %v6751_v0 = vadd.f32 %v8969_v42, %v12367_v19  ;;  %v12407_v56 = vadd.f32 %v8881_v41, %v12283_v6  ;;  %v8884_v33 = vadd.f32 %v8883_v63, %v8882_v13 }
 0x45d   : > { %v6866_v38 = vsel %vm6829_vm1, %v6751_v0, 0.0  ;;  %v6754_v29 = vadd.f32 %v8972_v57, %v12372_v43  ;;  %v12412_v12 = vadd.f32 %v8884_v33, %v12287_v55 }
 0x45e   : > { %6867 = vadd.xlane.f32.xlu0 %v6866_v38 }
 0x45f   : > { %v8973_v48 = vpop.f32.mrb[28].mxu0  ;;  %v6869_v44 = vsel %vm6829_vm1, %v6754_v29, 0.0  ;;  %v8885_v14 = vpop.f32.mrb[172].mxu1 }
 0x460   : > { %v8974_v58 = vpop.f32.mrb[29].mxu0  ;;  %6870 = vadd.xlane.f32.xlu1 %v6869_v44  ;;  %v8886_v61 = vpop.f32.mrb[173].mxu1 }
 0x461   : > { %v8975_v19 = vadd.f32 %v8974_v58, %v8973_v48  ;;  %v8976_v3 = vpop.f32.mrb[30].mxu0  ;;  %v8887_v6 = vadd.f32 %v8886_v61, %v8885_v14  ;;  %v8888_v15 = vpop.f32.mrb[174].mxu1 }
 0x462   : > { %v8977_v1 = vpop.f32.mrb[31].mxu0  ;;  %v8889_v28 = vpop.f32.mrb[175].mxu1 }
 0x463   : > { %v8978_v39 = vadd.f32 %v8977_v1, %v8976_v3  ;;  %v6759_v43 = vadd.f32 %v8975_v19, %v12377_v50  ;;  %v12417_v55 = vadd.f32 %v8887_v6, %v12292_v34  ;;  %v8890_v60 = vadd.f32 %v8889_v28, %v8888_v15 }
 0x465   : > { %v6872_v16 = vsel %vm6829_vm1, %v6759_v43, 0.0  ;;  %v6762_v8 = vadd.f32 %v8978_v39, %v12382_v18  ;;  %v12422_v17 = vadd.f32 %v8890_v60, %v12296_v7 }
 0x466   : > { %6873 = vadd.xlane.f32.xlu0 %v6872_v16 }
 0x467   : > { %v8979_v47 = vpop.f32.mrb[32].mxu0  ;;  %v6875_v53 = vsel %vm6829_vm1, %v6762_v8, 0.0  ;;  %v8891_v11 = vpop.f32.mrb[176].mxu1 }
 0x468   : > { %v8980_v54 = vpop.f32.mrb[33].mxu0  ;;  %6876 = vadd.xlane.f32.xlu1 %v6875_v53  ;;  %v8892_v46 = vpop.f32.mrb[177].mxu1 }
 0x469   : > { %v8981_v50 = vadd.f32 %v8980_v54, %v8979_v47  ;;  %v8982_v62 = vpop.f32.mrb[34].mxu0  ;;  %v8893_v34 = vadd.f32 %v8892_v46, %v8891_v11  ;;  %v8894_v40 = vpop.f32.mrb[178].mxu1 }
 0x46a   : > { %v8983_v21 = vpop.f32.mrb[35].mxu0  ;;  %v8895_v9 = vpop.f32.mrb[179].mxu1 }
 0x46b   : > { %v8984_v5 = vadd.f32 %v8983_v21, %v8982_v62  ;;  %v6767_v18 = vadd.f32 %v8981_v50, %v12387_v51  ;;  %v12427_v7 = vadd.f32 %v8893_v34, %v12301_v26  ;;  %v8896_v25 = vadd.f32 %v8895_v9, %v8894_v40 }
 0x46d   : > { %v6878_v10 = vsel %vm6829_vm1, %v6767_v18, 0.0  ;;  %v6770_v30 = vadd.f32 %v8984_v5, %v12392_v31  ;;  %v12432_v2 = vadd.f32 %v8896_v25, %v12307_v32 }
 0x46e   : > { %6879 = vadd.xlane.f32.xlu0 %v6878_v10 }
 0x46f   : > { %v8985_v37 = vpop.f32.mrb[36].mxu0  ;;  %v6881_v52 = vsel %vm6829_vm1, %v6770_v30, 0.0  ;;  %v8897_v59 = vpop.f32.mrb[180].mxu1 }
 0x470   : > { %v8986_v42 = vpop.f32.mrb[37].mxu0  ;;  %6882 = vadd.xlane.f32.xlu1 %v6881_v52  ;;  %v8898_v23 = vpop.f32.mrb[181].mxu1 }
 0x471   : > { %v8987_v51 = vadd.f32 %v8986_v42, %v8985_v37  ;;  %v8988_v41 = vpop.f32.mrb[38].mxu0  ;;  %v8899_v26 = vadd.f32 %v8898_v23, %v8897_v59  ;;  %v8900_v13 = vpop.f32.mrb[182].mxu1 }
 0x472   : > { %v8989_v35 = vpop.f32.mrb[39].mxu0  ;;  %v8901_v63 = vpop.f32.mrb[183].mxu1 }
 0x473   : > { %v8990_v57 = vadd.f32 %v8989_v35, %v8988_v41  ;;  %v6775_v31 = vadd.f32 %v8987_v51, %v12397_v24  ;;  %v12437_v32 = vadd.f32 %v8899_v26, %v12312_v36  ;;  %v8902_v0 = vadd.f32 %v8901_v63, %v8900_v13 }
 0x475   : > { %v6884_v33 = vsel %vm6829_vm1, %v6775_v31, 0.0  ;;  %v6778_v38 = vadd.f32 %v8990_v57, %v12402_v49  ;;  %v12442_v29 = vadd.f32 %v8902_v0, %v12318_v4 }
 0x476   : > { %6885 = vadd.xlane.f32.xlu0 %v6884_v33 }
 0x477   : > { %v8991_v48 = vpop.f32.mrb[40].mxu0  ;;  %v6887_v44 = vsel %vm6829_vm1, %v6778_v38, 0.0  ;;  %v8903_v14 = vpop.f32.mrb[184].mxu1 }
 0x478   : > { %v8992_v58 = vpop.f32.mrb[41].mxu0  ;;  %6888 = vadd.xlane.f32.xlu1 %v6887_v44  ;;  %v8904_v61 = vpop.f32.mrb[185].mxu1 }
 0x479   : > { %v8993_v24 = vadd.f32 %v8992_v58, %v8991_v48  ;;  %v8994_v19 = vpop.f32.mrb[42].mxu0  ;;  %v8905_v36 = vadd.f32 %v8904_v61, %v8903_v14  ;;  %v8906_v3 = vpop.f32.mrb[186].mxu1 }
 0x47a   : > { %v8995_v6 = vpop.f32.mrb[43].mxu0  ;;  %v8907_v15 = vpop.f32.mrb[187].mxu1 }
 0x47b   : > { %v8996_v1 = vadd.f32 %v8995_v6, %v8994_v19  ;;  %v6783_v49 = vadd.f32 %v8993_v24, %v12407_v56  ;;  %v6654_v4 = vadd.f32 %v8905_v36, %v12323_v45  ;;  %v8908_v28 = vadd.f32 %v8907_v15, %v8906_v3 }
 0x47d   : > { %v6890_v39 = vsel %vm6829_vm1, %v6783_v49, 0.0  ;;  %v6786_v43 = vadd.f32 %v8996_v1, %v12412_v12  ;;  %v6657_v60 = vadd.f32 %v8908_v28, %v12329_v22 }
 0x47e   : > { %6891 = vadd.xlane.f32.xlu0 %v6890_v39 }
 0x47f   : > { %v8997_v16 = vpop.f32.mrb[44].mxu0  ;;  %v6893_v8 = vsel %vm6829_vm1, %v6786_v43, 0.0  ;;  %v8909_v47 = vpop.f32.mrb[188].mxu1 }
 0x480   : > { %v8998_v53 = vpop.f32.mrb[45].mxu0  ;;  %6894 = vadd.xlane.f32.xlu1 %v6893_v8  ;;  %v8910_v11 = vpop.f32.mrb[189].mxu1 }
 0x481   : > { %v8999_v54 = vadd.f32 %v8998_v53, %v8997_v16  ;;  %v9000_v46 = vpop.f32.mrb[46].mxu0  ;;  %v8911_v56 = vadd.f32 %v8910_v11, %v8909_v47  ;;  %v8912_v50 = vpop.f32.mrb[190].mxu1  ;;  %v6961_v53 = vld [vmem:[%s12642_s4 + $0x10] sm:$0xff] }
 0x482   : > { %v9001_v45 = vpop.f32.mrb[47].mxu0  ;;  %v8913_v62 = vpop.f32.mrb[191].mxu1 }
 0x483   : > { %v9002_v34 = vadd.f32 %v9001_v45, %v9000_v46  ;;  %v6791_v40 = vadd.f32 %v8999_v54, %v12417_v55  ;;  %v6662_v12 = vadd.f32 %v8911_v56, %v12334_v20  ;;  %v8914_v22 = vadd.f32 %v8913_v62, %v8912_v50  ;;  %v6962_v56 = vld [vmem:[%s12642_s4 + $0x18] sm:$0xff] }
 0x485   : > { %v6896_v21 = vsel %vm6829_vm1, %v6791_v40, 0.0  ;;  %v6794_v9 = vadd.f32 %v9002_v34, %v12422_v17  ;;  %v6665_v5 = vadd.f32 %v8914_v22, %v12340_v27  ;;  %v6963_v34 = vld [vmem:[%s12642_s4 + $0x20] sm:$0xff]  ;;  %v6964_v22 = vld [vmem:[%s12642_s4 + $0x28] sm:$0xff] }
 0x486   : > { %6897 = vadd.xlane.f32.xlu0 %v6896_v21 }
 0x487   : > { %v9003_v18 = vpop.f32.mrb[48].mxu0  ;;  %v6899_v25 = vsel %vm6829_vm1, %v6794_v9, 0.0  ;;  %v9015_v10 = vpop.f32.mrb[192].mxu1 }
 0x488   : > { %v9004_v30 = vpop.f32.mrb[49].mxu0  ;;  %6900 = vadd.xlane.f32.xlu1 %v6899_v25  ;;  %v9016_v52 = vpop.f32.mrb[193].mxu1  ;;  %v6965_v25 = vld [vmem:[%s12642_s4 + $0x30] sm:$0xff] }
 0x489   : > { %v9005_v37 = vadd.f32 %v9004_v30, %v9003_v18  ;;  %v9006_v59 = vpop.f32.mrb[50].mxu0  ;;  %v9017_v55 = vadd.f32 %v9016_v52, %v9015_v10  ;;  %v9018_v42 = vpop.f32.mrb[194].mxu1 }
 0x48a   : > { %v9007_v20 = vpop.f32.mrb[51].mxu0  ;;  %v9019_v51 = vpop.f32.mrb[195].mxu1 }
 0x48b   : > { %v9008_v23 = vadd.f32 %v9007_v20, %v9006_v59  ;;  %v6799_v41 = vadd.f32 %v9005_v37, %v12427_v7  ;;  %v9020_v17 = vadd.f32 %v9019_v51, %v9018_v42  ;;  %v6815_v26 = vadd.f32 %v9017_v55, %v6654_v4  ;;  %v6966_v37 = vld [vmem:[%s12642_s4 + $0x38] sm:$0xff]  ;;  %v6967_v20 = vld [vmem:[%s12642_s4 + $0x40] sm:$0xff] }
 0x48d   : > { %v6902_v27 = vsel %vm6829_vm1, %v6799_v41, 0.0  ;;  %v6802_v13 = vadd.f32 %v9008_v23, %v12432_v2  ;;  %v6818_v35 = vadd.f32 %v9020_v17, %v6657_v60  ;;  %v6914_v44 = vsel %vm6829_vm1, %v6815_v26, 0.0  ;;  %v6960_v60 = vld [vmem:[%s12642_s4 + $0x8] sm:$0xff] }
 0x48e   : > { %6903 = vadd.xlane.f32.xlu0 %v6902_v27  ;;  %v6968_v41 = vld [vmem:[%s12642_s4 + $0x48] sm:$0xff] }
 0x48f   : > { %v9009_v63 = vpop.f32.mrb[52].mxu0  ;;  %v6905_v57 = vsel %vm6829_vm1, %v6802_v13, 0.0  ;;  %v9021_v31 = vpop.f32.mrb[196].mxu1  ;;  %v6917_v2 = vsel %vm6829_vm1, %v6818_v35, 0.0  ;;  %v6969_v35 = vld [vmem:[%s12642_s4 + $0x50] sm:$0xff] }
 0x490   : > { %v9010_v0 = vpop.f32.mrb[53].mxu0  ;;  %6906 = vadd.xlane.f32.xlu1 %v6905_v57  ;;  %v9022_v38 = vpop.f32.mrb[197].mxu1 }
 0x491   : > { %v9011_v33 = vadd.f32 %v9010_v0, %v9009_v63  ;;  %v9012_v48 = vpop.f32.mrb[54].mxu0  ;;  %v9023_v7 = vadd.f32 %v9022_v38, %v9021_v31  ;;  %v9024_v14 = vpop.f32.mrb[198].mxu1  ;;  %v6970_v31 = vld [vmem:[%s12642_s4 + $0x58] sm:$0xff] }
 0x492   : > { %v9013_v58 = vpop.f32.mrb[55].mxu0  ;;  %6915 = vadd.xlane.f32.xlu0 %v6914_v44  ;;  %v9025_v24 = vpop.f32.mrb[199].mxu1  ;;  %v6971_v44 = vld [vmem:[%s12642_s4 + $0x60] sm:$0xff] }
 0x493   : > { %v9014_v61 = vadd.f32 %v9013_v58, %v9012_v48  ;;  %v6807_v19 = vadd.f32 %v9011_v33, %v12437_v32  ;;  %v9026_v36 = vadd.f32 %v9025_v24, %v9024_v14  ;;  %v6823_v3 = vadd.f32 %v9023_v7, %v6662_v12  ;;  %v6959_v32 = vld [vmem:[%s12642_s4] sm:$0xff]  ;;  %v6972_v58 = vld [vmem:[%s12642_s4 + $0x68] sm:$0xff] }
 0x494   : > { %6918 = vadd.xlane.f32.xlu1 %v6917_v2 }
 0x495   : > { %v6908_v6 = vsel %vm6829_vm1, %v6807_v19, 0.0  ;;  %v6810_v15 = vadd.f32 %v9014_v61, %v12442_v29  ;;  %v6826_v1 = vadd.f32 %v9026_v36, %v6665_v5  ;;  %v6920_v4 = vsel %vm6829_vm1, %v6823_v3, 0.0  ;;  %v6973_v36 = vld [vmem:[%s12642_s4 + $0x70] sm:$0xff] }
 0x496   : > { %6909 = vadd.xlane.f32.xlu0 %v6908_v6 }
 0x497   : > { %v6911_v49 = vsel %vm6829_vm1, %v6810_v15, 0.0  ;;  %v6923_v28 = vsel %vm6829_vm1, %v6826_v1, 0.0  ;;  %v6974_v15 = vld [vmem:[%s12642_s4 + $0x78] sm:$0xff] }
 0x498   : > { %6912 = vadd.xlane.f32.xlu1 %v6911_v49 }
 0x49a   : > { %6921 = vadd.xlane.f32.xlu0 %v6920_v4 }
 0x49c   : > { %6924 = vadd.xlane.f32.xlu1 %v6923_v28 }
 0x4bb   : > { %v6832_v39 = vpop.xlane.xlu0 %6831 }
 0x4bc   : > { %v6927_v43 = vmul.f32 0.015625, %v6832_v39 }
 0x4be   : > { %v6991_v29 = vadd.f32 %v6959_v32, %v6927_v43  ;;  %v6975_v32 = vld [vmem:[%s12642_s4 + $0x80] sm:$0xff] }
 0x4bf   : > { %v6835_v16 = vpop.xlane.xlu0 %6834 }
 0x4c0   : > { %7024 = vst.msk [vmem:[%s12476_s29] sm:$0xff] %vm7023_vm2, %v6991_v29  ;;  %v6928_v8 = vmul.f32 0.015625, %v6835_v16  ;;  %v6976_v29 = vld [vmem:[%s12642_s4 + $0x88] sm:$0xff] }
 0x4c2   : > { %v6992_v47 = vadd.f32 %v6960_v60, %v6928_v8 }
 0x4c3   : > { %v6838_v11 = vpop.xlane.xlu1 %6837 }
 0x4c4   : > { %7025 = vst.msk [vmem:[%s12476_s29 + $0x8] sm:$0xff] %vm7023_vm2, %v6992_v47  ;;  %v6929_v54 = vmul.f32 0.015625, %v6838_v11 }
 0x4c6   : > { %v6993_v46 = vadd.f32 %v6961_v53, %v6929_v54  ;;  %v6977_v53 = vld [vmem:[%s12642_s4 + $0x90] sm:$0xff] }
 0x4c7   : > { %v6841_v50 = vpop.xlane.xlu1 %6840 }
 0x4c8   : > { %7026 = vst.msk [vmem:[%s12476_s29 + $0x10] sm:$0xff] %vm7023_vm2, %v6993_v46  ;;  %v6930_v45 = vmul.f32 0.015625, %v6841_v50  ;;  %v6978_v46 = vld [vmem:[%s12642_s4 + $0x98] sm:$0xff] }
 0x4ca   : > { %v6994_v62 = vadd.f32 %v6962_v56, %v6930_v45 }
 0x4cb   : > { %v6844_v40 = vpop.xlane.xlu0 %6843 }
 0x4cc   : > { %7027 = vst.msk [vmem:[%s12476_s29 + $0x18] sm:$0xff] %vm7023_vm2, %v6994_v62  ;;  %v6931_v12 = vmul.f32 0.015625, %v6844_v40 }
 0x4cd   : > { %v6847_v21 = vpop.xlane.xlu1 %6846 }
 0x4ce   : > { %v6995_v9 = vadd.f32 %v6963_v34, %v6931_v12  ;;  %v6932_v5 = vmul.f32 0.015625, %v6847_v21  ;;  %v6979_v34 = vld [vmem:[%s12642_s4 + $0xa0] sm:$0xff] }
 0x4d0   : > { %7028 = vst.msk [vmem:[%s12476_s29 + $0x20] sm:$0xff] %vm7023_vm2, %v6995_v9  ;;  %v6996_v18 = vadd.f32 %v6964_v22, %v6932_v5  ;;  %v6980_v22 = vld [vmem:[%s12642_s4 + $0xa8] sm:$0xff] }
 0x4d2   : > { %7029 = vst.msk [vmem:[%s12476_s29 + $0x28] sm:$0xff] %vm7023_vm2, %v6996_v18 }
 0x4d3   : > { %v6850_v10 = vpop.xlane.xlu0 %6849 }
 0x4d4   : > { %v6933_v30 = vmul.f32 0.015625, %v6850_v10 }
 0x4d5   : > { %v6853_v52 = vpop.xlane.xlu1 %6852 }
 0x4d6   : > { %v6997_v59 = vadd.f32 %v6965_v25, %v6933_v30  ;;  %v6934_v55 = vmul.f32 0.015625, %v6853_v52  ;;  %v6981_v25 = vld [vmem:[%s12642_s4 + $0xb0] sm:$0xff] }
 0x4d8   : > { %7030 = vst.msk [vmem:[%s12476_s29 + $0x30] sm:$0xff] %vm7023_vm2, %v6997_v59  ;;  %v6998_v42 = vadd.f32 %v6966_v37, %v6934_v55  ;;  %v6982_v37 = vld [vmem:[%s12642_s4 + $0xb8] sm:$0xff] }
 0x4da   : > { %7031 = vst.msk [vmem:[%s12476_s29 + $0x38] sm:$0xff] %vm7023_vm2, %v6998_v42 }
 0x4db   : > { %v6856_v23 = vpop.xlane.xlu0 %6855 }
 0x4dc   : > { %v6935_v51 = vmul.f32 0.015625, %v6856_v23 }
 0x4dd   : > { %v6859_v17 = vpop.xlane.xlu1 %6858 }
 0x4de   : > { %v6999_v26 = vadd.f32 %v6967_v20, %v6935_v51  ;;  %v6936_v27 = vmul.f32 0.015625, %v6859_v17  ;;  %v6983_v20 = vld [vmem:[%s12642_s4 + $0xc0] sm:$0xff] }
 0x4e0   : > { %7032 = vst.msk [vmem:[%s12476_s29 + $0x40] sm:$0xff] %vm7023_vm2, %v6999_v26  ;;  %v7000_v13 = vadd.f32 %v6968_v41, %v6936_v27  ;;  %v6984_v41 = vld [vmem:[%s12642_s4 + $0xc8] sm:$0xff] }
 0x4e2   : > { %7033 = vst.msk [vmem:[%s12476_s29 + $0x48] sm:$0xff] %vm7023_vm2, %v7000_v13  ;;  %v6987_v13 = vld [vmem:[%s12642_s4 + $0xe0] sm:$0xff] }
 0x4e3   : > { %v6862_v63 = vpop.xlane.xlu0 %6861 }
 0x4e4   : > { %v6937_v57 = vmul.f32 0.015625, %v6862_v63 }
 0x4e5   : > { %v6865_v0 = vpop.xlane.xlu1 %6864 }
 0x4e6   : > { %v7001_v33 = vadd.f32 %v6969_v35, %v6937_v57  ;;  %v6938_v38 = vmul.f32 0.015625, %v6865_v0 }
 0x4e8   : > { %7034 = vst.msk [vmem:[%s12476_s29 + $0x50] sm:$0xff] %vm7023_vm2, %v7001_v33  ;;  %v7002_v48 = vadd.f32 %v6970_v31, %v6938_v38  ;;  %v6988_v31 = vld [vmem:[%s12642_s4 + $0xe8] sm:$0xff] }
 0x4ea   : > { %7035 = vst.msk [vmem:[%s12476_s29 + $0x58] sm:$0xff] %vm7023_vm2, %v7002_v48  ;;  %v6985_v48 = vld [vmem:[%s12642_s4 + $0xd0] sm:$0xff] }
 0x4eb   : > { %v6868_v7 = vpop.xlane.xlu0 %6867 }
 0x4ec   : > { %v6939_v14 = vmul.f32 0.015625, %v6868_v7 }
 0x4ed   : > { %v6871_v61 = vpop.xlane.xlu1 %6870 }
 0x4ee   : > { %v7003_v24 = vadd.f32 %v6971_v44, %v6939_v14  ;;  %v6940_v2 = vmul.f32 0.015625, %v6871_v61 }
 0x4f0   : > { %7036 = vst.msk [vmem:[%s12476_s29 + $0x60] sm:$0xff] %vm7023_vm2, %v7003_v24  ;;  %v7004_v19 = vadd.f32 %v6972_v58, %v6940_v2  ;;  %v6986_v58 = vld [vmem:[%s12642_s4 + $0xd8] sm:$0xff] }
 0x4f2   : > { %7037 = vst.msk [vmem:[%s12476_s29 + $0x68] sm:$0xff] %vm7023_vm2, %v7004_v19  ;;  %v6989_v19 = vld [vmem:[%s12642_s4 + $0xf0] sm:$0xff] }
 0x4f3   : > { %v6874_v3 = vpop.xlane.xlu0 %6873 }
 0x4f4   : > { %v6941_v6 = vmul.f32 0.015625, %v6874_v3 }
 0x4f5   : > { %v6877_v1 = vpop.xlane.xlu1 %6876 }
 0x4f6   : > { %v7005_v49 = vadd.f32 %v6973_v36, %v6941_v6  ;;  %v6942_v4 = vmul.f32 0.015625, %v6877_v1 }
 0x4f8   : > { %7038 = vst.msk [vmem:[%s12476_s29 + $0x70] sm:$0xff] %vm7023_vm2, %v7005_v49  ;;  %v7006_v28 = vadd.f32 %v6974_v15, %v6942_v4  ;;  %v6990_v15 = vld [vmem:[%s12642_s4 + $0xf8] sm:$0xff] }
 0x4fa   : > { %7039 = vst.msk [vmem:[%s12476_s29 + $0x78] sm:$0xff] %vm7023_vm2, %v7006_v28 }
 0x4fb   : > { %v6880_v39 = vpop.xlane.xlu0 %6879 }
 0x4fc   : > { %v6943_v43 = vmul.f32 0.015625, %v6880_v39 }
 0x4fd   : > { %v6883_v60 = vpop.xlane.xlu1 %6882 }
 0x4fe   : > { %v7007_v16 = vadd.f32 %v6975_v32, %v6943_v43  ;;  %v6944_v8 = vmul.f32 0.015625, %v6883_v60 }
 0x500   : > { %7040 = vst.msk [vmem:[%s12476_s29 + $0x80] sm:$0xff] %vm7023_vm2, %v7007_v16  ;;  %v7008_v47 = vadd.f32 %v6976_v29, %v6944_v8 }
 0x502   : > { %7041 = vst.msk [vmem:[%s12476_s29 + $0x88] sm:$0xff] %vm7023_vm2, %v7008_v47 }
 0x503   : > { %v6886_v11 = vpop.xlane.xlu0 %6885 }
 0x504   : > { %v6945_v54 = vmul.f32 0.015625, %v6886_v11 }
 0x505   : > { %v6889_v56 = vpop.xlane.xlu1 %6888 }
 0x506   : > { %v7009_v50 = vadd.f32 %v6977_v53, %v6945_v54  ;;  %v6946_v45 = vmul.f32 0.015625, %v6889_v56 }
 0x508   : > { %7042 = vst.msk [vmem:[%s12476_s29 + $0x90] sm:$0xff] %vm7023_vm2, %v7009_v50  ;;  %v7010_v62 = vadd.f32 %v6978_v46, %v6946_v45 }
 0x50a   : > { %7043 = vst.msk [vmem:[%s12476_s29 + $0x98] sm:$0xff] %vm7023_vm2, %v7010_v62 }
 0x50b   : > { %v6892_v40 = vpop.xlane.xlu0 %6891 }
 0x50c   : > { %v6947_v12 = vmul.f32 0.015625, %v6892_v40 }
 0x50d   : > { %v6895_v21 = vpop.xlane.xlu1 %6894 }
 0x50e   : > { %v7011_v9 = vadd.f32 %v6979_v34, %v6947_v12  ;;  %v6948_v5 = vmul.f32 0.015625, %v6895_v21 }
 0x510   : > { %7044 = vst.msk [vmem:[%s12476_s29 + $0xa0] sm:$0xff] %vm7023_vm2, %v7011_v9  ;;  %v7012_v18 = vadd.f32 %v6980_v22, %v6948_v5 }
 0x512   : > { %7045 = vst.msk [vmem:[%s12476_s29 + $0xa8] sm:$0xff] %vm7023_vm2, %v7012_v18 }
 0x513   : > { %v6898_v10 = vpop.xlane.xlu0 %6897 }
 0x514   : > { %v6949_v30 = vmul.f32 0.015625, %v6898_v10 }
 0x515   : > { %v6901_v52 = vpop.xlane.xlu1 %6900 }
 0x516   : > { %v7013_v59 = vadd.f32 %v6981_v25, %v6949_v30  ;;  %v6950_v55 = vmul.f32 0.015625, %v6901_v52 }
 0x518   : > { %7046 = vst.msk [vmem:[%s12476_s29 + $0xb0] sm:$0xff] %vm7023_vm2, %v7013_v59  ;;  %v7014_v42 = vadd.f32 %v6982_v37, %v6950_v55 }
 0x51a   : > { %7047 = vst.msk [vmem:[%s12476_s29 + $0xb8] sm:$0xff] %vm7023_vm2, %v7014_v42 }
 0x51b   : > { %v6904_v23 = vpop.xlane.xlu0 %6903 }
 0x51c   : > { %v6951_v51 = vmul.f32 0.015625, %v6904_v23 }
 0x51d   : > { %v6907_v17 = vpop.xlane.xlu1 %6906 }
 0x51e   : > { %v7015_v26 = vadd.f32 %v6983_v20, %v6951_v51  ;;  %v6952_v27 = vmul.f32 0.015625, %v6907_v17 }
 0x51f   : > { %v6916_v35 = vpop.xlane.xlu0 %6915 }
 0x520   : > { %7048 = vst.msk [vmem:[%s12476_s29 + $0xc0] sm:$0xff] %vm7023_vm2, %v7015_v26  ;;  %v7016_v63 = vadd.f32 %v6984_v41, %v6952_v27  ;;  %v6955_v57 = vmul.f32 0.015625, %v6916_v35 }
 0x521   : > { %v6919_v0 = vpop.xlane.xlu1 %6918 }
 0x522   : > { %7049 = vst.msk [vmem:[%s12476_s29 + $0xc8] sm:$0xff] %vm7023_vm2, %v7016_v63  ;;  %v7019_v33 = vadd.f32 %v6987_v13, %v6955_v57  ;;  %v6956_v38 = vmul.f32 0.015625, %v6919_v0 }
 0x523   : > { %v6910_v44 = vpop.xlane.xlu0 %6909 }
 0x524   : > { %7052 = vst.msk [vmem:[%s12476_s29 + $0xe0] sm:$0xff] %vm7023_vm2, %v7019_v33  ;;  %v7020_v7 = vadd.f32 %v6988_v31, %v6956_v38  ;;  %v6953_v14 = vmul.f32 0.015625, %v6910_v44 }
 0x525   : > { %v6913_v61 = vpop.xlane.xlu1 %6912 }
 0x526   : > { %7053 = vst.msk [vmem:[%s12476_s29 + $0xe8] sm:$0xff] %vm7023_vm2, %v7020_v7  ;;  %v7017_v24 = vadd.f32 %v6985_v48, %v6953_v14  ;;  %v6954_v2 = vmul.f32 0.015625, %v6913_v61 }
 0x527   : > { %v6922_v36 = vpop.xlane.xlu0 %6921 }
 0x528   : > { %7050 = vst.msk [vmem:[%s12476_s29 + $0xd0] sm:$0xff] %vm7023_vm2, %v7017_v24  ;;  %v7018_v3 = vadd.f32 %v6986_v58, %v6954_v2  ;;  %v6957_v6 = vmul.f32 0.015625, %v6922_v36 }
 0x529   : > { %v6925_v1 = vpop.xlane.xlu1 %6924 }
 0x52a   : > { %7051 = vst.msk [vmem:[%s12476_s29 + $0xd8] sm:$0xff] %vm7023_vm2, %v7018_v3  ;;  %v7021_v49 = vadd.f32 %v6989_v19, %v6957_v6  ;;  %v6958_v4 = vmul.f32 0.015625, %v6925_v1 }
 0x52c   : > { %7054 = vst.msk [vmem:[%s12476_s29 + $0xf0] sm:$0xff] %vm7023_vm2, %v7021_v49  ;;  %v7022_v28 = vadd.f32 %v6990_v15, %v6958_v4 }
 0x52e   : > { %7055 = vst.msk [vmem:[%s12476_s29 + $0xf8] sm:$0xff] %vm7023_vm2, %v7022_v28 }
 0x52f PF: > { %s17_s21 = sadd.s32 1, %s9651_s21  }
 0x530   : > { %p14_p4 = scmp.ge.s32.totalorder %s17_s21, 4  }
 0x532   :  { %16 = sbr.rel (!%p14_p4) target bundleno = 1 (0x1), region = 85 }

</bundles_post_ra>
